<compile_context>
chip_gen: v7x
topology: tpu7x:2x2x1
jax: 0.10.0
libtpu: 0.0.40
codegen_flags: <defaults>
</compile_context>

<pallas_src>
import math

import jax
import jax.numpy as jnp
from jax.experimental import pallas as pl
from jax.experimental.pallas import tpu as pltpu


def _round_up(x, m):
    return ((x + m - 1) // m) * m


# ------------------------------------------------------------------ kernel ---

def aac_policy_kernel(x_ref, w1_ref, b1_ref,
                      aw2_ref, ab2_ref, vw2_ref, vb2_ref,
                      w3a_ref, w3v_ref, b3_ref, out_ref):
    wdt = w1_ref.dtype

    # Layer 1 (both heads fused along N): cast x on the VPU (hidden under the
    # MXU), f32 accumulate, f32 bias + ReLU.
    x = x_ref[...].astype(wdt)
    h = jnp.dot(x, w1_ref[...], preferred_element_type=jnp.float32)
    h = jnp.maximum(h + b1_ref[...], 0.0)

    # Layer 2 (un-fused): two dense dots on static 128-lane-aligned column
    # slices of h -- no zero-padded block-diagonal matmul.
    k_a = aw2_ref.shape[0]                       # 512 (static)
    h2a = jnp.dot(h[:, :k_a].astype(wdt), aw2_ref[...],
                  preferred_element_type=jnp.float32)
    h2a = jnp.maximum(h2a + ab2_ref[...], 0.0)
    h2v = jnp.dot(h[:, k_a:].astype(wdt), vw2_ref[...],
                  preferred_element_type=jnp.float32)
    h2v = jnp.maximum(h2v + vb2_ref[...], 0.0)

    # Layer 3 (K-split, lane-fused output): actor part (K=256) + critic part
    # (K=128) accumulate into one slim output slab
    # (actor scores in cols [0:A], state value in col A).
    out = (jnp.dot(h2a.astype(wdt), w3a_ref[...],
                   preferred_element_type=jnp.float32)
           + jnp.dot(h2v.astype(wdt), w3v_ref[...],
                     preferred_element_type=jnp.float32)
           + b3_ref[...])
    out_ref[...] = out.astype(out_ref.dtype)


# ----------------------------------------------------------- param packing ---

def pack_params(params, *, use_bf16=True):
    """Pack the two heads for the fused kernel (done once per forward)."""
    wdt = jnp.bfloat16 if use_bf16 else jnp.float32

    aw1, ab1 = params["aw1"], params["ab1"]          # (O,512), (1,512)
    aw2, ab2 = params["aw2"], params["ab2"]          # (512,256), (1,256)
    aw3, ab3 = params["aw3"], params["ab3"]          # (256,A),   (1,A)
    vw1, vb1 = params["vw1"], params["vb1"]          # (O,256), (1,256)
    vw2, vb2 = params["vw2"], params["vb2"]          # (256,128), (1,128)
    vw3, vb3 = params["vw3"], params["vb3"]          # (128,1),   (1,1)

    h2a, h2v = aw2.shape[1], vw2.shape[1]            # 256, 128
    A = aw3.shape[1]
    out_w = _round_up(A + 1, 8)                      # slim f32 output slab

    # Layer 1: simple column concat (one wide dot, both heads).
    w1 = jnp.concatenate([aw1, vw1], axis=1)                       # (O, 768)
    b1 = jnp.concatenate([ab1, vb1], axis=1)                       # (1, 768)

    # Layer 2: kept as two separate dense weights (no zero padding).

    # Layer 3: split along K; actor -> cols [0:A], critic -> col A.
    w3a = jnp.zeros((h2a, out_w), jnp.float32).at[:, :A].set(aw3)  # (256, out_w)
    w3v = jnp.zeros((h2v, out_w), jnp.float32).at[:, A].set(vw3[:, 0])  # (128, out_w)
    b3 = jnp.zeros((1, out_w), jnp.float32)
    b3 = b3.at[:, :A].set(ab3).at[:, A].set(vb3[0, 0])

    return {
        "w1": w1.astype(wdt), "b1": b1,              # biases stay f32
        "aw2": aw2.astype(wdt), "ab2": ab2,
        "vw2": vw2.astype(wdt), "vb2": vb2,
        "w3a": w3a.astype(wdt), "w3v": w3v.astype(wdt), "b3": b3,
        "A": A, "out_w": out_w,
    }


# ---------------------------------------------------------------- wrapper ----

def aac_policy_forward(x, params, *, batch_tile=None, use_bf16=True,
                       vmem_limit_bytes=None):
    """x: (N, O) float32.  Returns (action_scores (N,A), state_values (N,1))."""
    N, O = x.shape
    packed = pack_params(params, use_bf16=use_bf16)
    A, out_w = packed["A"], packed["out_w"]

    # Batch tiling: big enough (512) to amortize the ~0.35 us per-step grid
    # overhead, but clamped to ceil(N/2) so there are always >=2 grid steps
    # and both v7x TensorCores get work.  Always a multiple of 8 sublanes.
    if batch_tile is None:
        if N <= 8:
            batch_tile = 8
        else:
            half = _round_up((N + 1) // 2, 8)
            batch_tile = max(8, min(512, half))
    batch_tile = max(8, _round_up(batch_tile, 8))

    grid = pl.cdiv(N, batch_tile)   # ragged N: Pallas masks the trailing block

    weights = (packed["w1"], packed["b1"],
               packed["aw2"], packed["ab2"],
               packed["vw2"], packed["vb2"],
               packed["w3a"], packed["w3v"], packed["b3"])

    # Weights: constant index_map -> fetched once, VMEM-resident across steps.
    def resident(shape):
        return pl.BlockSpec(shape, lambda i: (0, 0))

    in_specs = [pl.BlockSpec((batch_tile, O), lambda i: (i, 0))]
    in_specs += [resident(tuple(w.shape)) for w in weights]
    out_specs = pl.BlockSpec((batch_tile, out_w), lambda i: (i, 0))

    # Rough per-step VMEM estimate: weights + double-buffered I/O tiles +
    # f32 intermediates (+ bf16 dot-input copies).
    w_bytes = sum(int(w.size) * w.dtype.itemsize for w in weights)
    h_width = (packed["w1"].shape[1] + packed["aw2"].shape[1]
               + packed["vw2"].shape[1] + out_w)
    act_bytes = batch_tile * (2 * O * x.dtype.itemsize       # in tile, 2 bufs
                              + 2 * out_w * 4                # out tile, 2 bufs
                              + h_width * 4                  # f32 intermediates
                              + h_width * 2)                 # bf16 dot inputs
    est = w_bytes + act_bytes

    cp_kwargs = dict(dimension_semantics=("parallel",))
    # Generation-aware gate: trigger below v5e's 16 MiB default scoped limit,
    # cap inside v7x's 64 MiB physical VMEM.
    if vmem_limit_bytes is None and est > 14 * 1024 * 1024:
        vmem_limit_bytes = min(int(est * 1.5), 48 * 1024 * 1024)
    if vmem_limit_bytes is not None:
        cp_kwargs["vmem_limit_bytes"] = int(vmem_limit_bytes)

    # Advisory cost estimate for XLA's scheduler.
    macs_per_row = (O * 768 + 512 * 256 + 256 * 128
                    + 256 * out_w + 128 * out_w)
    cost = pl.CostEstimate(
        flops=2 * N * macs_per_row,
        transcendentals=0,
        bytes_accessed=int(x.size) * x.dtype.itemsize + w_bytes + N * out_w * 4,
    )

    out = pl.pallas_call(
        aac_policy_kernel,
        grid_spec=pltpu.PrefetchScalarGridSpec(
            num_scalar_prefetch=0,
            grid=(grid,),
            in_specs=in_specs,
            out_specs=out_specs,
        ),
        out_shape=jax.ShapeDtypeStruct((N, out_w), jnp.float32),
        compiler_params=pltpu.CompilerParams(**cp_kwargs),
        cost_estimate=cost,
    )(x, *weights)

    action_scores = out[:, :A]
    state_values = out[:, A:A + 1]
    return action_scores, state_values


# ------------------------------------------------------- init & reference ----

def init_params(key, in_features, out_actions):
    """Deterministic init mimicking PyTorch nn.Linear default U(-1/sqrt(fan_in), +)."""
    dims_actions = [(in_features, 512), (512, 256), (256, out_actions)]
    dims_values = [(in_features, 256), (256, 128), (128, 1)]
    params = {}
    keys = jax.random.split(key, 12)
    k = 0
    for prefix, dims in (("a", dims_actions), ("v", dims_values)):
        for li, (fan_in, fan_out) in enumerate(dims, start=1):
            bound = 1.0 / math.sqrt(fan_in)
            w = jax.random.uniform(keys[k], (fan_in, fan_out),
                                   minval=-bound, maxval=bound, dtype=jnp.float32)
            k += 1
            b = jax.random.uniform(keys[k], (1, fan_out),
                                   minval=-bound, maxval=bound, dtype=jnp.float32)
            k += 1
            params[f"{prefix}w{li}"] = w
            params[f"{prefix}b{li}"] = b
    return params


def reference_forward(x, params):
    """Pure-JAX f32 reference of the PyTorch forward pass."""
    h = jnp.maximum(x @ params["aw1"] + params["ab1"], 0.0)
    h = jnp.maximum(h @ params["aw2"] + params["ab2"], 0.0)
    act = h @ params["aw3"] + params["ab3"]
    g = jnp.maximum(x @ params["vw1"] + params["vb1"], 0.0)
    g = jnp.maximum(g @ params["vw2"] + params["vb2"], 0.0)
    val = g @ params["vw3"] + params["vb3"]
    return act, val


# ------------------------------------------------------------------- main ----

if __name__ == "__main__":
    key = jax.random.PRNGKey(0)
    k_params, k_x = jax.random.split(key)

    N = 512           # batch size (2 grid steps at batch_tile=256)
    in_features = 16  # observation dim O
    out_actions = 4   # number of actions A

    params = init_params(k_params, in_features, out_actions)
    x = jax.random.normal(k_x, (N, in_features), dtype=jnp.float32)

    act_ref, val_ref = reference_forward(x, params)

    # Exact f32 path: verifies the fused/split kernel math.
    act32, val32 = aac_policy_forward(x, params, use_bf16=False)
    act32 = jax.block_until_ready(act32)
    val32 = jax.block_until_ready(val32)
    assert act32.shape == (N, out_actions)
    assert val32.shape == (N, 1)
    assert jnp.allclose(act32, act_ref, atol=1e-4, rtol=1e-4)
    assert jnp.allclose(val32, val_ref, atol=1e-4, rtol=1e-4)

    # Default fast path: bf16 matmul inputs, f32 accumulation.
    act, val = aac_policy_forward(x, params)
    act = jax.block_until_ready(act)
    val = jax.block_until_ready(val)
    assert act.shape == (N, out_actions)
    assert val.shape == (N, 1)
    assert jnp.allclose(act, act_ref, atol=5e-2, rtol=5e-2)
    assert jnp.allclose(val, val_ref, atol=5e-2, rtol=5e-2)

    # Ragged batch (N not a multiple of the tile): exercises the no-pad
    # trailing-block masking path.
    Nr = 300
    xr = x[:Nr]
    actr, valr = aac_policy_forward(xr, params, use_bf16=False)
    actr = jax.block_until_ready(actr)
    valr = jax.block_until_ready(valr)
    assert actr.shape == (Nr, out_actions)
    assert valr.shape == (Nr, 1)
    assert jnp.allclose(actr, act_ref[:Nr], atol=1e-4, rtol=1e-4)
    assert jnp.allclose(valr, val_ref[:Nr], atol=1e-4, rtol=1e-4)

    print("KERNEL_OK")
</pallas_src>

<mosaic_0001>
module attributes {stable_mosaic.version = 11 : i64} {
  func.func @aac_policy_kernel(%arg0: i32, %arg1: memref<256x16xf32, #tpu.memory_space<vmem>>, %arg2: memref<16x768xf32, #tpu.memory_space<vmem>>, %arg3: memref<1x768xf32, #tpu.memory_space<vmem>>, %arg4: memref<512x256xf32, #tpu.memory_space<vmem>>, %arg5: memref<1x256xf32, #tpu.memory_space<vmem>>, %arg6: memref<256x128xf32, #tpu.memory_space<vmem>>, %arg7: memref<1x128xf32, #tpu.memory_space<vmem>>, %arg8: memref<256x8xf32, #tpu.memory_space<vmem>>, %arg9: memref<128x8xf32, #tpu.memory_space<vmem>>, %arg10: memref<1x8xf32, #tpu.memory_space<vmem>>, %arg11: memref<256x8xf32, #tpu.memory_space<vmem>>) attributes {dimension_semantics = [#tpu.dimension_semantics<parallel>], iteration_bounds = array<i64: 2>, scalar_prefetch = 0 : i64, scratch_operands = 0 : i64, tpu.core_type = #tpu.core_type<tc>, window_params = [{transform_indices = @transform_0, window_bounds = array<i64: 256, 16>}, {pipeline_mode = #tpu.pipeline_mode<synchronous>, transform_indices = @transform_1, window_bounds = array<i64: 16, 768>}, {pipeline_mode = #tpu.pipeline_mode<synchronous>, transform_indices = @transform_2, window_bounds = array<i64: 1, 768>}, {pipeline_mode = #tpu.pipeline_mode<synchronous>, transform_indices = @transform_3, window_bounds = array<i64: 512, 256>}, {pipeline_mode = #tpu.pipeline_mode<synchronous>, transform_indices = @transform_4, window_bounds = array<i64: 1, 256>}, {pipeline_mode = #tpu.pipeline_mode<synchronous>, transform_indices = @transform_5, window_bounds = array<i64: 256, 128>}, {pipeline_mode = #tpu.pipeline_mode<synchronous>, transform_indices = @transform_6, window_bounds = array<i64: 1, 128>}, {pipeline_mode = #tpu.pipeline_mode<synchronous>, transform_indices = @transform_7, window_bounds = array<i64: 256, 8>}, {pipeline_mode = #tpu.pipeline_mode<synchronous>, transform_indices = @transform_8, window_bounds = array<i64: 128, 8>}, {pipeline_mode = #tpu.pipeline_mode<synchronous>, transform_indices = @transform_9, window_bounds = array<i64: 1, 8>}, {transform_indices = @transform_10, window_bounds = array<i64: 256, 8>}]} {
    %c0 = arith.constant 0 : index
    %c0_0 = arith.constant 0 : index
    %0 = vector.load %arg1[%c0, %c0_0] : memref<256x16xf32, #tpu.memory_space<vmem>>, vector<256x16xf32>
    %c0_1 = arith.constant 0 : index
    %c0_2 = arith.constant 0 : index
    %1 = vector.load %arg2[%c0_1, %c0_2] : memref<16x768xf32, #tpu.memory_space<vmem>>, vector<16x768xf32>
    %cst = arith.constant dense<0.000000e+00> : vector<256x768xf32>
    %2 = tpu.matmul %0, %1, %cst {dimension_numbers = #tpu.dot_dimension_numbers<[1], [0], [0], [1], [0, 0, 1, 1], [], []>} : vector<256x16xf32>, vector<16x768xf32>, vector<256x768xf32> -> vector<256x768xf32>
    %c0_3 = arith.constant 0 : index
    %c0_4 = arith.constant 0 : index
    %3 = vector.load %arg3[%c0_3, %c0_4] : memref<1x768xf32, #tpu.memory_space<vmem>>, vector<1x768xf32>
    %4 = vector.broadcast %3 : vector<1x768xf32> to vector<256x768xf32>
    %5 = arith.addf %2, %4 : vector<256x768xf32>
    %cst_5 = arith.constant 0.000000e+00 : f32
    %6 = vector.broadcast %cst_5 : f32 to vector<256x768xf32>
    %7 = arith.maximumf %5, %6 : vector<256x768xf32>
    %8 = vector.extract_strided_slice %7 {offsets = [0, 0], sizes = [256, 512], strides = [1, 1]} : vector<256x768xf32> to vector<256x512xf32>
    %c0_6 = arith.constant 0 : index
    %c0_7 = arith.constant 0 : index
    %9 = vector.load %arg4[%c0_6, %c0_7] : memref<512x256xf32, #tpu.memory_space<vmem>>, vector<512x256xf32>
    %cst_8 = arith.constant dense<0.000000e+00> : vector<256x256xf32>
    %10 = tpu.matmul %8, %9, %cst_8 {dimension_numbers = #tpu.dot_dimension_numbers<[1], [0], [0], [1], [0, 0, 1, 1], [], []>} : vector<256x512xf32>, vector<512x256xf32>, vector<256x256xf32> -> vector<256x256xf32>
    %c0_9 = arith.constant 0 : index
    %c0_10 = arith.constant 0 : index
    %11 = vector.load %arg5[%c0_9, %c0_10] : memref<1x256xf32, #tpu.memory_space<vmem>>, vector<1x256xf32>
    %12 = vector.broadcast %11 : vector<1x256xf32> to vector<256x256xf32>
    %13 = arith.addf %10, %12 : vector<256x256xf32>
    %cst_11 = arith.constant 0.000000e+00 : f32
    %14 = vector.broadcast %cst_11 : f32 to vector<256x256xf32>
    %15 = arith.maximumf %13, %14 : vector<256x256xf32>
    %16 = vector.extract_strided_slice %7 {offsets = [0, 512], sizes = [256, 256], strides = [1, 1]} : vector<256x768xf32> to vector<256x256xf32>
    %c0_12 = arith.constant 0 : index
    %c0_13 = arith.constant 0 : index
    %17 = vector.load %arg6[%c0_12, %c0_13] : memref<256x128xf32, #tpu.memory_space<vmem>>, vector<256x128xf32>
    %cst_14 = arith.constant dense<0.000000e+00> : vector<256x128xf32>
    %18 = tpu.matmul %16, %17, %cst_14 {dimension_numbers = #tpu.dot_dimension_numbers<[1], [0], [0], [1], [0, 0, 1, 1], [], []>} : vector<256x256xf32>, vector<256x128xf32>, vector<256x128xf32> -> vector<256x128xf32>
    %c0_15 = arith.constant 0 : index
    %c0_16 = arith.constant 0 : index
    %19 = vector.load %arg7[%c0_15, %c0_16] : memref<1x128xf32, #tpu.memory_space<vmem>>, vector<1x128xf32>
    %20 = vector.broadcast %19 : vector<1x128xf32> to vector<256x128xf32>
    %21 = arith.addf %18, %20 : vector<256x128xf32>
    %cst_17 = arith.constant 0.000000e+00 : f32
    %22 = vector.broadcast %cst_17 : f32 to vector<256x128xf32>
    %23 = arith.maximumf %21, %22 : vector<256x128xf32>
    %c0_18 = arith.constant 0 : index
    %c0_19 = arith.constant 0 : index
    %24 = vector.load %arg8[%c0_18, %c0_19] : memref<256x8xf32, #tpu.memory_space<vmem>>, vector<256x8xf32>
    %cst_20 = arith.constant dense<0.000000e+00> : vector<256x8xf32>
    %25 = tpu.matmul %15, %24, %cst_20 {dimension_numbers = #tpu.dot_dimension_numbers<[1], [0], [0], [1], [0, 0, 1, 1], [], []>} : vector<256x256xf32>, vector<256x8xf32>, vector<256x8xf32> -> vector<256x8xf32>
    %c0_21 = arith.constant 0 : index
    %c0_22 = arith.constant 0 : index
    %26 = vector.load %arg9[%c0_21, %c0_22] : memref<128x8xf32, #tpu.memory_space<vmem>>, vector<128x8xf32>
    %cst_23 = arith.constant dense<0.000000e+00> : vector<256x8xf32>
    %27 = tpu.matmul %23, %26, %cst_23 {dimension_numbers = #tpu.dot_dimension_numbers<[1], [0], [0], [1], [0, 0, 1, 1], [], []>} : vector<256x128xf32>, vector<128x8xf32>, vector<256x8xf32> -> vector<256x8xf32>
    %28 = arith.addf %25, %27 : vector<256x8xf32>
    %c0_24 = arith.constant 0 : index
    %c0_25 = arith.constant 0 : index
    %29 = vector.load %arg10[%c0_24, %c0_25] : memref<1x8xf32, #tpu.memory_space<vmem>>, vector<1x8xf32>
    %30 = vector.broadcast %29 : vector<1x8xf32> to vector<256x8xf32>
    %31 = arith.addf %28, %30 : vector<256x8xf32>
    %c0_26 = arith.constant 0 : index
    %c0_27 = arith.constant 0 : index
    %32 = vector.load %arg11[%c0_26, %c0_27] : memref<256x8xf32, #tpu.memory_space<vmem>>, vector<256x8xf32>
    tpu.vector_store %arg11[%c0_26, %c0_27], %31 {strides = array<i32>} : memref<256x8xf32, #tpu.memory_space<vmem>>, vector<256x8xf32>,
    return
  }
  func.func @transform_0(%arg0: i32) -> (i32, i32) {
    %c0_i32 = arith.constant 0 : i32
    %c0_i32_0 = arith.constant 0 : i32
    return %arg0, %c0_i32 : i32, i32
  }
  func.func @transform_1(%arg0: i32) -> (i32, i32) {
    %c0_i32 = arith.constant 0 : i32
    %c0_i32_0 = arith.constant 0 : i32
    %c0_i32_1 = arith.constant 0 : i32
    return %c0_i32, %c0_i32_0 : i32, i32
  }
  func.func @transform_2(%arg0: i32) -> (i32, i32) {
    %c0_i32 = arith.constant 0 : i32
    %c0_i32_0 = arith.constant 0 : i32
    %c0_i32_1 = arith.constant 0 : i32
    return %c0_i32, %c0_i32_0 : i32, i32
  }
  func.func @transform_3(%arg0: i32) -> (i32, i32) {
    %c0_i32 = arith.constant 0 : i32
    %c0_i32_0 = arith.constant 0 : i32
    %c0_i32_1 = arith.constant 0 : i32
    return %c0_i32, %c0_i32_0 : i32, i32
  }
  func.func @transform_4(%arg0: i32) -> (i32, i32) {
    %c0_i32 = arith.constant 0 : i32
    %c0_i32_0 = arith.constant 0 : i32
    %c0_i32_1 = arith.constant 0 : i32
    return %c0_i32, %c0_i32_0 : i32, i32
  }
  func.func @transform_5(%arg0: i32) -> (i32, i32) {
    %c0_i32 = arith.constant 0 : i32
    %c0_i32_0 = arith.constant 0 : i32
    %c0_i32_1 = arith.constant 0 : i32
    return %c0_i32, %c0_i32_0 : i32, i32
  }
  func.func @transform_6(%arg0: i32) -> (i32, i32) {
    %c0_i32 = arith.constant 0 : i32
    %c0_i32_0 = arith.constant 0 : i32
    %c0_i32_1 = arith.constant 0 : i32
    return %c0_i32, %c0_i32_0 : i32, i32
  }
  func.func @transform_7(%arg0: i32) -> (i32, i32) {
    %c0_i32 = arith.constant 0 : i32
    %c0_i32_0 = arith.constant 0 : i32
    %c0_i32_1 = arith.constant 0 : i32
    return %c0_i32, %c0_i32_0 : i32, i32
  }
  func.func @transform_8(%arg0: i32) -> (i32, i32) {
    %c0_i32 = arith.constant 0 : i32
    %c0_i32_0 = arith.constant 0 : i32
    %c0_i32_1 = arith.constant 0 : i32
    return %c0_i32, %c0_i32_0 : i32, i32
  }
  func.func @transform_9(%arg0: i32) -> (i32, i32) {
    %c0_i32 = arith.constant 0 : i32
    %c0_i32_0 = arith.constant 0 : i32
    %c0_i32_1 = arith.constant 0 : i32
    return %c0_i32, %c0_i32_0 : i32, i32
  }
  func.func @transform_10(%arg0: i32) -> (i32, i32) {
    %c0_i32 = arith.constant 0 : i32
    %c0_i32_0 = arith.constant 0 : i32
    return %arg0, %c0_i32 : i32, i32
  }
}

</mosaic_0001>

<bundles_post_ra>
// kernel: tpu_custom_call.1
= control target key start
LH: loop header
LB: loop body
LE: loop exit
PB: predicated region body
PF: predicated region fallthrough
CT: control target
= control target key end

     0   :  { %15 = vsyncpa [#allocation3], 0  ;;  %s3927_s13 = smov 0   ;;  %s5274_s0 = inlined_call_operand.vmem [shape: f32[512,16], index: 0, kind: input, shape index: {}]   ;;  %s5275_s1 = inlined_call_operand.vmem [shape: f32[16,768], index: 1, kind: input, shape index: {}]   ;;  %s5276_s2 = inlined_call_operand.vmem [shape: f32[1,768], index: 2, kind: input, shape index: {}]   ;;  %s5277_s3 = inlined_call_operand.hbm [shape: f32[512,256], index: 3, kind: input, shape index: {}]   ;;  %s5278_s4 = inlined_call_operand.vmem [shape: f32[1,256], index: 4, kind: input, shape index: {}]   ;;  %s5279_s5 = inlined_call_operand.vmem [shape: f32[256,128], index: 5, kind: input, shape index: {}]   ;;  %s5280_s6 = inlined_call_operand.vmem [shape: f32[1,128], index: 6, kind: input, shape index: {}]   ;;  %s5281_s7 = inlined_call_operand.vmem [shape: f32[256,8], index: 7, kind: input, shape index: {}]   ;;  %s5282_s8 = inlined_call_operand.vmem [shape: f32[128,8], index: 8, kind: input, shape index: {}]   ;;  %s5283_s9 = inlined_call_operand.vmem [shape: f32[1,8], index: 9, kind: input, shape index: {}]   ;;  %s5284_s10 = inlined_call_operand.vmem [shape: f32[512,8], index: 10, kind: output, shape index: {}]  }
   0x1 LB: > { %s3166_s14 = sadd.s32 4294967295, %s3865_s13   ;;  %p3168_p0 = scmp.ge.s32.totalorder %s3865_s13, 1  ;;  %s3865_s13 = sphi %s3927_s13, %s21_s13  }
   0x2   : > { %p267_p1 = scmp.lt.s32.totalorder %s3865_s13, 3  ;;  %s3867_s15 = smov [#allocation2]  }
   0x3   : > { %s285_s16 = sshll.u32 %s3867_s15, 4  ;;  %p3941_p3 = scmp.eq.s32.totalorder %s3166_s14, 0  ;;  %s286_s16 = int_to_ptr.vmem [resolvable:$true] %s285_s16 }
   0x4   : > { %p3935_p2 = pnand %p3168_p0, %p267_p1  ;;  %s3827_s22 = scalar_lea.hbm %s5277_s3, 16384 }
   0x5   : > { %s5295_s18 = scalar_select %p3941_p3, 1, 0 }
   0x6   : > { %s5294_s17 = scalar_select %p3935_p2, 1, 0 }
   0x7   : > { %p3807_p4 = pneg %p3935_p2  ;;  %p3828_p6 = scmp.ne.s32.totalorder %s5277_s3, %s3827_s22 }
   0x8   : > { %p3834_p10 = scmp.lt.u32.totalorder %s3827_s22, %s5277_s3 }
   0x9   : > { %p3949_p5 = pnand %p3941_p3, %p3807_p4 }
   0xb   : > { %p3829_p7 = pneg %p3949_p5 }
   0xd   : > { %p3830_p8 = pnand %p3829_p7, %p3828_p6 }
   0xf   : > { %p3831_p9 = pneg %p3830_p8 }
  0x11   : > { %p3836_p11 = pnand %p3834_p10, %p3831_p9 }
  0x13   : > { %3839 = shalt.err (!%p3836_p11)
}
  0x14   : > { %s3840_s27 = scalar_lea.vmem %s286_s16, 16384  ;;  %p3848_p1 = scmp.lt.s32.totalorder %s286_s16, %s286_s16 }
  0x15   : > { %p3841_p12 = scmp.ne.s32.totalorder %s286_s16, %s3840_s27  ;;  %p3849_p4 = scmp.lt.s32.totalorder %s3840_s27, %s3840_s27 }
  0x17   : > { %p3843_p13 = pnand %p3841_p12, %p3829_p7  ;;  %p3850_p3 = por %p3849_p4, %p3848_p1 }
  0x19   : > { %p3844_p0 = pneg %p3843_p13 }
  0x1b   : > { %p3851_p2 = pnand %p3850_p3, %p3844_p0 }
  0x1d   : > { %3854 = shalt.err (!%p3851_p2)
}
  0x1e   : > { %s3868_s28 = smov 256   ;;  %s3869_s29 = smov 16  }
  0x1f   : > { %3810 = dma.hbm_to_vmem [thread:$0]  (!%p3949_p5), %s5277_s3, 16384, %s286_s16, [#allocation3], %s3868_s28, %s3868_s28, %s3869_s29  }
  0x20   : > { %p5297_p6 = scmp.ne.s32.totalorder %s5294_s17, 0 }
  0x22   : > { %328 = sbr.rel (%p5297_p6) target bundleno = 987 (0x3db), region = 60 }
  0x29   : > { %p5298_p8 = scmp.ne.s32.totalorder %s5295_s18, 0 }
  0x2b   : > { %3860 = dma.done.wait (%p5298_p8), [#allocation3], 16384  }
  0x2c   : > { %3862 = vsyncadd (%p5298_p8), [#allocation3], 4294950912  ;;  %s3173_s12 = sshll.u32 %s3166_s14, 5  ;;  %v3870_v0 = vmov 0.0   ;;  %v411_v1 = vld [vmem:[%s5275_s1 + $0x8] sm:$0xff]  ;;  %v417_v2 = vld [vmem:[%s5275_s1 + $0x38] sm:$0xff] }
  0x2d   : > { %615 = vmatprep.mubr.f32.mxu0 %v3870_v0  ;;  %p367_p2 = scmp.lt.s32.totalorder %s3173_s12, 63  ;;  %920 = vmatprep.mubr.f32.mxu1 %v3870_v0  ;;  %v410_v3 = vld [vmem:[%s5275_s1] sm:$0xff]  ;;  %v3405_v4 = vpack.c.bf16 %v417_v2, %v411_v1  ;;  %v416_v5 = vld [vmem:[%s5275_s1 + $0x30] sm:$0xff]  ;;  %v413_v6 = vld [vmem:[%s5275_s1 + $0x18] sm:$0xff]  ;;  %vm454_vm0 = vcmask 130048   ;;  %vm3065_vm1 = vcmask 64512  }
  0x2e   : > { %v3407_v7 = vpack.c.bf16 %v416_v5, %v410_v3  ;;  %v419_v8 = vld [vmem:[%s5275_s1 + $0x48] sm:$0xff]  ;;  %v412_v9 = vld [vmem:[%s5275_s1 + $0x10] sm:$0xff]  ;;  %v418_v10 = vld [vmem:[%s5275_s1 + $0x40] sm:$0xff] }
  0x2f   : > { %s5317_s12 = smov (!%p367_p2, %s3173_s12), 63  ;;  %3406 = vmatprep.subr.bf16.mxu0 %v3405_v4  ;;  %v3409_v11 = vpack.c.bf16 %v419_v8, %v413_v6  ;;  %v3411_v12 = vpack.c.bf16 %v418_v10, %v412_v9  ;;  %v415_v18 = vld [vmem:[%s5275_s1 + $0x28] sm:$0xff]  ;;  %v421_v19 = vld [vmem:[%s5275_s1 + $0x58] sm:$0xff]  ;;  %v1514_v32 = vld [vmem:[#allocation2] sm:$0xff] }
  0x30   : > { %s3174_s15 = sshll.u32 %s5317_s12, 3  ;;  %3408 = vmatpush1.bf16.msra.mxu0 %v3407_v7  ;;  %v3413_v20 = vpack.c.bf16 %v421_v19, %v415_v18  ;;  %v1515_v29 = vld [vmem:[#allocation2 + $0x8] sm:$0xff]  ;;  %v1517_v30 = vld [vmem:[#allocation2 + $0x18] sm:$0xff]  ;;  %v1516_v33 = vld [vmem:[#allocation2 + $0x10] sm:$0xff] }
  0x31   : > { %s3999_s25 = scalar_lea.vmem %s5274_s0, %s3174_s15  ;;  %3410 = vmatprep.subr.bf16.mxu0 %v3409_v11  ;;  %3673 = vmatprep.subr.bf16.mxu1 %v3409_v11  ;;  %v3417_v31 = vpack.c.bf16 %v1517_v30, %v1515_v29  ;;  %v3419_v36 = vpack.c.bf16 %v1516_v33, %v1514_v32  ;;  %v1519_v37 = vld [vmem:[#allocation2 + $0x28] sm:$0xff]  ;;  %v1521_v38 = vld [vmem:[#allocation2 + $0x38] sm:$0xff]  ;;  %v1518_v40 = vld [vmem:[#allocation2 + $0x20] sm:$0xff]  ;;  %s5173_s27 = scalar_lea.vmem %s5284_s10, %s3174_s15 }
  0x32   : > { %v4014_v13 = vld [vmem:[%s3999_s25] sm:$0xff]  ;;  %3674 = vmatpush1.bf16.msra.mxu1 %v3411_v12  ;;  %v4020_v14 = vld [vmem:[%s3999_s25 + $0x8] sm:$0xff]  ;;  %v4032_v16 = vld [vmem:[%s3999_s25 + $0x10] sm:$0xff]  ;;  %v3421_v39 = vpack.c.bf16 %v1521_v38, %v1519_v37 }
  0x33   : > { %3177 = vmatmul.mubr.msk.f32.vlgmr.msra.gmra.mrb[0].mxu0 %vm454_vm0, %v4014_v13  ;;  %v4023_v15 = vld [vmem:[%s3999_s25 + $0x40] sm:$0xff]  ;;  %v4035_v17 = vld [vmem:[%s3999_s25 + $0x48] sm:$0xff]  ;;  %v4050_v21 = vld [vmem:[%s3999_s25 + $0x18] sm:$0xff]  ;;  %3418 = vmatprep.subr.bf16.mxu1 %v3417_v31 }
  0x34   : > { %3412 = vmatpush1.bf16.msra.mxu0 %v3411_v12  ;;  %621 = vmatprep.mubr.f32.mxu0 %v3870_v0  ;;  %v4053_v22 = vld [vmem:[%s3999_s25 + $0x50] sm:$0xff]  ;;  %v4062_v23 = vld [vmem:[%s3999_s25 + $0x20] sm:$0xff]  ;;  %v4065_v24 = vld [vmem:[%s3999_s25 + $0x58] sm:$0xff] }
  0x35   : > { %3217 = vmatmul.mubr.msk.f32.vlgmr.msra.gmra.mrb[0].mxu1 %vm454_vm0, %v4023_v15  ;;  %3414 = vmatprep.subr.bf16.mxu0 %v3413_v20  ;;  %v4074_v25 = vld [vmem:[%s3999_s25 + $0x28] sm:$0xff]  ;;  %v4077_v26 = vld [vmem:[%s3999_s25 + $0x60] sm:$0xff]  ;;  %v4086_v27 = vld [vmem:[%s3999_s25 + $0x30] sm:$0xff] }
  0x36   : > { %926 = vmatprep.mubr.f32.mxu1 %v3870_v0  ;;  %v4089_v28 = vld [vmem:[%s3999_s25 + $0x68] sm:$0xff]  ;;  %v4098_v34 = vld [vmem:[%s3999_s25 + $0x38] sm:$0xff]  ;;  %v4101_v35 = vld [vmem:[%s3999_s25 + $0x70] sm:$0xff]  ;;  %3420 = vmatpush1.bf16.msra.mxu1 %v3419_v36 }
  0x37   : > { %3178 = vmatmul.mubr.msk.f32.gmra.mrb[2].mxu0 %vm454_vm0, %v4020_v14  ;;  %v1520_v41 = vld [vmem:[#allocation2 + $0x30] sm:$0xff]  ;;  %v4110_v42 = vld [vmem:[%s3999_s25 + $0x78] sm:$0xff]  ;;  %3422 = vmatprep.subr.bf16.mxu1 %v3421_v39  ;;  %v1523_v44 = vld [vmem:[#allocation2 + $0x48] sm:$0xff] }
  0x38   : > { %627 = vmatprep.mubr.f32.mxu0 %v3870_v0  ;;  %v3423_v43 = vpack.c.bf16 %v1520_v41, %v1518_v40  ;;  %v1525_v45 = vld [vmem:[#allocation2 + $0x58] sm:$0xff]  ;;  %v1522_v47 = vld [vmem:[#allocation2 + $0x40] sm:$0xff]  ;;  %v1524_v48 = vld [vmem:[#allocation2 + $0x50] sm:$0xff] }
  0x39   : > { %3218 = vmatmul.mubr.msk.f32.gmra.mrb[2].mxu1 %vm454_vm0, %v4035_v17  ;;  %v3425_v46 = vpack.c.bf16 %v1525_v45, %v1523_v44  ;;  %v4119_v49 = vld [vmem:[%s3999_s25 + $0x80] sm:$0xff]  ;;  %v3427_v50 = vpack.c.bf16 %v1524_v48, %v1522_v47  ;;  %v1527_v51 = vld [vmem:[#allocation2 + $0x68] sm:$0xff]  ;;  %v1529_v52 = vld [vmem:[#allocation2 + $0x78] sm:$0xff] }
  0x3a   : > { %932 = vmatprep.mubr.f32.mxu1 %v3870_v0  ;;  %3424 = vmatpush1.bf16.msra.mxu1 %v3423_v43  ;;  %v3429_v53 = vpack.c.bf16 %v1529_v52, %v1527_v51  ;;  %v1526_v54 = vld [vmem:[#allocation2 + $0x60] sm:$0xff]  ;;  %v1528_v55 = vld [vmem:[#allocation2 + $0x70] sm:$0xff]  ;;  %v4128_v56 = vld [vmem:[%s3999_s25 + $0x88] sm:$0xff] }
  0x3b   : > { %3179 = vmatmul.mubr.msk.f32.gmra.mrb[4].mxu0 %vm454_vm0, %v4032_v16  ;;  %3426 = vmatprep.subr.bf16.mxu1 %v3425_v46  ;;  %v3431_v57 = vpack.c.bf16 %v1528_v55, %v1526_v54  ;;  %v1531_v58 = vld [vmem:[#allocation2 + $0x88] sm:$0xff]  ;;  %v1533_v59 = vld [vmem:[#allocation2 + $0x98] sm:$0xff]  ;;  %v1530_v61 = vld [vmem:[#allocation2 + $0x80] sm:$0xff] }
  0x3c   : > { %633 = vmatprep.mubr.f32.mxu0 %v3870_v0  ;;  %v3433_v60 = vpack.c.bf16 %v1533_v59, %v1531_v58  ;;  %v1532_v62 = vld [vmem:[#allocation2 + $0x90] sm:$0xff]  ;;  %v1535_v2 = vld [vmem:[#allocation2 + $0xa8] sm:$0xff]  ;;  %v1537_v3 = vld [vmem:[#allocation2 + $0xb8] sm:$0xff] }
  0x3d   : > { %3219 = vmatmul.mubr.msk.f32.gmra.mrb[4].mxu1 %vm454_vm0, %v4053_v22  ;;  %v4137_v63 = vld [vmem:[%s3999_s25 + $0x90] sm:$0xff]  ;;  %v3435_v1 = vpack.c.bf16 %v1532_v62, %v1530_v61  ;;  %v3437_v4 = vpack.c.bf16 %v1537_v3, %v1535_v2  ;;  %v1534_v5 = vld [vmem:[#allocation2 + $0xa0] sm:$0xff]  ;;  %v4146_v7 = vld [vmem:[%s3999_s25 + $0x98] sm:$0xff] }
  0x3e   : > { %938 = vmatprep.mubr.f32.mxu1 %v3870_v0  ;;  %3428 = vmatpush1.bf16.msra.mxu1 %v3427_v50  ;;  %v1536_v6 = vld [vmem:[#allocation2 + $0xb0] sm:$0xff]  ;;  %v1539_v9 = vld [vmem:[#allocation2 + $0xc8] sm:$0xff]  ;;  %v1541_v10 = vld [vmem:[#allocation2 + $0xd8] sm:$0xff] }
  0x3f   : > { %3180 = vmatmul.mubr.msk.f32.gmra.mrb[6].mxu0 %vm454_vm0, %v4050_v21  ;;  %3430 = vmatprep.subr.bf16.mxu1 %v3429_v53  ;;  %v3439_v8 = vpack.c.bf16 %v1536_v6, %v1534_v5  ;;  %v3441_v11 = vpack.c.bf16 %v1541_v10, %v1539_v9  ;;  %v1538_v12 = vld [vmem:[#allocation2 + $0xc0] sm:$0xff]  ;;  %v1540_v18 = vld [vmem:[#allocation2 + $0xd0] sm:$0xff]  ;;  %v1543_v29 = vld [vmem:[#allocation2 + $0xe8] sm:$0xff] }
  0x40   : > { %639 = vmatprep.mubr.f32.mxu0 %v3870_v0  ;;  %v4155_v19 = vld [vmem:[%s3999_s25 + $0xa0] sm:$0xff]  ;;  %v3443_v20 = vpack.c.bf16 %v1540_v18, %v1538_v12  ;;  %v1545_v30 = vld [vmem:[#allocation2 + $0xf8] sm:$0xff]  ;;  %v1544_v33 = vld [vmem:[#allocation2 + $0xf0] sm:$0xff] }
  0x41   : > { %3220 = vmatmul.mubr.msk.f32.gmra.mrb[6].mxu1 %vm454_vm0, %v4065_v24  ;;  %v3445_v31 = vpack.c.bf16 %v1545_v30, %v1543_v29  ;;  %v1542_v32 = vld [vmem:[#allocation2 + $0xe0] sm:$0xff]  ;;  %v4164_v36 = vld [vmem:[%s3999_s25 + $0xa8] sm:$0xff]  ;;  %v1549_v39 = vld [vmem:[#allocation2 + $0x118] sm:$0xff] }
  0x42   : > { %944 = vmatprep.mubr.f32.mxu1 %v3870_v0  ;;  %3432 = vmatpush1.bf16.msra.mxu1 %v3431_v57  ;;  %v3447_v37 = vpack.c.bf16 %v1544_v33, %v1542_v32  ;;  %v1547_v38 = vld [vmem:[#allocation2 + $0x108] sm:$0xff]  ;;  %v1546_v41 = vld [vmem:[#allocation2 + $0x100] sm:$0xff]  ;;  %v1548_v43 = vld [vmem:[#allocation2 + $0x110] sm:$0xff] }
  0x43   : > { %3181 = vmatmul.mubr.msk.f32.gmra.mrb[8].mxu0 %vm454_vm0, %v4062_v23  ;;  %3434 = vmatprep.subr.bf16.mxu1 %v3433_v60  ;;  %v3449_v40 = vpack.c.bf16 %v1549_v39, %v1547_v38  ;;  %v4173_v44 = vld [vmem:[%s3999_s25 + $0xb0] sm:$0xff]  ;;  %v3451_v45 = vpack.c.bf16 %v1548_v43, %v1546_v41  ;;  %v1551_v46 = vld [vmem:[#allocation2 + $0x128] sm:$0xff]  ;;  %v1553_v47 = vld [vmem:[#allocation2 + $0x138] sm:$0xff] }
  0x44   : > { %645 = vmatprep.mubr.f32.mxu0 %v3870_v0  ;;  %v3453_v48 = vpack.c.bf16 %v1553_v47, %v1551_v46  ;;  %v1550_v50 = vld [vmem:[#allocation2 + $0x120] sm:$0xff]  ;;  %v1552_v51 = vld [vmem:[#allocation2 + $0x130] sm:$0xff]  ;;  %v4182_v52 = vld [vmem:[%s3999_s25 + $0xb8] sm:$0xff] }
  0x45   : > { %3221 = vmatmul.mubr.msk.f32.gmra.mrb[8].mxu1 %vm454_vm0, %v4077_v26  ;;  %v3455_v53 = vpack.c.bf16 %v1552_v51, %v1550_v50  ;;  %v1555_v54 = vld [vmem:[#allocation2 + $0x148] sm:$0xff]  ;;  %v1557_v55 = vld [vmem:[#allocation2 + $0x158] sm:$0xff]  ;;  %v1554_v58 = vld [vmem:[#allocation2 + $0x140] sm:$0xff] }
  0x46   : > { %950 = vmatprep.mubr.f32.mxu1 %v3870_v0  ;;  %3436 = vmatpush1.bf16.msra.mxu1 %v3435_v1  ;;  %v3457_v57 = vpack.c.bf16 %v1557_v55, %v1555_v54  ;;  %v1556_v59 = vld [vmem:[#allocation2 + $0x150] sm:$0xff]  ;;  %v4191_v60 = vld [vmem:[%s3999_s25 + $0xc0] sm:$0xff]  ;;  %v1559_v62 = vld [vmem:[#allocation2 + $0x168] sm:$0xff] }
  0x47   : > { %3182 = vmatmul.mubr.msk.f32.gmra.mrb[10].mxu0 %vm454_vm0, %v4074_v25  ;;  %3438 = vmatprep.subr.bf16.mxu1 %v3437_v4  ;;  %v3459_v61 = vpack.c.bf16 %v1556_v59, %v1554_v58  ;;  %v1561_v1 = vld [vmem:[#allocation2 + $0x178] sm:$0xff]  ;;  %v1558_v3 = vld [vmem:[#allocation2 + $0x160] sm:$0xff]  ;;  %v1560_v4 = vld [vmem:[#allocation2 + $0x170] sm:$0xff] }
  0x48   : > { %651 = vmatprep.mubr.f32.mxu0 %v3870_v0  ;;  %v3461_v2 = vpack.c.bf16 %v1561_v1, %v1559_v62  ;;  %v4200_v5 = vld [vmem:[%s3999_s25 + $0xc8] sm:$0xff]  ;;  %v3463_v6 = vpack.c.bf16 %v1560_v4, %v1558_v3  ;;  %v1565_v9 = vld [vmem:[#allocation2 + $0x198] sm:$0xff]  ;;  %v1564_v12 = vld [vmem:[#allocation2 + $0x190] sm:$0xff] }
  0x49   : > { %3222 = vmatmul.mubr.msk.f32.gmra.mrb[10].mxu1 %vm454_vm0, %v4089_v28  ;;  %v4209_v18 = vld [vmem:[%s3999_s25 + $0xd0] sm:$0xff]  ;;  %v1567_v29 = vld [vmem:[#allocation2 + $0x1a8] sm:$0xff]  ;;  %v1569_v30 = vld [vmem:[#allocation2 + $0x1b8] sm:$0xff] }
  0x4a   : > { %956 = vmatprep.mubr.f32.mxu1 %v3870_v0  ;;  %3440 = vmatpush1.bf16.msra.mxu1 %v3439_v8  ;;  %v1563_v8 = vld [vmem:[#allocation2 + $0x188] sm:$0xff]  ;;  %v1566_v32 = vld [vmem:[#allocation2 + $0x1a0] sm:$0xff]  ;;  %v1568_v33 = vld [vmem:[#allocation2 + $0x1b0] sm:$0xff] }
  0x4b   : > { %3183 = vmatmul.mubr.msk.f32.gmra.mrb[12].mxu0 %vm454_vm0, %v4086_v27  ;;  %3442 = vmatprep.subr.bf16.mxu1 %v3441_v11  ;;  %v3465_v10 = vpack.c.bf16 %v1565_v9, %v1563_v8  ;;  %v1562_v11 = vld [vmem:[#allocation2 + $0x180] sm:$0xff]  ;;  %v3471_v38 = vpack.c.bf16 %v1568_v33, %v1566_v32  ;;  %v1571_v39 = vld [vmem:[#allocation2 + $0x1c8] sm:$0xff]  ;;  %v1577_v50 = vld [vmem:[#allocation2 + $0x1f8] sm:$0xff] }
  0x4c   : > { %657 = vmatprep.mubr.f32.mxu0 %v3870_v0  ;;  %v1570_v43 = vld [vmem:[#allocation2 + $0x1c0] sm:$0xff]  ;;  %v1576_v54 = vld [vmem:[#allocation2 + $0x1f0] sm:$0xff]  ;;  %v4236_v55 = vld [vmem:[%s3999_s25 + $0xe8] sm:$0xff] }
  0x4d   : > { %3223 = vmatmul.mubr.msk.f32.gmra.mrb[12].mxu1 %vm454_vm0, %v4101_v35  ;;  %v4227_v46 = vld [vmem:[%s3999_s25 + $0xe0] sm:$0xff]  ;;  %v4245_v58 = vld [vmem:[%s3999_s25 + $0xf0] sm:$0xff]  ;;  %v4254_v59 = vld [vmem:[%s3999_s25 + $0xf8] sm:$0xff] }
  0x4e   : > { %962 = vmatprep.mubr.f32.mxu1 %v3870_v0  ;;  %3444 = vmatpush1.bf16.msra.mxu1 %v3443_v20  ;;  %v3467_v20 = vpack.c.bf16 %v1564_v12, %v1562_v11  ;;  %v420_v62 = vld [vmem:[%s5275_s1 + $0x50] sm:$0xff]  ;;  %v1579_v1 = vld [vmem:[#allocation2 + $0x208] sm:$0xff]  ;;  %v2232_v8 = vld [vmem:[%s5279_s5] sm:$0xff] }
  0x4f   : > { %3184 = vmatmul.mubr.msk.f32.gmra.mrb[14].mxu0 %vm454_vm0, %v4098_v34  ;;  %3446 = vmatprep.subr.bf16.mxu1 %v3445_v31  ;;  %v3469_v31 = vpack.c.bf16 %v1569_v30, %v1567_v29  ;;  %v2233_v9 = vld [vmem:[%s5279_s5 + $0x8] sm:$0xff]  ;;  %v2234_v11 = vld [vmem:[%s5279_s5 + $0x10] sm:$0xff]  ;;  %v2235_v12 = vld [vmem:[%s5279_s5 + $0x18] sm:$0xff] }
  0x50   : > { %663 = vmatprep.mubr.f32.mxu0 %v3870_v0  ;;  %v2236_v29 = vld [vmem:[%s5279_s5 + $0x20] sm:$0xff]  ;;  %v2237_v30 = vld [vmem:[%s5279_s5 + $0x28] sm:$0xff]  ;;  %v2239_v32 = vld [vmem:[%s5279_s5 + $0x38] sm:$0xff] }
  0x51   : > { %3224 = vmatmul.mubr.msk.f32.gmra.mrb[14].mxu1 %vm454_vm0, %v4110_v42  ;;  %v2240_v33 = vld [vmem:[%s5279_s5 + $0x40] sm:$0xff] }
  0x52   : > { %968 = vmatprep.mubr.f32.mxu1 %v3870_v0  ;;  %3448 = vmatpush1.bf16.msra.mxu1 %v3447_v37  ;;  %v4218_v37 = vld [vmem:[%s3999_s25 + $0xd8] sm:$0xff] }
  0x53   : > { %3185 = vmatmul.mubr.msk.f32.gmra.mrb[16].mxu0 %vm454_vm0, %v4023_v15  ;;  %3450 = vmatprep.subr.bf16.mxu1 %v3449_v40  ;;  %v1573_v40 = vld [vmem:[#allocation2 + $0x1d8] sm:$0xff] }
  0x54   : > { %669 = vmatprep.mubr.f32.mxu0 %v3870_v0  ;;  %v3473_v41 = vpack.c.bf16 %v1573_v40, %v1571_v39  ;;  %v2242_v39 = vld [vmem:[%s5279_s5 + $0x50] sm:$0xff]  ;;  %v2243_v40 = vld [vmem:[%s5279_s5 + $0x58] sm:$0xff] }
  0x55   : > { %3225 = vmatmul.mubr.msk.f32.gmra.mrb[16].mxu1 %vm454_vm0, %v4119_v49 }
  0x56   : > { %974 = vmatprep.mubr.f32.mxu1 %v3870_v0  ;;  %3452 = vmatpush1.bf16.msra.mxu1 %v3451_v45  ;;  %v1572_v45 = vld [vmem:[#allocation2 + $0x1d0] sm:$0xff] }
  0x57   : > { %3186 = vmatmul.mubr.msk.f32.gmra.mrb[18].mxu0 %vm454_vm0, %v4035_v17  ;;  %3454 = vmatprep.subr.bf16.mxu1 %v3453_v48  ;;  %v3475_v47 = vpack.c.bf16 %v1572_v45, %v1570_v43  ;;  %v1575_v48 = vld [vmem:[#allocation2 + $0x1e8] sm:$0xff]  ;;  %v2246_v45 = vld [vmem:[%s5279_s5 + $0x70] sm:$0xff] }
  0x58   : > { %675 = vmatprep.mubr.f32.mxu0 %v3870_v0  ;;  %v3477_v51 = vpack.c.bf16 %v1577_v50, %v1575_v48  ;;  %v2245_v43 = vld [vmem:[%s5279_s5 + $0x68] sm:$0xff]  ;;  %v2248_v48 = vld [vmem:[%s5279_s5 + $0x80] sm:$0xff] }
  0x59   : > { %3226 = vmatmul.mubr.msk.f32.gmra.mrb[18].mxu1 %vm454_vm0, %v4128_v56 }
  0x5a   : > { %980 = vmatprep.mubr.f32.mxu1 %v3870_v0  ;;  %3456 = vmatpush1.bf16.msra.mxu1 %v3455_v53  ;;  %v1574_v53 = vld [vmem:[#allocation2 + $0x1e0] sm:$0xff] }
  0x5b   : > { %3187 = vmatmul.mubr.msk.f32.gmra.mrb[20].mxu0 %vm454_vm0, %v4053_v22  ;;  %3458 = vmatprep.subr.bf16.mxu1 %v3457_v57  ;;  %v3479_v57 = vpack.c.bf16 %v1576_v54, %v1574_v53  ;;  %v2251_v53 = vld [vmem:[%s5279_s5 + $0x98] sm:$0xff] }
  0x5c   : > { %681 = vmatprep.mubr.f32.mxu0 %v3870_v0 }
  0x5d   : > { %3227 = vmatmul.mubr.msk.f32.gmra.mrb[20].mxu1 %vm454_vm0, %v4137_v63 }
  0x5e   : > { %986 = vmatprep.mubr.f32.mxu1 %v3870_v0  ;;  %3460 = vmatpush1.bf16.msra.mxu1 %v3459_v61  ;;  %v414_v61 = vld [vmem:[%s5275_s1 + $0x20] sm:$0xff] }
  0x5f   : > { %3188 = vmatmul.mubr.msk.f32.gmra.mrb[22].mxu0 %vm454_vm0, %v4065_v24  ;;  %3462 = vmatprep.subr.bf16.mxu1 %v3461_v2  ;;  %v1581_v2 = vld [vmem:[#allocation2 + $0x218] sm:$0xff]  ;;  %v3415_v4 = vpack.c.bf16 %v420_v62, %v414_v61  ;;  %v2252_v61 = vld [vmem:[%s5279_s5 + $0xa0] sm:$0xff]  ;;  %v2253_v62 = vld [vmem:[%s5279_s5 + $0xa8] sm:$0xff] }
  0x60   : > { %687 = vmatprep.mubr.f32.mxu0 %v3870_v0  ;;  %v3481_v3 = vpack.c.bf16 %v1581_v2, %v1579_v1 }
  0x61   : > { %3228 = vmatmul.mubr.msk.f32.gmra.mrb[22].mxu1 %vm454_vm0, %v4146_v7 }
  0x62   : > { %992 = vmatprep.mubr.f32.mxu1 %v3870_v0  ;;  %3464 = vmatpush1.bf16.msra.mxu1 %v3463_v6  ;;  %v5290_v6 = vmov 0.0|0.0  }
  0x63   : > { %3189 = vmatmul.mubr.msk.f32.gmra.mrb[24].mxu0 %vm454_vm0, %v4077_v26  ;;  %3466 = vmatprep.subr.bf16.mxu1 %v3465_v10  ;;  %v3546_v10 = vpack.c.bf16 %v2233_v9, %v2232_v8  ;;  %v1580_v9 = vld [vmem:[#allocation2 + $0x210] sm:$0xff] }
  0x64   : > { %693 = vmatprep.mubr.f32.mxu0 %v3870_v0 }
  0x65   : > { %3229 = vmatmul.mubr.msk.f32.gmra.mrb[24].mxu1 %vm454_vm0, %v4155_v19 }
  0x66   : > { %998 = vmatprep.mubr.f32.mxu1 %v3870_v0  ;;  %3468 = vmatpush1.bf16.msra.mxu1 %v3467_v20  ;;  %v3549_v20 = vpack.c.bf16 %v2235_v12, %v2234_v11  ;;  %v1583_v11 = vld [vmem:[#allocation2 + $0x228] sm:$0xff]  ;;  %v1585_v12 = vld [vmem:[#allocation2 + $0x238] sm:$0xff] }
  0x67   : > { %3190 = vmatmul.mubr.msk.f32.gmra.mrb[26].mxu0 %vm454_vm0, %v4089_v28  ;;  %3470 = vmatprep.subr.bf16.mxu1 %v3469_v31  ;;  %v2238_v31 = vld [vmem:[%s5279_s5 + $0x30] sm:$0xff] }
  0x68   : > { %699 = vmatprep.mubr.f32.mxu0 %v3870_v0 }
  0x69   : > { %3230 = vmatmul.mubr.msk.f32.gmra.mrb[26].mxu1 %vm454_vm0, %v4164_v36 }
  0x6a   : > { %1004 = vmatprep.mubr.f32.mxu1 %v3870_v0  ;;  %3472 = vmatpush1.bf16.msra.mxu1 %v3471_v38  ;;  %v2241_v38 = vld [vmem:[%s5279_s5 + $0x48] sm:$0xff] }
  0x6b   : > { %3191 = vmatmul.mubr.msk.f32.gmra.mrb[28].mxu0 %vm454_vm0, %v4101_v35  ;;  %3474 = vmatprep.subr.bf16.mxu1 %v3473_v41  ;;  %v2244_v41 = vld [vmem:[%s5279_s5 + $0x60] sm:$0xff] }
  0x6c   : > { %705 = vmatprep.mubr.f32.mxu0 %v3870_v0 }
  0x6d   : > { %3231 = vmatmul.mubr.msk.f32.gmra.mrb[28].mxu1 %vm454_vm0, %v4173_v44 }
  0x6e   : > { %1010 = vmatprep.mubr.f32.mxu1 %v3870_v0  ;;  %3476 = vmatpush1.bf16.msra.mxu1 %v3475_v47  ;;  %v2247_v47 = vld [vmem:[%s5279_s5 + $0x78] sm:$0xff] }
  0x6f   : > { %3192 = vmatmul.mubr.msk.f32.gmra.mrb[30].mxu0 %vm454_vm0, %v4110_v42  ;;  %3478 = vmatprep.subr.bf16.mxu1 %v3477_v51  ;;  %v2250_v51 = vld [vmem:[%s5279_s5 + $0x90] sm:$0xff] }
  0x70   : > { %711 = vmatprep.mubr.f32.mxu0 %v3870_v0 }
  0x71   : > { %3232 = vmatmul.mubr.msk.f32.gmra.mrb[30].mxu1 %vm454_vm0, %v4182_v52 }
  0x72   : > { %1016 = vmatprep.mubr.f32.mxu1 %v3870_v0  ;;  %3480 = vmatpush1.bf16.msra.mxu1 %v3479_v57  ;;  %v4425_v57 = vld [vmem:[%s5276_s2] sm:$0x3f] }
  0x73   : > { %3193 = vmatmul.mubr.msk.f32.gmra.mrb[32].mxu0 %vm454_vm0, %v4119_v49  ;;  %3482 = vmatprep.subr.bf16.mxu1 %v3481_v3 }
  0x74   : > { %717 = vmatprep.mubr.f32.mxu0 %v3870_v0 }
  0x75   : > { %3233 = vmatmul.mubr.msk.f32.gmra.mrb[32].mxu1 %vm454_vm0, %v4191_v60 }
  0x76   : > { %1022 = vmatprep.mubr.f32.mxu1 %v3870_v0 }
  0x77   : > { %3194 = vmatmul.mubr.msk.f32.gmra.mrb[34].mxu0 %vm454_vm0, %v4128_v56 }
  0x78   : > { %723 = vmatprep.mubr.f32.mxu0 %v3870_v0 }
  0x79   : > { %3234 = vmatmul.mubr.msk.f32.gmra.mrb[34].mxu1 %vm454_vm0, %v4200_v5 }
  0x7a   : > { %1028 = vmatprep.mubr.f32.mxu1 %v3870_v0 }
  0x7b   : > { %3195 = vmatmul.mubr.msk.f32.gmra.mrb[36].mxu0 %vm454_vm0, %v4137_v63 }
  0x7c   : > { %729 = vmatprep.mubr.f32.mxu0 %v3870_v0 }
  0x7d   : > { %3235 = vmatmul.mubr.msk.f32.gmra.mrb[36].mxu1 %vm454_vm0, %v4209_v18 }
  0x7e   : > { %1034 = vmatprep.mubr.f32.mxu1 %v3870_v0 }
  0x7f   : > { %3196 = vmatmul.mubr.msk.f32.gmra.mrb[38].mxu0 %vm454_vm0, %v4146_v7 }
  0x80   : > { %735 = vmatprep.mubr.f32.mxu0 %v3870_v0 }
  0x81   : > { %3236 = vmatmul.mubr.msk.f32.gmra.mrb[38].mxu1 %vm454_vm0, %v4218_v37 }
  0x82   : > { %1040 = vmatprep.mubr.f32.mxu1 %v3870_v0 }
  0x83   : > { %3197 = vmatmul.mubr.msk.f32.gmra.mrb[40].mxu0 %vm454_vm0, %v4155_v19 }
  0x84   : > { %741 = vmatprep.mubr.f32.mxu0 %v3870_v0 }
  0x85   : > { %3237 = vmatmul.mubr.msk.f32.gmra.mrb[40].mxu1 %vm454_vm0, %v4227_v46 }
  0x86   : > { %1046 = vmatprep.mubr.f32.mxu1 %v3870_v0 }
  0x87   : > { %3198 = vmatmul.mubr.msk.f32.gmra.mrb[42].mxu0 %vm454_vm0, %v4164_v36 }
  0x88   : > { %747 = vmatprep.mubr.f32.mxu0 %v3870_v0 }
  0x89   : > { %3238 = vmatmul.mubr.msk.f32.gmra.mrb[42].mxu1 %vm454_vm0, %v4236_v55 }
  0x8a   : > { %1052 = vmatprep.mubr.f32.mxu1 %v3870_v0 }
  0x8b   : > { %3199 = vmatmul.mubr.msk.f32.gmra.mrb[44].mxu0 %vm454_vm0, %v4173_v44 }
  0x8c   : > { %753 = vmatprep.mubr.f32.mxu0 %v3870_v0 }
  0x8d   : > { %3239 = vmatmul.mubr.msk.f32.gmra.mrb[44].mxu1 %vm454_vm0, %v4245_v58 }
  0x8e   : > { %1058 = vmatprep.mubr.f32.mxu1 %v3870_v0 }
  0x8f   : > { %3200 = vmatmul.mubr.msk.f32.gmra.mrb[46].mxu0 %vm454_vm0, %v4182_v52 }
  0x90   : > { %759 = vmatprep.mubr.f32.mxu0 %v3870_v0 }
  0x91   : > { %3240 = vmatmul.mubr.msk.f32.gmra.mrb[46].mxu1 %vm454_vm0, %v4254_v59 }
  0x93   : > { %3201 = vmatmul.mubr.msk.f32.gmra.mrb[48].mxu0 %vm454_vm0, %v4191_v60 }
  0x94   : > { %765 = vmatprep.mubr.f32.mxu0 %v3870_v0 }
  0x97   : > { %3202 = vmatmul.mubr.msk.f32.gmra.mrb[50].mxu0 %vm454_vm0, %v4200_v5 }
  0x98   : > { %771 = vmatprep.mubr.f32.mxu0 %v3870_v0 }
  0x9b   : > { %3203 = vmatmul.mubr.msk.f32.gmra.mrb[52].mxu0 %vm454_vm0, %v4209_v18 }
  0x9c   : > { %777 = vmatprep.mubr.f32.mxu0 %v3870_v0 }
  0x9f   : > { %3204 = vmatmul.mubr.msk.f32.gmra.mrb[54].mxu0 %vm454_vm0, %v4218_v37 }
  0xa0   : > { %783 = vmatprep.mubr.f32.mxu0 %v3870_v0 }
  0xa3   : > { %3205 = vmatmul.mubr.msk.f32.gmra.mrb[56].mxu0 %vm454_vm0, %v4227_v46 }
  0xa4   : > { %789 = vmatprep.mubr.f32.mxu0 %v3870_v0 }
  0xa7   : > { %3206 = vmatmul.mubr.msk.f32.gmra.mrb[58].mxu0 %vm454_vm0, %v4236_v55 }
  0xa8   : > { %795 = vmatprep.mubr.f32.mxu0 %v3870_v0 }
  0xab   : > { %3207 = vmatmul.mubr.msk.f32.gmra.mrb[60].mxu0 %vm454_vm0, %v4245_v58 }
  0xac   : > { %801 = vmatprep.mubr.f32.mxu0 %v3870_v0 }
  0xaf   : > { %3208 = vmatmul.mubr.msk.f32.gmra.mrb[62].mxu0 %vm454_vm0, %v4254_v59 }
  0xb0   : > { %872 = vmatprep.mubr.f32.mxu0 %v3870_v0 }
  0xb3   : > { %3209 = vmatmul.mubr.msk.f32.vlgmr.msra.gmra.mrb[64].mxu0 %vm454_vm0, %v4014_v13 }
  0xb4   : > { %3416 = vmatpush1.bf16.msra.mxu0 %v3415_v4  ;;  %878 = vmatprep.mubr.f32.mxu0 %v3870_v0 }
  0xb5   : > { %3545 = vmatprep.subr.bf16.mxu0 %v5290_v6 }
  0xb7   : > { %3210 = vmatmul.mubr.msk.f32.gmra.mrb[66].mxu0 %vm454_vm0, %v4020_v14 }
  0xb8   : > { %884 = vmatprep.mubr.f32.mxu0 %v3870_v0 }
  0xbb   : > { %3211 = vmatmul.mubr.msk.f32.gmra.mrb[68].mxu0 %vm454_vm0, %v4032_v16 }
  0xbc   : > { %890 = vmatprep.mubr.f32.mxu0 %v3870_v0 }
  0xbf   : > { %3212 = vmatmul.mubr.msk.f32.gmra.mrb[70].mxu0 %vm454_vm0, %v4050_v21 }
  0xc0   : > { %896 = vmatprep.mubr.f32.mxu0 %v3870_v0 }
  0xc3   : > { %3213 = vmatmul.mubr.msk.f32.gmra.mrb[72].mxu0 %vm454_vm0, %v4062_v23 }
  0xc4   : > { %902 = vmatprep.mubr.f32.mxu0 %v3870_v0 }
  0xc7   : > { %3214 = vmatmul.mubr.msk.f32.gmra.mrb[74].mxu0 %vm454_vm0, %v4074_v25 }
  0xc8   : > { %908 = vmatprep.mubr.f32.mxu0 %v3870_v0 }
  0xcb   : > { %3215 = vmatmul.mubr.msk.f32.gmra.mrb[76].mxu0 %vm454_vm0, %v4086_v27 }
  0xcc   : > { %914 = vmatprep.mubr.f32.mxu0 %v3870_v0 }
  0xcf   : > { %3216 = vmatmul.mubr.msk.f32.gmra.mrb[78].mxu0 %vm454_vm0, %v4098_v34 }
  0xd0   : > { %1129 = vmatprep.mubr.f32.mxu0 %v3870_v0 }
  0xd3   : > { %3241 = vmatmul.mubr.msk.f32.vlgmr.msra.gmra.mrb[80].mxu0 %vm454_vm0, %v4014_v13  ;;  %v3552_v13 = vpack.c.bf16 %v2237_v30, %v2236_v29  ;;  %v2255_v29 = vld [vmem:[%s5279_s5 + $0xb8] sm:$0xff] }
  0xd4   : > { %1135 = vmatprep.mubr.f32.mxu0 %v3870_v0  ;;  %3547 = vmatpush1.bf16.msra.mxu0 %v3546_v10 }
  0xd5   : > { %3548 = vmatprep.subr.bf16.mxu0 %v5290_v6 }
  0xd7   : > { %3242 = vmatmul.mubr.msk.f32.gmra.mrb[82].mxu0 %vm454_vm0, %v4020_v14  ;;  %v3555_v14 = vpack.c.bf16 %v2239_v32, %v2238_v31 }
  0xd8   : > { %1141 = vmatprep.mubr.f32.mxu0 %v3870_v0  ;;  %3550 = vmatpush1.bf16.msra.mxu0 %v3549_v20  ;;  %v2254_v20 = vld [vmem:[%s5279_s5 + $0xb0] sm:$0xff] }
  0xd9   : > { %3551 = vmatprep.subr.bf16.mxu0 %v5290_v6 }
  0xdb   : > { %3243 = vmatmul.mubr.msk.f32.gmra.mrb[84].mxu0 %vm454_vm0, %v4032_v16  ;;  %v3558_v16 = vpack.c.bf16 %v2241_v38, %v2240_v33  ;;  %v3485_v38 = vpack.c.bf16 %v1585_v12, %v1583_v11  ;;  %v1592_v11 = vld [vmem:[#allocation2 + $0x270] sm:$0xff] }
  0xdc   : > { %1147 = vmatprep.mubr.f32.mxu0 %v3870_v0  ;;  %3553 = vmatpush1.bf16.msra.mxu0 %v3552_v13 }
  0xdd   : > { %3554 = vmatprep.subr.bf16.mxu0 %v5290_v6 }
  0xdf   : > { %3244 = vmatmul.mubr.msk.f32.gmra.mrb[86].mxu0 %vm454_vm0, %v4050_v21  ;;  %v3561_v21 = vpack.c.bf16 %v2243_v40, %v2242_v39  ;;  %v1584_v39 = vld [vmem:[#allocation2 + $0x230] sm:$0xff] }
  0xe0   : > { %1153 = vmatprep.mubr.f32.mxu0 %v3870_v0  ;;  %3556 = vmatpush1.bf16.msra.mxu0 %v3555_v14 }
  0xe1   : > { %3557 = vmatprep.subr.bf16.mxu0 %v5290_v6 }
  0xe3   : > { %3245 = vmatmul.mubr.msk.f32.gmra.mrb[88].mxu0 %vm454_vm0, %v4062_v23  ;;  %v3564_v23 = vpack.c.bf16 %v2245_v43, %v2244_v41  ;;  %v1589_v41 = vld [vmem:[#allocation2 + $0x258] sm:$0xff] }
  0xe4   : > { %1159 = vmatprep.mubr.f32.mxu0 %v3870_v0  ;;  %3559 = vmatpush1.bf16.msra.mxu0 %v3558_v16  ;;  %v1582_v16 = vld [vmem:[#allocation2 + $0x220] sm:$0xff] }
  0xe5   : > { %3560 = vmatprep.subr.bf16.mxu0 %v5290_v6 }
  0xe7   : > { %3246 = vmatmul.mubr.msk.f32.gmra.mrb[90].mxu0 %vm454_vm0, %v4074_v25  ;;  %v3567_v25 = vpack.c.bf16 %v2247_v47, %v2246_v45  ;;  %v3487_v45 = vpack.c.bf16 %v1584_v39, %v1582_v16  ;;  %v1599_v39 = vld [vmem:[#allocation2 + $0x2a8] sm:$0xff] }
  0xe8   : > { %1165 = vmatprep.mubr.f32.mxu0 %v3870_v0  ;;  %3562 = vmatpush1.bf16.msra.mxu0 %v3561_v21  ;;  %v1587_v21 = vld [vmem:[#allocation2 + $0x248] sm:$0xff] }
  0xe9   : > { %3563 = vmatprep.subr.bf16.mxu0 %v5290_v6 }
  0xeb   : > { %3247 = vmatmul.mubr.msk.f32.gmra.mrb[92].mxu0 %vm454_vm0, %v4086_v27  ;;  %v2249_v27 = vld [vmem:[%s5279_s5 + $0x88] sm:$0xff] }
  0xec   : > { %1171 = vmatprep.mubr.f32.mxu0 %v3870_v0  ;;  %3565 = vmatpush1.bf16.msra.mxu0 %v3564_v23  ;;  %v3570_v50 = vpack.c.bf16 %v2249_v27, %v2248_v48  ;;  %v3489_v48 = vpack.c.bf16 %v1589_v41, %v1587_v21  ;;  %v1586_v27 = vld [vmem:[#allocation2 + $0x240] sm:$0xff]  ;;  %v2258_v21 = vld [vmem:[%s5279_s5 + $0xd0] sm:$0xff] }
  0xed   : > { %3566 = vmatprep.subr.bf16.mxu0 %v5290_v6 }
  0xef   : > { %3248 = vmatmul.mubr.msk.f32.gmra.mrb[94].mxu0 %vm454_vm0, %v4098_v34  ;;  %v424_v34 = vlaneseq }
  0xf0   : > { %1177 = vmatprep.mubr.f32.mxu0 %v3870_v0  ;;  %3568 = vmatpush1.bf16.msra.mxu0 %v3567_v25 }
  0xf1   : > { %3569 = vmatprep.subr.bf16.mxu0 %v5290_v6  ;;  %v4414_v54 = vshrl.u32 %v424_v34, 7 }
  0xf3   : > { %3249 = vmatmul.mubr.msk.f32.gmra.mrb[96].mxu0 %vm454_vm0, %v4023_v15  ;;  %v3573_v15 = vpack.c.bf16 %v2251_v53, %v2250_v51  ;;  %5299 = vst [vmem:[#allocation5_spill] sm:$0xff] %v4414_v54  ;;  %v1591_v51 = vld [vmem:[#allocation2 + $0x268] sm:$0xff]  ;;  %v1593_v53 = vld [vmem:[#allocation2 + $0x278] sm:$0xff] }
  0xf4   : > { %1183 = vmatprep.mubr.f32.mxu0 %v3870_v0  ;;  %3571 = vmatpush1.bf16.msra.mxu0 %v3570_v50  ;;  %v1588_v50 = vld [vmem:[#allocation2 + $0x250] sm:$0xff] }
  0xf5   : > { %3572 = vmatprep.subr.bf16.mxu0 %v5290_v6 }
  0xf7   : > { %3250 = vmatmul.mubr.msk.f32.gmra.mrb[98].mxu0 %vm454_vm0, %v4035_v17  ;;  %v5289_v17 = vsub.s32 0, %v4414_v54 }
  0xf8   : > { %1189 = vmatprep.mubr.f32.mxu0 %v3870_v0  ;;  %3574 = vmatpush1.bf16.msra.mxu0 %v3573_v15  ;;  %v2256_v15 = vld [vmem:[%s5279_s5 + $0xc0] sm:$0xff] }
  0xf9   : > { %3575 = vmatprep.subr.bf16.mxu0 %v5290_v6  ;;  %v4439_v1 = vrot.slane %v4425_v57, %v5289_v17 }
  0xfb   : > { %3251 = vmatmul.mubr.msk.f32.gmra.mrb[100].mxu0 %vm454_vm0, %v4053_v22  ;;  %v5288_v22 = vsub.s32 1, %v4414_v54 }
  0xfc   : > { %1195 = vmatprep.mubr.f32.mxu0 %v3870_v0 }
  0xfd   : > { %v4445_v2 = vrot.slane %v4425_v57, %v5288_v22 }
  0xff   : > { %3252 = vmatmul.mubr.msk.f32.gmra.mrb[102].mxu0 %vm454_vm0, %v4065_v24  ;;  %v3576_v24 = vpack.c.bf16 %v2253_v62, %v2252_v61 }
 0x100   : > { %1201 = vmatprep.mubr.f32.mxu0 %v3870_v0 }
 0x101   : > { %3577 = vmatpush1.bf16.msra.mxu0 %v3576_v24  ;;  %v3491_v24 = vpack.c.bf16 %v1588_v50, %v1586_v27  ;;  %v1598_v27 = vld [vmem:[#allocation2 + $0x2a0] sm:$0xff]  ;;  %v1600_v50 = vld [vmem:[#allocation2 + $0x2b0] sm:$0xff] }
 0x102   : > { %3578 = vmatprep.subr.bf16.mxu0 %v5290_v6 }
 0x103   : > { %3253 = vmatmul.mubr.msk.f32.gmra.mrb[104].mxu0 %vm454_vm0, %v4077_v26  ;;  %v1578_v26 = vld [vmem:[#allocation2 + $0x200] sm:$0xff] }
 0x104   : > { %1207 = vmatprep.mubr.f32.mxu0 %v3870_v0  ;;  %v3483_v31 = vpack.c.bf16 %v1580_v9, %v1578_v26  ;;  %v3493_v9 = vpack.c.bf16 %v1593_v53, %v1591_v51  ;;  %v1603_v51 = vld [vmem:[#allocation2 + $0x2c8] sm:$0xff]  ;;  %v1605_v53 = vld [vmem:[#allocation2 + $0x2d8] sm:$0xff] }
 0x106   : > { %v617_v3 = vpop.f32.mrb[0].mxu0 }
 0x107   : > { %v618_v4 = vadd.f32 %v617_v3, %v4439_v1  ;;  %v619_v8 = vpop.f32.mrb[1].mxu0  ;;  %3254 = vmatmul.mubr.msk.f32.gmra.mrb[106].mxu0 %vm454_vm0, %v4089_v28  ;;  %v3579_v28 = vpack.c.bf16 %v2255_v29, %v2254_v20  ;;  %v1595_v20 = vld [vmem:[#allocation2 + $0x288] sm:$0xff]  ;;  %v1597_v29 = vld [vmem:[#allocation2 + $0x298] sm:$0xff] }
 0x108   : > { %v620_v10 = vadd.f32 %v619_v8, %v4445_v2  ;;  %1213 = vmatprep.mubr.f32.mxu0 %v3870_v0 }
 0x109   : > { %v1322_v32 = vmax.f32 %v618_v4, 0.0  ;;  %3580 = vmatpush1.bf16.msra.mxu0 %v3579_v28 }
 0x10a   : > { %v1323_v30 = vmax.f32 %v620_v10, 0.0  ;;  %v623_v13 = vpop.f32.mrb[2].mxu0  ;;  %3581 = vmatprep.subr.bf16.mxu0 %v5290_v6  ;;  %v1590_v10 = vld [vmem:[#allocation2 + $0x260] sm:$0xff] }
 0x10b   : > { %v624_v14 = vadd.f32 %v623_v13, %v4439_v1  ;;  %v625_v33 = vpop.f32.mrb[3].mxu0  ;;  %3255 = vmatmul.mubr.msk.f32.gmra.mrb[108].mxu0 %vm454_vm0, %v4101_v35 }
 0x10c   : > { %v626_v40 = vadd.f32 %v625_v33, %v4445_v2  ;;  %1718 = vmatprep.mubr.f32.mxu1 %v1323_v30  ;;  %1219 = vmatprep.mubr.f32.mxu0 %v3870_v0  ;;  %v1594_v33 = vld [vmem:[#allocation2 + $0x280] sm:$0xff] }
 0x10d   : > { %1719 = vmatmul.mubr.f32.vlgmr.msra.gmra.mrb[48].mxu1 %v1322_v32  ;;  %v1328_v47 = vmax.f32 %v624_v14, 0.0  ;;  %v3497_v14 = vpack.c.bf16 %v1597_v29, %v1595_v20  ;;  %v2260_v20 = vld [vmem:[%s5279_s5 + $0xe0] sm:$0xff] }
 0x10e   : > { %v1329_v43 = vmax.f32 %v626_v40, 0.0  ;;  %v629_v23 = vpop.f32.mrb[4].mxu0  ;;  %3484 = vmatpush1.bf16.msra.mxu1 %v3483_v31  ;;  %v3495_v31 = vpack.c.bf16 %v1592_v11, %v1590_v10  ;;  %v1601_v40 = vld [vmem:[#allocation2 + $0x2b8] sm:$0xff]  ;;  %v1607_v11 = vld [vmem:[#allocation2 + $0x2e8] sm:$0xff] }
 0x10f   : > { %v630_v35 = vadd.f32 %v629_v23, %v4439_v1  ;;  %v631_v25 = vpop.f32.mrb[5].mxu0  ;;  %3256 = vmatmul.mubr.msk.f32.gmra.mrb[110].mxu0 %vm454_vm0, %v4110_v42  ;;  %3486 = vmatprep.subr.bf16.mxu1 %v3485_v38  ;;  %v2257_v42 = vld [vmem:[%s5279_s5 + $0xc8] sm:$0xff]  ;;  %v1596_v38 = vld [vmem:[#allocation2 + $0x290] sm:$0xff] }
 0x110   : > { %v632_v34 = vadd.f32 %v631_v25, %v4445_v2  ;;  %1724 = vmatprep.mubr.f32.mxu1 %v1329_v43  ;;  %1225 = vmatprep.mubr.f32.mxu0 %v3870_v0  ;;  %v3582_v3 = vpack.c.bf16 %v2257_v42, %v2256_v15  ;;  %v3499_v23 = vpack.c.bf16 %v1596_v38, %v1594_v33  ;;  %v1606_v38 = vld [vmem:[#allocation2 + $0x2e0] sm:$0xff] }
 0x111   : > { %1725 = vmatmul.mubr.f32.gmra.mrb[50].mxu1 %v1328_v47  ;;  %v1334_v4 = vmax.f32 %v630_v35, 0.0 }
 0x112   : > { %v1335_v61 = vmax.f32 %v632_v34, 0.0  ;;  %v635_v62 = vpop.f32.mrb[6].mxu0  ;;  %3488 = vmatpush1.bf16.msra.mxu1 %v3487_v45  ;;  %3583 = vmatpush1.bf16.msra.mxu0 %v3582_v3 }
 0x113   : > { %v636_v8 = vadd.f32 %v635_v62, %v4439_v1  ;;  %v637_v26 = vpop.f32.mrb[7].mxu0  ;;  %3257 = vmatmul.mubr.msk.f32.gmra.mrb[112].mxu0 %vm454_vm0, %v4119_v49  ;;  %3490 = vmatprep.subr.bf16.mxu1 %v3489_v48  ;;  %v3501_v48 = vpack.c.bf16 %v1601_v40, %v1599_v39 }
 0x114   : > { %v638_v12 = vadd.f32 %v637_v26, %v4445_v2  ;;  %1730 = vmatprep.mubr.f32.mxu1 %v1335_v61  ;;  %1231 = vmatprep.mubr.f32.mxu0 %v3870_v0  ;;  %v3503_v61 = vpack.c.bf16 %v1600_v50, %v1598_v27  ;;  %v1604_v26 = vld [vmem:[#allocation2 + $0x2d0] sm:$0xff] }
 0x115   : > { %1731 = vmatmul.mubr.f32.gmra.mrb[52].mxu1 %v1334_v4  ;;  %3584 = vmatprep.subr.bf16.mxu0 %v5290_v6  ;;  %v1340_v49 = vmax.f32 %v636_v8, 0.0  ;;  %v3505_v4 = vpack.c.bf16 %v1605_v53, %v1603_v51  ;;  %v1602_v8 = vld [vmem:[#allocation2 + $0x2c0] sm:$0xff]  ;;  %v1612_v27 = vld [vmem:[#allocation2 + $0x310] sm:$0xff] }
 0x116   : > { %v1341_v30 = vmax.f32 %v638_v12, 0.0  ;;  %v641_v13 = vpop.f32.mrb[8].mxu0  ;;  %3492 = vmatpush1.bf16.msra.mxu1 %v3491_v24  ;;  %v1609_v12 = vld [vmem:[#allocation2 + $0x2f8] sm:$0xff]  ;;  %v2262_v50 = vld [vmem:[%s5279_s5 + $0xf0] sm:$0xff] }
 0x117   : > { %v642_v28 = vadd.f32 %v641_v13, %v4439_v1  ;;  %v643_v32 = vpop.f32.mrb[9].mxu0  ;;  %3258 = vmatmul.mubr.msk.f32.gmra.mrb[114].mxu0 %vm454_vm0, %v4128_v56  ;;  %3494 = vmatprep.subr.bf16.mxu1 %v3493_v9  ;;  %v2259_v56 = vld [vmem:[%s5279_s5 + $0xd8] sm:$0xff]  ;;  %v3507_v13 = vpack.c.bf16 %v1604_v26, %v1602_v8  ;;  %v3509_v33 = vpack.c.bf16 %v1609_v12, %v1607_v11  ;;  %v1614_v11 = vld [vmem:[#allocation2 + $0x320] sm:$0xff]  ;;  %v1616_v12 = vld [vmem:[#allocation2 + $0x330] sm:$0xff] }
 0x118   : > { %v644_v16 = vadd.f32 %v643_v32, %v4445_v2  ;;  %1736 = vmatprep.mubr.f32.mxu1 %v1341_v30  ;;  %1237 = vmatprep.mubr.f32.mxu0 %v3870_v0  ;;  %v3585_v45 = vpack.c.bf16 %v2259_v56, %v2258_v21  ;;  %v1611_v21 = vld [vmem:[#allocation2 + $0x308] sm:$0xff]  ;;  %v1613_v56 = vld [vmem:[#allocation2 + $0x318] sm:$0xff] }
 0x119   : > { %1737 = vmatmul.mubr.f32.gmra.mrb[54].mxu1 %v1340_v49  ;;  %v1346_v47 = vmax.f32 %v642_v28, 0.0 }
 0x11a   : > { %v1347_v41 = vmax.f32 %v644_v16, 0.0  ;;  %v647_v43 = vpop.f32.mrb[10].mxu0  ;;  %3496 = vmatpush1.bf16.msra.mxu1 %v3495_v31  ;;  %3586 = vmatpush1.bf16.msra.mxu0 %v3585_v45  ;;  %v1608_v16 = vld [vmem:[#allocation2 + $0x2f0] sm:$0xff] }
 0x11b   : > { %v648_v35 = vadd.f32 %v647_v43, %v4439_v1  ;;  %v649_v25 = vpop.f32.mrb[11].mxu0  ;;  %3259 = vmatmul.mubr.msk.f32.gmra.mrb[116].mxu0 %vm454_vm0, %v4137_v63  ;;  %3498 = vmatprep.subr.bf16.mxu1 %v3497_v14  ;;  %v4499_v63 = vpop.f32.mrb[0].mxu1 }
 0x11c   : > { %v650_v34 = vadd.f32 %v649_v25, %v4445_v2  ;;  %1742 = vmatprep.mubr.f32.mxu1 %v1347_v41  ;;  %1243 = vmatprep.mubr.f32.mxu0 %v3870_v0  ;;  %v4504_v9 = vpop.f32.mrb[1].mxu1 }
 0x11d   : > { %1743 = vmatmul.mubr.f32.gmra.mrb[56].mxu1 %v1346_v47  ;;  %3587 = vmatprep.subr.bf16.mxu0 %v5290_v6  ;;  %v1352_v62 = vmax.f32 %v648_v35, 0.0  ;;  %v4514_v49 = vpop.f32.mrb[2].mxu1 }
 0x11e   : > { %v1353_v15 = vmax.f32 %v650_v34, 0.0  ;;  %v653_v42 = vpop.f32.mrb[12].mxu0  ;;  %3500 = vmatpush1.bf16.msra.mxu1 %v3499_v23  ;;  %v4519_v39 = vpop.f32.mrb[3].mxu1  ;;  %v3511_v23 = vpack.c.bf16 %v1608_v16, %v1606_v38  ;;  %v2263_v34 = vld [vmem:[%s5279_s5 + $0xf8] sm:$0xff]  ;;  %v1618_v16 = vld [vmem:[#allocation2 + $0x340] sm:$0xff] }
 0x11f   : > { %v654_v24 = vadd.f32 %v653_v42, %v4439_v1  ;;  %v655_v3 = vpop.f32.mrb[13].mxu0  ;;  %3260 = vmatmul.mubr.msk.f32.gmra.mrb[118].mxu0 %vm454_vm0, %v4146_v7  ;;  %3502 = vmatprep.subr.bf16.mxu1 %v3501_v48  ;;  %v2261_v7 = vld [vmem:[%s5279_s5 + $0xe8] sm:$0xff]  ;;  %v4524_v45 = vpop.f32.mrb[4].mxu1  ;;  %v3513_v48 = vpack.c.bf16 %v1613_v56, %v1611_v21  ;;  %v3591_v42 = vpack.c.bf16 %v2263_v34, %v2262_v50  ;;  %v1622_v50 = vld [vmem:[#allocation2 + $0x360] sm:$0xff]  ;;  %v1624_v34 = vld [vmem:[#allocation2 + $0x370] sm:$0xff] }
 0x120   : > { %v656_v10 = vadd.f32 %v655_v3, %v4445_v2  ;;  %1748 = vmatprep.mubr.f32.mxu1 %v1353_v15  ;;  %1249 = vmatprep.mubr.f32.mxu0 %v3870_v0  ;;  %v3588_v31 = vpack.c.bf16 %v2261_v7, %v2260_v20  ;;  %v4535_v51 = vpop.f32.mrb[5].mxu1  ;;  %v1615_v15 = vld [vmem:[#allocation2 + $0x328] sm:$0xff] }
 0x121   : > { %1749 = vmatmul.mubr.f32.gmra.mrb[58].mxu1 %v1352_v62  ;;  %v1358_v28 = vmax.f32 %v654_v24, 0.0  ;;  %v4539_v3 = vpop.f32.mrb[6].mxu1 }
 0x122   : > { %v1359_v29 = vmax.f32 %v656_v10, 0.0  ;;  %v659_v30 = vpop.f32.mrb[14].mxu0  ;;  %3504 = vmatpush1.bf16.msra.mxu1 %v3503_v61  ;;  %3589 = vmatpush1.bf16.msra.mxu0 %v3588_v31  ;;  %v4544_v20 = vpop.f32.mrb[7].mxu1 }
 0x123   : > { %v660_v32 = vadd.f32 %v659_v30, %v4439_v1  ;;  %v661_v14 = vpop.f32.mrb[15].mxu0  ;;  %3261 = vmatmul.mubr.msk.f32.gmra.mrb[120].mxu0 %vm454_vm0, %v4155_v19  ;;  %3506 = vmatprep.subr.bf16.mxu1 %v3505_v4  ;;  %v1610_v19 = vld [vmem:[#allocation2 + $0x300] sm:$0xff]  ;;  %v1621_v30 = vld [vmem:[#allocation2 + $0x358] sm:$0xff] }
 0x124   : > { %v662_v40 = vadd.f32 %v661_v14, %v4445_v2  ;;  %1754 = vmatprep.mubr.f32.mxu1 %v1359_v29  ;;  %1255 = vmatprep.mubr.f32.mxu0 %v3870_v0  ;;  %v3515_v24 = vpack.c.bf16 %v1612_v27, %v1610_v19  ;;  %v1619_v29 = vld [vmem:[#allocation2 + $0x348] sm:$0xff] }
 0x125   : > { %1755 = vmatmul.mubr.f32.gmra.mrb[60].mxu1 %v1358_v28  ;;  %3590 = vmatprep.subr.bf16.mxu0 %v5290_v6  ;;  %v1364_v47 = vmax.f32 %v660_v32, 0.0  ;;  %v3519_v28 = vpack.c.bf16 %v1616_v12, %v1614_v11  ;;  %v4548_v32 = vpop.f32.mrb[8].mxu1  ;;  %v3521_v38 = vpack.c.bf16 %v1621_v30, %v1619_v29  ;;  %v1626_v11 = vld [vmem:[#allocation2 + $0x380] sm:$0xff]  ;;  %v1628_v12 = vld [vmem:[#allocation2 + $0x390] sm:$0xff]  ;;  %v1631_v30 = vld [vmem:[#allocation2 + $0x3a8] sm:$0xff] }
 0x126   : > { %v1365_v41 = vmax.f32 %v662_v40, 0.0  ;;  %v665_v43 = vpop.f32.mrb[16].mxu0  ;;  %3508 = vmatpush1.bf16.msra.mxu1 %v3507_v13  ;;  %3592 = vmatpush1.bf16.msra.mxu0 %v3591_v42  ;;  %v1620_v40 = vld [vmem:[#allocation2 + $0x350] sm:$0xff]  ;;  %v4553_v21 = vpop.f32.mrb[9].mxu1  ;;  %v1629_v42 = vld [vmem:[#allocation2 + $0x398] sm:$0xff] }
 0x127   : > { %v666_v35 = vadd.f32 %v665_v43, %v4439_v1  ;;  %v667_v25 = vpop.f32.mrb[17].mxu0  ;;  %3262 = vmatmul.mubr.msk.f32.gmra.mrb[122].mxu0 %vm454_vm0, %v4164_v36  ;;  %3510 = vmatprep.subr.bf16.mxu1 %v3509_v33  ;;  %v1617_v36 = vld [vmem:[#allocation2 + $0x338] sm:$0xff] }
 0x128   : > { %v668_v53 = vadd.f32 %v667_v25, %v4445_v2  ;;  %1760 = vmatprep.mubr.f32.mxu1 %v1365_v41  ;;  %1261 = vmatprep.mubr.f32.mxu0 %v3870_v0  ;;  %v3517_v10 = vpack.c.bf16 %v1617_v36, %v1615_v15  ;;  %v1623_v41 = vld [vmem:[#allocation2 + $0x368] sm:$0xff]  ;;  %v1625_v43 = vld [vmem:[#allocation2 + $0x378] sm:$0xff] }
 0x129   : > { %1761 = vmatmul.mubr.f32.gmra.mrb[62].mxu1 %v1364_v47  ;;  %v1370_v4 = vmax.f32 %v666_v35, 0.0  ;;  %v3523_v47 = vpack.c.bf16 %v1620_v40, %v1618_v16  ;;  %v4557_v35 = vpop.f32.mrb[10].mxu1  ;;  %v3525_v27 = vpack.c.bf16 %v1625_v43, %v1623_v41  ;;  %v1627_v36 = vld [vmem:[#allocation2 + $0x388] sm:$0xff]  ;;  %v1630_v40 = vld [vmem:[#allocation2 + $0x3a0] sm:$0xff] }
 0x12a   : > { %v1371_v61 = vmax.f32 %v668_v53, 0.0  ;;  %v671_v62 = vpop.f32.mrb[18].mxu0  ;;  %3512 = vmatpush1.bf16.msra.mxu1 %v3511_v23  ;;  %v4562_v53 = vpop.f32.mrb[11].mxu1 }
 0x12b   : > { %v672_v8 = vadd.f32 %v671_v62, %v4439_v1  ;;  %v673_v26 = vpop.f32.mrb[19].mxu0  ;;  %3263 = vmatmul.mubr.msk.f32.gmra.mrb[124].mxu0 %vm454_vm0, %v4173_v44  ;;  %3514 = vmatprep.subr.bf16.mxu1 %v3513_v48 }
 0x12c   : > { %v674_v7 = vadd.f32 %v673_v26, %v4445_v2  ;;  %1766 = vmatprep.mubr.f32.mxu1 %v1371_v61  ;;  %1267 = vmatprep.mubr.f32.mxu0 %v3870_v0 }
 0x12d   : > { %1767 = vmatmul.mubr.f32.gmra.mrb[64].mxu1 %v1370_v4  ;;  %v1376_v44 = vmax.f32 %v672_v8, 0.0  ;;  %v4566_v4 = vpop.f32.mrb[12].mxu1 }
 0x12e   : > { %v1377_v13 = vmax.f32 %v674_v7, 0.0  ;;  %v677_v31 = vpop.f32.mrb[20].mxu0  ;;  %3516 = vmatpush1.bf16.msra.mxu1 %v3515_v24  ;;  %v3527_v24 = vpack.c.bf16 %v1624_v34, %v1622_v50  ;;  %v4571_v7 = vpop.f32.mrb[13].mxu1 }
 0x12f   : > { %v678_v14 = vadd.f32 %v677_v31, %v4439_v1  ;;  %v679_v33 = vpop.f32.mrb[21].mxu0  ;;  %3264 = vmatmul.mubr.msk.f32.gmra.mrb[126].mxu0 %vm454_vm0, %v4182_v52  ;;  %3518 = vmatprep.subr.bf16.mxu1 %v3517_v10  ;;  %v3529_v10 = vpack.c.bf16 %v1629_v42, %v1627_v36  ;;  %v1636_v36 = vld [vmem:[#allocation2 + $0x3d0] sm:$0xff] }
 0x130   : > { %v680_v56 = vadd.f32 %v679_v33, %v4445_v2  ;;  %1772 = vmatprep.mubr.f32.mxu1 %v1377_v13  ;;  %1273 = vmatprep.mubr.f32.mxu0 %v3870_v0  ;;  %v1633_v13 = vld [vmem:[#allocation2 + $0x3b8] sm:$0xff] }
 0x131   : > { %1773 = vmatmul.mubr.f32.gmra.mrb[66].mxu1 %v1376_v44  ;;  %v1382_v52 = vmax.f32 %v678_v14, 0.0  ;;  %v3531_v44 = vpack.c.bf16 %v1628_v12, %v1626_v11  ;;  %v4575_v14 = vpop.f32.mrb[14].mxu1  ;;  %v3533_v16 = vpack.c.bf16 %v1633_v13, %v1631_v30  ;;  %v1638_v30 = vld [vmem:[#allocation2 + $0x3e0] sm:$0xff]  ;;  %v1640_v13 = vld [vmem:[#allocation2 + $0x3f0] sm:$0xff] }
 0x132   : > { %v1383_v23 = vmax.f32 %v680_v56, 0.0  ;;  %v683_v19 = vpop.f32.mrb[22].mxu0  ;;  %3520 = vmatpush1.bf16.msra.mxu1 %v3519_v28  ;;  %v1632_v56 = vld [vmem:[#allocation2 + $0x3b0] sm:$0xff]  ;;  %v4580_v41 = vpop.f32.mrb[15].mxu1 }
 0x133   : > { %v684_v25 = vadd.f32 %v683_v19, %v4439_v1  ;;  %v685_v48 = vpop.f32.mrb[23].mxu0  ;;  %3265 = vmatmul.mubr.msk.f32.gmra.mrb[128].mxu0 %vm454_vm0, %v4191_v60  ;;  %3522 = vmatprep.subr.bf16.mxu1 %v3521_v38  ;;  %v1637_v19 = vld [vmem:[#allocation2 + $0x3d8] sm:$0xff] }
 0x134   : > { %v686_v15 = vadd.f32 %v685_v48, %v4445_v2  ;;  %1778 = vmatprep.mubr.f32.mxu1 %v1383_v23  ;;  %1279 = vmatprep.mubr.f32.mxu0 %v3870_v0  ;;  %v1635_v23 = vld [vmem:[#allocation2 + $0x3c8] sm:$0xff]  ;;  %v4584_v48 = vpop.f32.mrb[16].mxu1 }
 0x135   : > { %1779 = vmatmul.mubr.f32.gmra.mrb[68].mxu1 %v1382_v52  ;;  %v1388_v60 = vmax.f32 %v684_v25, 0.0  ;;  %v3535_v25 = vpack.c.bf16 %v1632_v56, %v1630_v40  ;;  %v3537_v34 = vpack.c.bf16 %v1637_v19, %v1635_v23  ;;  %v4589_v42 = vpop.f32.mrb[17].mxu1 }
 0x136   : > { %v1389_v61 = vmax.f32 %v686_v15, 0.0  ;;  %v689_v62 = vpop.f32.mrb[24].mxu0  ;;  %3524 = vmatpush1.bf16.msra.mxu1 %v3523_v47  ;;  %v1634_v15 = vld [vmem:[#allocation2 + $0x3c0] sm:$0xff] }
 0x137   : > { %v690_v8 = vadd.f32 %v689_v62, %v4439_v1  ;;  %v691_v26 = vpop.f32.mrb[25].mxu0  ;;  %3266 = vmatmul.mubr.msk.f32.gmra.mrb[130].mxu0 %vm454_vm0, %v4200_v5  ;;  %3526 = vmatprep.subr.bf16.mxu1 %v3525_v27  ;;  %v1639_v62 = vld [vmem:[#allocation2 + $0x3e8] sm:$0xff] }
 0x138   : > { %v692_v29 = vadd.f32 %v691_v26, %v4445_v2  ;;  %1784 = vmatprep.mubr.f32.mxu1 %v1389_v61  ;;  %1285 = vmatprep.mubr.f32.mxu0 %v3870_v0  ;;  %v3539_v26 = vpack.c.bf16 %v1636_v36, %v1634_v15 }
 0x139   : > { %1785 = vmatmul.mubr.f32.gmra.mrb[70].mxu1 %v1388_v60  ;;  %v1394_v5 = vmax.f32 %v690_v8, 0.0 }
 0x13a   : > { %v1395_v31 = vmax.f32 %v692_v29, 0.0  ;;  %v695_v28 = vpop.f32.mrb[26].mxu0  ;;  %3528 = vmatpush1.bf16.msra.mxu1 %v3527_v24  ;;  %v1641_v24 = vld [vmem:[#allocation2 + $0x3f8] sm:$0xff] }
 0x13b   : > { %v696_v33 = vadd.f32 %v695_v28, %v4439_v1  ;;  %v697_v38 = vpop.f32.mrb[27].mxu0  ;;  %3267 = vmatmul.mubr.msk.f32.gmra.mrb[132].mxu0 %vm454_vm0, %v4209_v18  ;;  %3530 = vmatprep.subr.bf16.mxu1 %v3529_v10  ;;  %v4593_v10 = vpop.f32.mrb[18].mxu1  ;;  %v3541_v29 = vpack.c.bf16 %v1641_v24, %v1639_v62 }
 0x13c   : > { %v698_v43 = vadd.f32 %v697_v38, %v4445_v2  ;;  %1790 = vmatprep.mubr.f32.mxu1 %v1395_v31  ;;  %1291 = vmatprep.mubr.f32.mxu0 %v3870_v0  ;;  %v4598_v31 = vpop.f32.mrb[19].mxu1 }
 0x13d   : > { %1791 = vmatmul.mubr.f32.gmra.mrb[72].mxu1 %v1394_v5  ;;  %v1400_v18 = vmax.f32 %v696_v33, 0.0  ;;  %v3543_v33 = vpack.c.bf16 %v1640_v13, %v1638_v30  ;;  %v4602_v38 = vpop.f32.mrb[20].mxu1 }
 0x13e   : > { %v1401_v47 = vmax.f32 %v698_v43, 0.0  ;;  %v701_v52 = vpop.f32.mrb[28].mxu0  ;;  %3532 = vmatpush1.bf16.msra.mxu1 %v3531_v44  ;;  %v4607_v56 = vpop.f32.mrb[21].mxu1 }
 0x13f   : > { %v702_v27 = vadd.f32 %v701_v52, %v4439_v1  ;;  %v703_v50 = vpop.f32.mrb[29].mxu0  ;;  %3268 = vmatmul.mubr.msk.f32.gmra.mrb[134].mxu0 %vm454_vm0, %v4218_v37  ;;  %3534 = vmatprep.subr.bf16.mxu1 %v3533_v16 }
 0x140   : > { %v704_v61 = vadd.f32 %v703_v50, %v4445_v2  ;;  %1796 = vmatprep.mubr.f32.mxu1 %v1401_v47  ;;  %1297 = vmatprep.mubr.f32.mxu0 %v3870_v0  ;;  %v4611_v47 = vpop.f32.mrb[22].mxu1 }
 0x141   : > { %1797 = vmatmul.mubr.f32.gmra.mrb[74].mxu1 %v1400_v18  ;;  %v1406_v37 = vmax.f32 %v702_v27, 0.0 }
 0x142   : > { %v1407_v60 = vmax.f32 %v704_v61, 0.0  ;;  %v707_v8 = vpop.f32.mrb[30].mxu0  ;;  %3536 = vmatpush1.bf16.msra.mxu1 %v3535_v25 }
 0x143   : > { %v708_v11 = vadd.f32 %v707_v8, %v4439_v1  ;;  %v709_v12 = vpop.f32.mrb[31].mxu0  ;;  %3269 = vmatmul.mubr.msk.f32.gmra.mrb[136].mxu0 %vm454_vm0, %v4227_v46  ;;  %3538 = vmatprep.subr.bf16.mxu1 %v3537_v34 }
 0x144   : > { %v710_v28 = vadd.f32 %v709_v12, %v4445_v2  ;;  %1802 = vmatprep.mubr.f32.mxu1 %v1407_v60  ;;  %1303 = vmatprep.mubr.f32.mxu0 %v3870_v0 }
 0x145   : > { %1803 = vmatmul.mubr.f32.gmra.mrb[76].mxu1 %v1406_v37  ;;  %v1412_v16 = vmax.f32 %v708_v11, 0.0 }
 0x146   : > { %v1413_v44 = vmax.f32 %v710_v28, 0.0  ;;  %v713_v5 = vpop.f32.mrb[32].mxu0  ;;  %3540 = vmatpush1.bf16.msra.mxu1 %v3539_v26 }
 0x147   : > { %v714_v46 = vadd.f32 %v713_v5, %v4439_v1  ;;  %v715_v40 = vpop.f32.mrb[33].mxu0  ;;  %3270 = vmatmul.mubr.msk.f32.gmra.mrb[138].mxu0 %vm454_vm0, %v4236_v55  ;;  %3542 = vmatprep.subr.bf16.mxu1 %v3541_v29  ;;  %v4616_v55 = vpop.f32.mrb[23].mxu1 }
 0x148   : > { %v716_v43 = vadd.f32 %v715_v40, %v4445_v2  ;;  %1808 = vmatprep.mubr.f32.mxu1 %v1413_v44  ;;  %1309 = vmatprep.mubr.f32.mxu0 %v3870_v0  ;;  %v4621_v15 = vpop.f32.mrb[24].mxu1 }
 0x149   : > { %1809 = vmatmul.mubr.f32.gmra.mrb[78].mxu1 %v1412_v16  ;;  %v1418_v52 = vmax.f32 %v714_v46, 0.0 }
 0x14a   : > { %v1419_v23 = vmax.f32 %v716_v43, 0.0  ;;  %v719_v19 = vpop.f32.mrb[34].mxu0  ;;  %3544 = vmatpush1.bf16.msra.mxu1 %v3543_v33 }
 0x14b   : > { %v720_v25 = vadd.f32 %v719_v19, %v4439_v1  ;;  %v721_v18 = vpop.f32.mrb[35].mxu0  ;;  %3271 = vmatmul.mubr.msk.f32.gmra.mrb[140].mxu0 %vm454_vm0, %v4245_v58  ;;  %3625 = vmatprep.subr.bf16.mxu1 %v5290_v6  ;;  %v4626_v58 = vpop.f32.mrb[25].mxu1 }
 0x14c   : > { %v722_v27 = vadd.f32 %v721_v18, %v4445_v2  ;;  %1814 = vmatprep.mubr.f32.mxu1 %v1419_v23  ;;  %1315 = vmatprep.mubr.f32.mxu0 %v3870_v0  ;;  %v4629_v8 = vpop.f32.mrb[26].mxu1 }
 0x14d   : > { %1815 = vmatmul.mubr.f32.gmra.mrb[80].mxu1 %v1418_v52  ;;  %v1424_v36 = vmax.f32 %v720_v25, 0.0  ;;  %v4632_v12 = vpop.f32.mrb[27].mxu1 }
 0x14e   : > { %v1425_v50 = vmax.f32 %v722_v27, 0.0  ;;  %v725_v34 = vpop.f32.mrb[36].mxu0  ;;  %v4635_v13 = vpop.f32.mrb[28].mxu1 }
 0x14f   : > { %v726_v61 = vadd.f32 %v725_v34, %v4439_v1  ;;  %v727_v62 = vpop.f32.mrb[37].mxu0  ;;  %3272 = vmatmul.mubr.msk.f32.gmra.mrb[142].mxu0 %vm454_vm0, %v4254_v59  ;;  %v4638_v33 = vpop.f32.mrb[29].mxu1 }
 0x150   : > { %v728_v24 = vadd.f32 %v727_v62, %v4445_v2  ;;  %1820 = vmatprep.mubr.f32.mxu1 %v1425_v50  ;;  %v4641_v43 = vpop.f32.mrb[30].mxu1 }
 0x151   : > { %1821 = vmatmul.mubr.f32.gmra.mrb[82].mxu1 %v1424_v36  ;;  %v1430_v26 = vmax.f32 %v726_v61, 0.0  ;;  %v4644_v25 = vpop.f32.mrb[31].mxu1 }
 0x152   : > { %v1431_v60 = vmax.f32 %v728_v24, 0.0  ;;  %v731_v0 = vpop.f32.mrb[38].mxu0  ;;  %v4647_v34 = vpop.f32.mrb[32].mxu1 }
 0x153   : > { %v732_v37 = vadd.f32 %v731_v0, %v4439_v1  ;;  %v733_v11 = vpop.f32.mrb[39].mxu0  ;;  %v4650_v24 = vpop.f32.mrb[33].mxu1 }
 0x154   : > { %v734_v29 = vadd.f32 %v733_v11, %v4445_v2  ;;  %1826 = vmatprep.mubr.f32.mxu1 %v1431_v60 }
 0x155   : > { %1827 = vmatmul.mubr.f32.gmra.mrb[84].mxu1 %v1430_v26  ;;  %v1436_v28 = vmax.f32 %v732_v37, 0.0  ;;  %v4653_v37 = vpop.f32.mrb[34].mxu1 }
 0x156   : > { %v1437_v59 = vmax.f32 %v734_v29, 0.0  ;;  %v737_v30 = vpop.f32.mrb[40].mxu0 }
 0x157   : > { %v738_v44 = vadd.f32 %v737_v30, %v4439_v1  ;;  %v739_v5 = vpop.f32.mrb[41].mxu0  ;;  %v4656_v30 = vpop.f32.mrb[35].mxu1 }
 0x158   : > { %v740_v16 = vadd.f32 %v739_v5, %v4445_v2  ;;  %1832 = vmatprep.mubr.f32.mxu1 %v1437_v59 }
 0x159   : > { %1833 = vmatmul.mubr.f32.gmra.mrb[86].mxu1 %v1436_v28  ;;  %v1442_v23 = vmax.f32 %v738_v44, 0.0 }
 0x15a   : > { %v1443_v46 = vmax.f32 %v740_v16, 0.0  ;;  %v743_v40 = vpop.f32.mrb[42].mxu0  ;;  %v4659_v16 = vpop.f32.mrb[36].mxu1 }
 0x15b   : > { %v744_v19 = vadd.f32 %v743_v40, %v4439_v1  ;;  %v745_v52 = vpop.f32.mrb[43].mxu0 }
 0x15c   : > { %v746_v18 = vadd.f32 %v745_v52, %v4445_v2  ;;  %1838 = vmatprep.mubr.f32.mxu1 %v1443_v46 }
 0x15d   : > { %1839 = vmatmul.mubr.f32.gmra.mrb[88].mxu1 %v1442_v23  ;;  %v1448_v36 = vmax.f32 %v744_v19, 0.0  ;;  %v4662_v19 = vpop.f32.mrb[37].mxu1 }
 0x15e   : > { %v1449_v27 = vmax.f32 %v746_v18, 0.0  ;;  %v749_v50 = vpop.f32.mrb[44].mxu0 }
 0x15f   : > { %v750_v61 = vadd.f32 %v749_v50, %v4439_v1  ;;  %v751_v62 = vpop.f32.mrb[45].mxu0  ;;  %v4665_v50 = vpop.f32.mrb[38].mxu1 }
 0x160   : > { %v752_v60 = vadd.f32 %v751_v62, %v4445_v2  ;;  %1844 = vmatprep.mubr.f32.mxu1 %v1449_v27 }
 0x161   : > { %1845 = vmatmul.mubr.f32.gmra.mrb[90].mxu1 %v1448_v36  ;;  %v1454_v11 = vmax.f32 %v750_v61, 0.0 }
 0x162   : > { %v1455_v0 = vmax.f32 %v752_v60, 0.0  ;;  %v755_v26 = vpop.f32.mrb[46].mxu0  ;;  %v4668_v60 = vpop.f32.mrb[39].mxu1 }
 0x163   : > { %v756_v29 = vadd.f32 %v755_v26, %v4439_v1  ;;  %v757_v59 = vpop.f32.mrb[47].mxu0 }
 0x164   : > { %v758_v28 = vadd.f32 %v757_v59, %v4445_v2  ;;  %1850 = vmatprep.mubr.f32.mxu1 %v1455_v0 }
 0x165   : > { %1851 = vmatmul.mubr.f32.gmra.mrb[92].mxu1 %v1454_v11  ;;  %v1460_v46 = vmax.f32 %v756_v29, 0.0  ;;  %v4671_v29 = vpop.f32.mrb[40].mxu1 }
 0x166   : > { %v1461_v44 = vmax.f32 %v758_v28, 0.0  ;;  %v761_v5 = vpop.f32.mrb[48].mxu0 }
 0x167   : > { %v762_v40 = vadd.f32 %v761_v5, %v4439_v1  ;;  %v763_v23 = vpop.f32.mrb[49].mxu0  ;;  %v4674_v5 = vpop.f32.mrb[41].mxu1 }
 0x168   : > { %v764_v52 = vadd.f32 %v763_v23, %v4445_v2  ;;  %1856 = vmatprep.mubr.f32.mxu1 %v1461_v44 }
 0x169   : > { %1857 = vmatmul.mubr.f32.gmra.mrb[94].mxu1 %v1460_v46  ;;  %v1466_v36 = vmax.f32 %v762_v40, 0.0 }
 0x16a   : > { %v1467_v18 = vmax.f32 %v764_v52, 0.0  ;;  %v767_v27 = vpop.f32.mrb[50].mxu0  ;;  %v4677_v52 = vpop.f32.mrb[42].mxu1 }
 0x16b   : > { %v768_v61 = vadd.f32 %v767_v27, %v4439_v1  ;;  %v769_v62 = vpop.f32.mrb[51].mxu0  ;;  %5300 = vst [vmem:[#allocation6_spill] sm:$0xff] %v4677_v52 }
 0x16c   : > { %v770_v0 = vadd.f32 %v769_v62, %v4445_v2  ;;  %1862 = vmatprep.mubr.f32.mxu1 %v1467_v18  ;;  %v4680_v62 = vpop.f32.mrb[43].mxu1 }
 0x16d   : > { %1863 = vmatmul.mubr.f32.gmra.mrb[96].mxu1 %v1466_v36  ;;  %v1472_v59 = vmax.f32 %v768_v61, 0.0  ;;  %5301 = vst [vmem:[#allocation7_spill] sm:$0xff] %v4680_v62  ;;  %v4683_v22 = vpop.f32.mrb[44].mxu1  ;;  %v2562_v62 = vld [vmem:[%s5282_s8 + $0x10] sm:$0xff] }
 0x16e   : > { %v1473_v26 = vmax.f32 %v770_v0, 0.0  ;;  %v773_v11 = vpop.f32.mrb[52].mxu0  ;;  %5302 = vst [vmem:[#allocation8_spill] sm:$0xff] %v4683_v22 }
 0x16f   : > { %v774_v28 = vadd.f32 %v773_v11, %v4439_v1  ;;  %v775_v44 = vpop.f32.mrb[53].mxu0 }
 0x170   : > { %v776_v46 = vadd.f32 %v775_v44, %v4445_v2  ;;  %1868 = vmatprep.mubr.f32.mxu1 %v1473_v26 }
 0x171   : > { %1869 = vmatmul.mubr.f32.gmra.mrb[98].mxu1 %v1472_v59  ;;  %v1478_v18 = vmax.f32 %v774_v28, 0.0 }
 0x172   : > { %v1479_v40 = vmax.f32 %v776_v46, 0.0  ;;  %v779_v23 = vpop.f32.mrb[54].mxu0  ;;  %v4686_v46 = vpop.f32.mrb[45].mxu1 }
 0x173   : > { %v780_v27 = vadd.f32 %v779_v23, %v4439_v1  ;;  %v781_v36 = vpop.f32.mrb[55].mxu0  ;;  %5303 = vst [vmem:[#allocation9_spill] sm:$0xff] %v4686_v46  ;;  %v4689_v6 = vpop.f32.mrb[46].mxu1 }
 0x174   : > { %v782_v61 = vadd.f32 %v781_v36, %v4445_v2  ;;  %1874 = vmatprep.mubr.f32.mxu1 %v1479_v40  ;;  %5304 = vst [vmem:[#allocation10_spill] sm:$0xff] %v4689_v6 }
 0x175   : > { %1875 = vmatmul.mubr.f32.gmra.mrb[100].mxu1 %v1478_v18  ;;  %v1484_v26 = vmax.f32 %v780_v27, 0.0 }
 0x176   : > { %v1485_v0 = vmax.f32 %v782_v61, 0.0  ;;  %v785_v11 = vpop.f32.mrb[56].mxu0  ;;  %v4692_v61 = vpop.f32.mrb[47].mxu1 }
 0x177   : > { %v786_v59 = vadd.f32 %v785_v11, %v4439_v1  ;;  %v787_v44 = vpop.f32.mrb[57].mxu0  ;;  %5305 = vst [vmem:[#allocation11_spill] sm:$0xff] %v4692_v61 }
 0x178   : > { %v788_v28 = vadd.f32 %v787_v44, %v4445_v2  ;;  %1880 = vmatprep.mubr.f32.mxu1 %v1485_v0  ;;  %v434_v44 = vsub.s32 2, %v4414_v54 }
 0x179   : > { %1881 = vmatmul.mubr.f32.gmra.mrb[102].mxu1 %v1484_v26  ;;  %v1490_v40 = vmax.f32 %v786_v59, 0.0 }
 0x17a   : > { %v1491_v23 = vmax.f32 %v788_v28, 0.0  ;;  %v791_v17 = vpop.f32.mrb[58].mxu0 }
 0x17b   : > { %v792_v18 = vadd.f32 %v791_v17, %v4439_v1  ;;  %v793_v36 = vpop.f32.mrb[59].mxu0  ;;  %v438_v17 = vsub.s32 3, %v4414_v54 }
 0x17c   : > { %v794_v27 = vadd.f32 %v793_v36, %v4445_v2  ;;  %1886 = vmatprep.mubr.f32.mxu1 %v1491_v23  ;;  %v4701_v36 = vrot.slane %v4425_v57, %v434_v44 }
 0x17d   : > { %1887 = vmatmul.mubr.f32.gmra.mrb[104].mxu1 %v1490_v40  ;;  %v1496_v46 = vmax.f32 %v792_v18, 0.0  ;;  %v4705_v18 = vrot.slane %v4425_v57, %v438_v17  ;;  %v2529_v57 = vld [vmem:[%s5281_s7 + $0x8] sm:$0xff] }
 0x17e   : > { %v1497_v11 = vmax.f32 %v794_v27, 0.0  ;;  %v797_v22 = vpop.f32.mrb[60].mxu0 }
 0x17f   : > { %v798_v0 = vadd.f32 %v797_v22, %v4439_v1  ;;  %v799_v26 = vpop.f32.mrb[61].mxu0 }
 0x180   : > { %v800_v28 = vadd.f32 %v799_v26, %v4445_v2  ;;  %1892 = vmatprep.mubr.f32.mxu1 %v1497_v11 }
 0x181   : > { %1893 = vmatmul.mubr.f32.gmra.mrb[106].mxu1 %v1496_v46  ;;  %v1502_v61 = vmax.f32 %v798_v0, 0.0 }
 0x182   : > { %v1503_v59 = vmax.f32 %v800_v28, 0.0  ;;  %v803_v6 = vpop.f32.mrb[62].mxu0 }
 0x183   : > { %v804_v23 = vadd.f32 %v803_v6, %v4439_v1  ;;  %v805_v40 = vpop.f32.mrb[63].mxu0 }
 0x184   : > { %v806_v22 = vadd.f32 %v805_v40, %v4445_v2  ;;  %1898 = vmatprep.mubr.f32.mxu1 %v1503_v59  ;;  %v2528_v2 = vld [vmem:[%s5281_s7] sm:$0xff] }
 0x185   : > { %1899 = vmatmul.mubr.f32.gmra.mrb[108].mxu1 %v1502_v61  ;;  %v1508_v26 = vmax.f32 %v804_v23, 0.0  ;;  %v3626_v59 = vpack.c.bf16 %v2529_v57, %v2528_v2  ;;  %v2531_v2 = vld [vmem:[%s5281_s7 + $0x18] sm:$0xff] }
 0x186   : > { %v1509_v27 = vmax.f32 %v806_v22, 0.0  ;;  %v874_v11 = vpop.f32.mrb[64].mxu0 }
 0x187   : > { %v875_v46 = vadd.f32 %v874_v11, %v4701_v36  ;;  %v876_v28 = vpop.f32.mrb[65].mxu0 }
 0x188   : > { %v877_v0 = vadd.f32 %v876_v28, %v4705_v18  ;;  %1904 = vmatprep.mubr.f32.mxu1 %v1509_v27  ;;  %v5306_v28 = vmov 0.0|0.0  }
 0x189   : > { %1905 = vmatmul.mubr.f32.gmra.mrb[110].mxu1 %v1508_v26  ;;  %v1324_v61 = vmax.f32 %v875_v46, 0.0 }
 0x18a   : > { %v1325_v6 = vmax.f32 %v877_v0, 0.0  ;;  %v880_v1 = vpop.f32.mrb[66].mxu0 }
 0x18b   : > { %v881_v44 = vadd.f32 %v880_v1, %v4701_v36  ;;  %v882_v17 = vpop.f32.mrb[67].mxu0 }
 0x18c   : > { %v883_v23 = vadd.f32 %v882_v17, %v4705_v18  ;;  %1975 = vmatprep.mubr.f32.mxu1 %v1325_v6  ;;  %v2530_v6 = vld [vmem:[%s5281_s7 + $0x10] sm:$0xff] }
 0x18d   : > { %1976 = vmatmul.mubr.f32.vlgmr.msra.gmra.mrb[48].mxu1 %v1324_v61  ;;  %v1330_v27 = vmax.f32 %v881_v44, 0.0  ;;  %v3629_v17 = vpack.c.bf16 %v2531_v2, %v2530_v6  ;;  %v2533_v6 = vld [vmem:[%s5281_s7 + $0x28] sm:$0xff] }
 0x18e   : > { %v1331_v40 = vmax.f32 %v883_v23, 0.0  ;;  %v886_v22 = vpop.f32.mrb[68].mxu0  ;;  %3627 = vmatpush1.bf16.msra.mxu1 %v3626_v59 }
 0x18f   : > { %v887_v11 = vadd.f32 %v886_v22, %v4701_v36  ;;  %v888_v26 = vpop.f32.mrb[69].mxu0  ;;  %3628 = vmatprep.subr.bf16.mxu1 %v5306_v28 }
 0x190   : > { %v889_v0 = vadd.f32 %v888_v26, %v4705_v18  ;;  %1981 = vmatprep.mubr.f32.mxu1 %v1331_v40 }
 0x191   : > { %1982 = vmatmul.mubr.f32.gmra.mrb[50].mxu1 %v1330_v27  ;;  %v1336_v57 = vmax.f32 %v887_v11, 0.0 }
 0x192   : > { %v1337_v46 = vmax.f32 %v889_v0, 0.0  ;;  %v892_v1 = vpop.f32.mrb[70].mxu0  ;;  %3630 = vmatpush1.bf16.msra.mxu1 %v3629_v17 }
 0x193   : > { %v893_v61 = vadd.f32 %v892_v1, %v4701_v36  ;;  %v894_v44 = vpop.f32.mrb[71].mxu0  ;;  %3631 = vmatprep.subr.bf16.mxu1 %v5306_v28 }
 0x194   : > { %v895_v59 = vadd.f32 %v894_v44, %v4705_v18  ;;  %1987 = vmatprep.mubr.f32.mxu1 %v1337_v46  ;;  %v2532_v46 = vld [vmem:[%s5281_s7 + $0x20] sm:$0xff] }
 0x195   : > { %1988 = vmatmul.mubr.f32.gmra.mrb[52].mxu1 %v1336_v57  ;;  %v1342_v22 = vmax.f32 %v893_v61, 0.0  ;;  %v3632_v44 = vpack.c.bf16 %v2533_v6, %v2532_v46  ;;  %v2534_v6 = vld [vmem:[%s5281_s7 + $0x30] sm:$0xff] }
 0x196   : > { %v1343_v23 = vmax.f32 %v895_v59, 0.0  ;;  %v898_v40 = vpop.f32.mrb[72].mxu0 }
 0x197   : > { %v899_v27 = vadd.f32 %v898_v40, %v4701_v36  ;;  %v900_v26 = vpop.f32.mrb[73].mxu0  ;;  %3633 = vmatpush1.bf16.msra.mxu1 %v3632_v44 }
 0x198   : > { %v901_v0 = vadd.f32 %v900_v26, %v4705_v18  ;;  %1993 = vmatprep.mubr.f32.mxu1 %v1343_v23  ;;  %3634 = vmatprep.subr.bf16.mxu1 %v5306_v28 }
 0x199   : > { %1994 = vmatmul.mubr.f32.gmra.mrb[54].mxu1 %v1342_v22  ;;  %v1348_v2 = vmax.f32 %v899_v27, 0.0 }
 0x19a   : > { %v1349_v11 = vmax.f32 %v901_v0, 0.0  ;;  %v904_v1 = vpop.f32.mrb[74].mxu0  ;;  %v442_v0 = vsub.s32 4, %v4414_v54 }
 0x19b   : > { %v905_v57 = vadd.f32 %v904_v1, %v4701_v36  ;;  %v906_v61 = vpop.f32.mrb[75].mxu0  ;;  %v446_v1 = vsub.s32 5, %v4414_v54 }
 0x19c   : > { %v907_v17 = vadd.f32 %v906_v61, %v4705_v18  ;;  %1999 = vmatprep.mubr.f32.mxu1 %v1349_v11 }
 0x19d   : > { %2000 = vmatmul.mubr.f32.gmra.mrb[56].mxu1 %v1348_v2  ;;  %v1354_v40 = vmax.f32 %v905_v57, 0.0  ;;  %v2535_v2 = vld [vmem:[%s5281_s7 + $0x38] sm:$0xff] }
 0x19e   : > { %v1355_v59 = vmax.f32 %v907_v17, 0.0  ;;  %v910_v23 = vpop.f32.mrb[76].mxu0  ;;  %v3826_v17 = vld [vmem:[%s5276_s2] sm:$0x3f] }
 0x19f   : > { %v911_v22 = vadd.f32 %v910_v23, %v4701_v36  ;;  %v912_v26 = vpop.f32.mrb[77].mxu0  ;;  %v3635_v23 = vpack.c.bf16 %v2535_v2, %v2534_v6 }
 0x1a0   : > { %v913_v27 = vadd.f32 %v912_v26, %v4705_v18  ;;  %2005 = vmatprep.mubr.f32.mxu1 %v1355_v59  ;;  %v4754_v59 = vrot.slane %v3826_v17, %v442_v0  ;;  %v2537_v0 = vld [vmem:[%s5281_s7 + $0x48] sm:$0xff] }
 0x1a1   : > { %2006 = vmatmul.mubr.f32.gmra.mrb[58].mxu1 %v1354_v40  ;;  %v1360_v57 = vmax.f32 %v911_v22, 0.0  ;;  %v925_v40 = vadd.f32 %v4504_v9, %v4705_v18  ;;  %v923_v9 = vadd.f32 %v4499_v63, %v4701_v36  ;;  %v929_v63 = vadd.f32 %v4514_v49, %v4701_v36  ;;  %v2541_v49 = vld [vmem:[%s5281_s7 + $0x68] sm:$0xff] }
 0x1a2   : > { %v1361_v46 = vmax.f32 %v913_v27, 0.0  ;;  %v916_v11 = vpop.f32.mrb[78].mxu0  ;;  %v4759_v27 = vrot.slane %v3826_v17, %v446_v1  ;;  %3636 = vmatpush1.bf16.msra.mxu1 %v3635_v23  ;;  %v2538_v23 = vld [vmem:[%s5281_s7 + $0x50] sm:$0xff] }
 0x1a3   : > { %v917_v61 = vadd.f32 %v916_v11, %v4701_v36  ;;  %v918_v44 = vpop.f32.mrb[79].mxu0  ;;  %v2536_v11 = vld [vmem:[%s5281_s7 + $0x40] sm:$0xff]  ;;  %3637 = vmatprep.subr.bf16.mxu1 %v5306_v28 }
 0x1a4   : > { %v919_v26 = vadd.f32 %v918_v44, %v4705_v18  ;;  %2011 = vmatprep.mubr.f32.mxu1 %v1361_v46  ;;  %v3638_v2 = vpack.c.bf16 %v2537_v0, %v2536_v11  ;;  %v931_v44 = vadd.f32 %v4519_v39, %v4705_v18 }
 0x1a5   : > { %2012 = vmatmul.mubr.f32.gmra.mrb[60].mxu1 %v1360_v57  ;;  %v1366_v6 = vmax.f32 %v917_v61, 0.0  ;;  %v1373_v57 = vmax.f32 %v925_v40, 0.0 }
 0x1a6   : > { %v1367_v22 = vmax.f32 %v919_v26, 0.0  ;;  %v1131_v54 = vpop.f32.mrb[80].mxu0  ;;  %3639 = vmatpush1.bf16.msra.mxu1 %v3638_v2  ;;  %v2540_v26 = vld [vmem:[%s5281_s7 + $0x60] sm:$0xff]  ;;  %v2561_v2 = vld [vmem:[%s5282_s8 + $0x8] sm:$0xff] }
 0x1a7   : > { %v1132_v46 = vadd.f32 %v1131_v54, %v4754_v59  ;;  %v1133_v1 = vpop.f32.mrb[81].mxu0  ;;  %v2539_v54 = vld [vmem:[%s5281_s7 + $0x58] sm:$0xff]  ;;  %3640 = vmatprep.subr.bf16.mxu1 %v5306_v28  ;;  %v3644_v52 = vpack.c.bf16 %v2541_v49, %v2540_v26 }
 0x1a8   : > { %v1134_v17 = vadd.f32 %v1133_v1, %v4759_v27  ;;  %2017 = vmatprep.mubr.f32.mxu1 %v1367_v22  ;;  %v3641_v39 = vpack.c.bf16 %v2539_v54, %v2538_v23  ;;  %v1372_v22 = vmax.f32 %v923_v9, 0.0  ;;  %v2560_v1 = vld [vmem:[%s5282_s8] sm:$0xff]  ;;  %v937_v9 = vadd.f32 %v4535_v51, %v4705_v18  ;;  %v2563_v51 = vld [vmem:[%s5282_s8 + $0x18] sm:$0xff] }
 0x1a9   : > { %2018 = vmatmul.mubr.f32.gmra.mrb[62].mxu1 %v1366_v6  ;;  %v1326_v11 = vmax.f32 %v1132_v46, 0.0  ;;  %v1378_v23 = vmax.f32 %v929_v63, 0.0  ;;  %v2543_v26 = vld [vmem:[%s5281_s7 + $0x78] sm:$0xff] }
 0x1aa   : > { %v1327_v61 = vmax.f32 %v1134_v17, 0.0  ;;  %v1137_v40 = vpop.f32.mrb[82].mxu0  ;;  %2023 = vmatprep.mubr.f32.mxu1 %v1373_v57  ;;  %v1379_v57 = vmax.f32 %v931_v44, 0.0  ;;  %v3593_v17 = vpack.c.bf16 %v2561_v2, %v2560_v1  ;;  %3642 = vmatpush1.bf16.msra.mxu1 %v3641_v39  ;;  %v935_v44 = vadd.f32 %v4524_v45, %v4701_v36  ;;  %v2542_v39 = vld [vmem:[%s5281_s7 + $0x70] sm:$0xff] }
 0x1ab   : > { %v1138_v0 = vadd.f32 %v1137_v40, %v4754_v59  ;;  %v1139_v6 = vpop.f32.mrb[83].mxu0  ;;  %3643 = vmatprep.subr.bf16.mxu1 %v5306_v28  ;;  %v943_v45 = vadd.f32 %v4544_v20, %v4705_v18  ;;  %v3647_v2 = vpack.c.bf16 %v2543_v26, %v2542_v39  ;;  %v2544_v20 = vld [vmem:[%s5281_s7 + $0x80] sm:$0xff] }
 0x1ac   : > { %v1140_v46 = vadd.f32 %v1139_v6, %v4759_v27  ;;  %2335 = vmatprep.mubr.f32.mxu0 %v1327_v61  ;;  %3594 = vmatprep.subr.bf16.mxu0 %v3593_v17  ;;  %v1385_v6 = vmax.f32 %v937_v9, 0.0 }
 0x1ad   : > { %2024 = vmatmul.mubr.f32.gmra.mrb[64].mxu1 %v1372_v22  ;;  %2336 = vmatmul.mubr.f32.vlgmr.msra.gmra.mrb[144].mxu0 %v1326_v11  ;;  %v1332_v61 = vmax.f32 %v1138_v0, 0.0  ;;  %v3597_v11 = vpack.c.bf16 %v2563_v51, %v2562_v62 }
 0x1ae   : > { %v1333_v54 = vmax.f32 %v1140_v46, 0.0  ;;  %v1143_v40 = vpop.f32.mrb[84].mxu0  ;;  %2029 = vmatprep.mubr.f32.mxu1 %v1379_v57  ;;  %3596 = vmatpush3.bf16.msra.mxu0 %v3593_v17  ;;  %v1384_v57 = vmax.f32 %v935_v44, 0.0  ;;  %v941_v46 = vadd.f32 %v4539_v3, %v4701_v36  ;;  %v2545_v17 = vld [vmem:[%s5281_s7 + $0x88] sm:$0xff] }
 0x1af   : > { %v1144_v22 = vadd.f32 %v1143_v40, %v4754_v59  ;;  %v1145_v63 = vpop.f32.mrb[85].mxu0  ;;  %3645 = vmatpush1.bf16.msra.mxu1 %v3644_v52  ;;  %3598 = vmatprep.subr.bf16.mxu0 %v3597_v11  ;;  %v1391_v52 = vmax.f32 %v943_v45, 0.0  ;;  %v3650_v44 = vpack.c.bf16 %v2545_v17, %v2544_v20  ;;  %v955_v45 = vadd.f32 %v4562_v53, %v4705_v18  ;;  %v2548_v53 = vld [vmem:[%s5281_s7 + $0xa0] sm:$0xff] }
 0x1b0   : > { %v1146_v0 = vadd.f32 %v1145_v63, %v4759_v27  ;;  %2340 = vmatprep.mubr.f32.mxu0 %v1333_v54  ;;  %3646 = vmatprep.subr.bf16.mxu1 %v5306_v28  ;;  %v961_v17 = vadd.f32 %v4571_v7, %v4705_v18  ;;  %v2550_v7 = vld [vmem:[%s5281_s7 + $0xb0] sm:$0xff] }
 0x1b1   : > { %2030 = vmatmul.mubr.f32.gmra.mrb[66].mxu1 %v1378_v23  ;;  %2341 = vmatmul.mubr.f32.gmra.mrb[146].mxu0 %v1332_v61  ;;  %v1338_v62 = vmax.f32 %v1144_v22, 0.0  ;;  %v949_v23 = vadd.f32 %v4553_v21, %v4705_v18  ;;  %v1390_v61 = vmax.f32 %v941_v46, 0.0  ;;  %v947_v22 = vadd.f32 %v4548_v32, %v4701_v36  ;;  %v2546_v21 = vld [vmem:[%s5281_s7 + $0x90] sm:$0xff] }
 0x1b2   : > { %v1339_v49 = vmax.f32 %v1146_v0, 0.0  ;;  %v1149_v1 = vpop.f32.mrb[86].mxu0  ;;  %2035 = vmatprep.mubr.f32.mxu1 %v1385_v6  ;;  %3600 = vmatpush3.bf16.msra.mxu0 %v3597_v11  ;;  %v2547_v11 = vld [vmem:[%s5281_s7 + $0x98] sm:$0xff]  ;;  %v1403_v20 = vmax.f32 %v955_v45, 0.0 }
 0x1b3   : > { %v1150_v9 = vadd.f32 %v1149_v1, %v4754_v59  ;;  %v1151_v40 = vpop.f32.mrb[87].mxu0  ;;  %3648 = vmatpush1.bf16.msra.mxu1 %v3647_v2  ;;  %v1397_v6 = vmax.f32 %v949_v23, 0.0  ;;  %v3653_v1 = vpack.c.bf16 %v2547_v11, %v2546_v21  ;;  %v1396_v2 = vmax.f32 %v947_v22, 0.0 }
 0x1b4   : > { %v1152_v3 = vadd.f32 %v1151_v40, %v4759_v27  ;;  %2345 = vmatprep.mubr.f32.mxu0 %v1339_v49  ;;  %3649 = vmatprep.subr.bf16.mxu1 %v5306_v28  ;;  %v2549_v40 = vld [vmem:[%s5281_s7 + $0xa8] sm:$0xff] }
 0x1b5   : > { %2036 = vmatmul.mubr.f32.gmra.mrb[68].mxu1 %v1384_v57  ;;  %2346 = vmatmul.mubr.f32.gmra.mrb[148].mxu0 %v1338_v62  ;;  %v1344_v63 = vmax.f32 %v1150_v9, 0.0  ;;  %v953_v57 = vadd.f32 %v4557_v35, %v4701_v36 }
 0x1b6   : > { %v1345_v54 = vmax.f32 %v1152_v3, 0.0  ;;  %v1155_v51 = vpop.f32.mrb[88].mxu0  ;;  %2041 = vmatprep.mubr.f32.mxu1 %v1391_v52  ;;  %v3656_v3 = vpack.c.bf16 %v2549_v40, %v2548_v53 }
 0x1b7   : > { %v1156_v39 = vadd.f32 %v1155_v51, %v4754_v59  ;;  %v1157_v26 = vpop.f32.mrb[89].mxu0  ;;  %3651 = vmatpush1.bf16.msra.mxu1 %v3650_v44  ;;  %v959_v51 = vadd.f32 %v4566_v4, %v4701_v36 }
 0x1b8   : > { %v1158_v32 = vadd.f32 %v1157_v26, %v4759_v27  ;;  %2350 = vmatprep.mubr.f32.mxu0 %v1345_v54  ;;  %3652 = vmatprep.subr.bf16.mxu1 %v5306_v28  ;;  %v1402_v54 = vmax.f32 %v953_v57, 0.0  ;;  %v967_v26 = vadd.f32 %v4580_v41, %v4705_v18  ;;  %v2552_v41 = vld [vmem:[%s5281_s7 + $0xc0] sm:$0xff] }
 0x1b9   : > { %2042 = vmatmul.mubr.f32.gmra.mrb[70].mxu1 %v1390_v61  ;;  %2351 = vmatmul.mubr.f32.gmra.mrb[150].mxu0 %v1344_v63  ;;  %v1350_v46 = vmax.f32 %v1156_v39, 0.0  ;;  %v2551_v63 = vld [vmem:[%s5281_s7 + $0xb8] sm:$0xff]  ;;  %v1409_v39 = vmax.f32 %v961_v17, 0.0  ;;  %v1408_v45 = vmax.f32 %v959_v51, 0.0 }
 0x1ba   : > { %v1351_v0 = vmax.f32 %v1158_v32, 0.0  ;;  %v1161_v49 = vpop.f32.mrb[90].mxu0  ;;  %2047 = vmatprep.mubr.f32.mxu1 %v1397_v6  ;;  %v3659_v6 = vpack.c.bf16 %v2551_v63, %v2550_v7  ;;  %v965_v32 = vadd.f32 %v4575_v14, %v4701_v36  ;;  %v1415_v57 = vmax.f32 %v967_v26, 0.0 }
 0x1bb   : > { %v1162_v62 = vadd.f32 %v1161_v49, %v4754_v59  ;;  %v1163_v9 = vpop.f32.mrb[91].mxu0  ;;  %3654 = vmatpush1.bf16.msra.mxu1 %v3653_v1  ;;  %v977_v7 = vadd.f32 %v4593_v10, %v4701_v36 }
 0x1bc   : > { %v1164_v35 = vadd.f32 %v1163_v9, %v4759_v27  ;;  %2355 = vmatprep.mubr.f32.mxu0 %v1351_v0  ;;  %3655 = vmatprep.subr.bf16.mxu1 %v5306_v28  ;;  %v1414_v40 = vmax.f32 %v965_v32, 0.0 }
 0x1bd   : > { %2048 = vmatmul.mubr.f32.gmra.mrb[72].mxu1 %v1396_v2  ;;  %2356 = vmatmul.mubr.f32.gmra.mrb[152].mxu0 %v1350_v46  ;;  %v1356_v44 = vmax.f32 %v1162_v62, 0.0  ;;  %v2553_v2 = vld [vmem:[%s5281_s7 + $0xc8] sm:$0xff]  ;;  %v973_v46 = vadd.f32 %v4589_v42, %v4705_v18  ;;  %v2554_v42 = vld [vmem:[%s5281_s7 + $0xd0] sm:$0xff]  ;;  %v1426_v10 = vmax.f32 %v977_v7, 0.0 }
 0x1be   : > { %v1357_v52 = vmax.f32 %v1164_v35, 0.0  ;;  %v1167_v23 = vpop.f32.mrb[92].mxu0  ;;  %2053 = vmatprep.mubr.f32.mxu1 %v1403_v20  ;;  %v3662_v53 = vpack.c.bf16 %v2553_v2, %v2552_v41  ;;  %v971_v20 = vadd.f32 %v4584_v48, %v4701_v36 }
 0x1bf   : > { %v1168_v61 = vadd.f32 %v1167_v23, %v4754_v59  ;;  %v1169_v22 = vpop.f32.mrb[93].mxu0  ;;  %3657 = vmatpush1.bf16.msra.mxu1 %v3656_v3  ;;  %v2555_v23 = vld [vmem:[%s5281_s7 + $0xd8] sm:$0xff]  ;;  %v1421_v3 = vmax.f32 %v973_v46, 0.0 }
 0x1c0   : > { %v1170_v4 = vadd.f32 %v1169_v22, %v4759_v27  ;;  %2360 = vmatprep.mubr.f32.mxu0 %v1357_v52  ;;  %3658 = vmatprep.subr.bf16.mxu1 %v5306_v28  ;;  %v1420_v22 = vmax.f32 %v971_v20, 0.0 }
 0x1c1   : > { %2054 = vmatmul.mubr.f32.gmra.mrb[74].mxu1 %v1402_v54  ;;  %2361 = vmatmul.mubr.f32.gmra.mrb[154].mxu0 %v1356_v44  ;;  %v1362_v0 = vmax.f32 %v1168_v61, 0.0  ;;  %v979_v54 = vadd.f32 %v4598_v31, %v4705_v18  ;;  %v3665_v61 = vpack.c.bf16 %v2555_v23, %v2554_v42 }
 0x1c2   : > { %v1363_v21 = vmax.f32 %v1170_v4, 0.0  ;;  %v1173_v11 = vpop.f32.mrb[94].mxu0  ;;  %2059 = vmatprep.mubr.f32.mxu1 %v1409_v39  ;;  %v985_v4 = vadd.f32 %v4607_v56, %v4705_v18 }
 0x1c3   : > { %v1174_v49 = vadd.f32 %v1173_v11, %v4754_v59  ;;  %v1175_v1 = vpop.f32.mrb[95].mxu0  ;;  %3660 = vmatpush1.bf16.msra.mxu1 %v3659_v6  ;;  %v1427_v31 = vmax.f32 %v979_v54, 0.0 }
 0x1c4   : > { %v1176_v14 = vadd.f32 %v1175_v1, %v4759_v27  ;;  %2365 = vmatprep.mubr.f32.mxu0 %v1363_v21  ;;  %3661 = vmatprep.subr.bf16.mxu1 %v5306_v28  ;;  %v1433_v56 = vmax.f32 %v985_v4, 0.0  ;;  %v991_v1 = vadd.f32 %v4616_v55, %v4705_v18  ;;  %v997_v55 = vadd.f32 %v4626_v58, %v4705_v18 }
 0x1c5   : > { %2060 = vmatmul.mubr.f32.gmra.mrb[76].mxu1 %v1408_v45  ;;  %2366 = vmatmul.mubr.f32.gmra.mrb[156].mxu0 %v1362_v0  ;;  %v1368_v17 = vmax.f32 %v1174_v49, 0.0  ;;  %v983_v45 = vadd.f32 %v4602_v38, %v4701_v36  ;;  %v989_v38 = vadd.f32 %v4611_v47, %v4701_v36  ;;  %v995_v47 = vadd.f32 %v4621_v15, %v4701_v36 }
 0x1c6   : > { %v1369_v62 = vmax.f32 %v1176_v14, 0.0  ;;  %v1179_v9 = vpop.f32.mrb[96].mxu0  ;;  %2065 = vmatprep.mubr.f32.mxu1 %v1415_v57  ;;  %v1003_v58 = vadd.f32 %v4632_v12, %v4705_v18  ;;  %v1001_v15 = vadd.f32 %v4629_v8, %v4701_v36  ;;  %v1009_v12 = vadd.f32 %v4638_v33, %v4705_v18  ;;  %v2557_v8 = vld [vmem:[%s5281_s7 + $0xe8] sm:$0xff] }
 0x1c7   : > { %v1180_v35 = vadd.f32 %v1179_v9, %v4754_v59  ;;  %v1181_v52 = vpop.f32.mrb[97].mxu0  ;;  %3663 = vmatpush1.bf16.msra.mxu1 %v3662_v53  ;;  %v1432_v46 = vmax.f32 %v983_v45, 0.0  ;;  %v1439_v53 = vmax.f32 %v991_v1, 0.0  ;;  %v1007_v33 = vadd.f32 %v4635_v13, %v4701_v36  ;;  %v2559_v13 = vld [vmem:[%s5281_s7 + $0xf8] sm:$0xff] }
 0x1c8   : > { %v1182_v48 = vadd.f32 %v1181_v52, %v4759_v27  ;;  %2370 = vmatprep.mubr.f32.mxu0 %v1369_v62  ;;  %3664 = vmatprep.subr.bf16.mxu1 %v5306_v28 }
 0x1c9   : > { %2066 = vmatmul.mubr.f32.gmra.mrb[78].mxu1 %v1414_v40  ;;  %2371 = vmatmul.mubr.f32.gmra.mrb[158].mxu0 %v1368_v17  ;;  %v1374_v63 = vmax.f32 %v1180_v35, 0.0  ;;  %v1438_v35 = vmax.f32 %v989_v38, 0.0 }
 0x1ca   : > { %v1375_v51 = vmax.f32 %v1182_v48, 0.0  ;;  %v1185_v44 = vpop.f32.mrb[98].mxu0  ;;  %2071 = vmatprep.mubr.f32.mxu1 %v1421_v3  ;;  %v1445_v3 = vmax.f32 %v997_v55, 0.0 }
 0x1cb   : > { %v1186_v39 = vadd.f32 %v1185_v44, %v4754_v59  ;;  %v1187_v26 = vpop.f32.mrb[99].mxu0  ;;  %3666 = vmatpush1.bf16.msra.mxu1 %v3665_v61  ;;  %v1444_v44 = vmax.f32 %v995_v47, 0.0 }
 0x1cc   : > { %v1188_v21 = vadd.f32 %v1187_v26, %v4759_v27  ;;  %2375 = vmatprep.mubr.f32.mxu0 %v1375_v51  ;;  %3667 = vmatprep.subr.bf16.mxu1 %v5306_v28  ;;  %v2556_v26 = vld [vmem:[%s5281_s7 + $0xe0] sm:$0xff] }
 0x1cd   : > { %2072 = vmatmul.mubr.f32.gmra.mrb[80].mxu1 %v1420_v22  ;;  %2376 = vmatmul.mubr.f32.gmra.mrb[160].mxu0 %v1374_v63  ;;  %v1380_v32 = vmax.f32 %v1186_v39, 0.0  ;;  %v1451_v63 = vmax.f32 %v1003_v58, 0.0 }
 0x1ce   : > { %v1381_v11 = vmax.f32 %v1188_v21, 0.0  ;;  %v1191_v6 = vpop.f32.mrb[100].mxu0  ;;  %2077 = vmatprep.mubr.f32.mxu1 %v1427_v31  ;;  %v3668_v21 = vpack.c.bf16 %v2557_v8, %v2556_v26 }
 0x1cf   : > { %v1192_v0 = vadd.f32 %v1191_v6, %v4754_v59  ;;  %v1193_v49 = vpop.f32.mrb[101].mxu0 }
 0x1d0   : > { %v1194_v41 = vadd.f32 %v1193_v49, %v4759_v27  ;;  %2380 = vmatprep.mubr.f32.mxu0 %v1381_v11  ;;  %v1450_v11 = vmax.f32 %v1001_v15, 0.0  ;;  %3669 = vmatpush1.bf16.msra.mxu1 %v3668_v21 }
 0x1d1   : > { %2078 = vmatmul.mubr.f32.gmra.mrb[82].mxu1 %v1426_v10  ;;  %2381 = vmatmul.mubr.f32.gmra.mrb[162].mxu0 %v1380_v32  ;;  %v1386_v14 = vmax.f32 %v1192_v0, 0.0  ;;  %v1457_v32 = vmax.f32 %v1009_v12, 0.0  ;;  %v1015_v0 = vadd.f32 %v4644_v25, %v4705_v18 }
 0x1d2   : > { %v1387_v2 = vmax.f32 %v1194_v41, 0.0  ;;  %v1197_v57 = vpop.f32.mrb[102].mxu0  ;;  %2083 = vmatprep.mubr.f32.mxu1 %v1433_v56  ;;  %v2558_v56 = vld [vmem:[%s5281_s7 + $0xf0] sm:$0xff]  ;;  %3670 = vmatprep.subr.bf16.mxu1 %v5306_v28 }
 0x1d3   : > { %v1198_v62 = vadd.f32 %v1197_v57, %v4754_v59  ;;  %v1199_v9 = vpop.f32.mrb[103].mxu0  ;;  %v3671_v25 = vpack.c.bf16 %v2559_v13, %v2558_v56  ;;  %v1013_v57 = vadd.f32 %v4641_v43, %v4701_v36  ;;  %v1019_v43 = vadd.f32 %v4647_v34, %v4701_v36 }
 0x1d4   : > { %v1200_v40 = vadd.f32 %v1199_v9, %v4759_v27  ;;  %2385 = vmatprep.mubr.f32.mxu0 %v1387_v2  ;;  %v1456_v2 = vmax.f32 %v1007_v33, 0.0  ;;  %v1021_v9 = vadd.f32 %v4650_v24, %v4705_v18  ;;  %v1027_v24 = vadd.f32 %v4656_v30, %v4705_v18  ;;  %v2566_v33 = vld [vmem:[%s5282_s8 + $0x30] sm:$0xff] }
 0x1d5   : > { %2084 = vmatmul.mubr.f32.gmra.mrb[84].mxu1 %v1432_v46  ;;  %2386 = vmatmul.mubr.f32.gmra.mrb[164].mxu0 %v1386_v14  ;;  %v1392_v52 = vmax.f32 %v1198_v62, 0.0  ;;  %v1463_v62 = vmax.f32 %v1015_v0, 0.0  ;;  %v1025_v30 = vadd.f32 %v4653_v37, %v4701_v36  ;;  %v1045_v56 = vadd.f32 %v4674_v5, %v4705_v18  ;;  %v2569_v5 = vld [vmem:[%s5282_s8 + $0x48] sm:$0xff] }
 0x1d6   : > { %v1393_v20 = vmax.f32 %v1200_v40, 0.0  ;;  %v1203_v17 = vpop.f32.mrb[104].mxu0  ;;  %2089 = vmatprep.mubr.f32.mxu1 %v1439_v53  ;;  %3672 = vmatpush1.bf16.msra.mxu1 %v3671_v25  ;;  %v1462_v40 = vmax.f32 %v1013_v57, 0.0  ;;  %v1469_v47 = vmax.f32 %v1021_v9, 0.0  ;;  %v1475_v15 = vmax.f32 %v1027_v24, 0.0 }
 0x1d7   : > { %v1204_v42 = vadd.f32 %v1203_v17, %v4754_v59  ;;  %v1205_v23 = vpop.f32.mrb[105].mxu0  ;;  %v1474_v12 = vmax.f32 %v1025_v30, 0.0 }
 0x1d8   : > { %v1206_v54 = vadd.f32 %v1205_v23, %v4759_v27  ;;  %2390 = vmatprep.mubr.f32.mxu0 %v1393_v20  ;;  %v2565_v23 = vld [vmem:[%s5282_s8 + $0x28] sm:$0xff] }
 0x1d9   : > { %2090 = vmatmul.mubr.f32.gmra.mrb[86].mxu1 %v1438_v35  ;;  %2391 = vmatmul.mubr.f32.gmra.mrb[166].mxu0 %v1392_v52  ;;  %v1398_v61 = vmax.f32 %v1204_v42, 0.0  ;;  %v2564_v42 = vld [vmem:[%s5282_s8 + $0x20] sm:$0xff] }
 0x1da   : > { %v1399_v48 = vmax.f32 %v1206_v54, 0.0  ;;  %v1209_v51 = vpop.f32.mrb[106].mxu0  ;;  %2095 = vmatprep.mubr.f32.mxu1 %v1445_v3  ;;  %v3601_v34 = vpack.c.bf16 %v2565_v23, %v2564_v42  ;;  %v1468_v54 = vmax.f32 %v1019_v43, 0.0  ;;  %v2570_v43 = vld [vmem:[%s5282_s8 + $0x50] sm:$0xff] }
 0x1db   : > { %v1210_v22 = vadd.f32 %v1209_v51, %v4754_v59  ;;  %v1211_v7 = vpop.f32.mrb[107].mxu0 }
 0x1dc   : > { %v1212_v39 = vadd.f32 %v1211_v7, %v4759_v27  ;;  %2395 = vmatprep.mubr.f32.mxu0 %v1399_v48  ;;  %3602 = vmatprep.subr.bf16.mxu0 %v3601_v34  ;;  %v1031_v7 = vadd.f32 %v4659_v16, %v4701_v36 }
 0x1dd   : > { %2096 = vmatmul.mubr.f32.gmra.mrb[88].mxu1 %v1444_v44  ;;  %2396 = vmatmul.mubr.f32.gmra.mrb[168].mxu0 %v1398_v61  ;;  %v1404_v6 = vmax.f32 %v1210_v22, 0.0  ;;  %v1033_v61 = vadd.f32 %v4662_v19, %v4705_v18  ;;  %v1039_v19 = vadd.f32 %v4668_v60, %v4705_v18  ;;  %v1037_v60 = vadd.f32 %v4665_v50, %v4701_v36  ;;  %v2568_v50 = vld [vmem:[%s5282_s8 + $0x40] sm:$0xff] }
 0x1de   : > { %v1405_v31 = vmax.f32 %v1212_v39, 0.0  ;;  %v1215_v4 = vpop.f32.mrb[108].mxu0  ;;  %2101 = vmatprep.mubr.f32.mxu1 %v1451_v63  ;;  %3604 = vmatpush3.bf16.msra.mxu0 %v3601_v34  ;;  %v1480_v21 = vmax.f32 %v1031_v7, 0.0  ;;  %v5309_v34 = vld [vmem:[#allocation9_spill] sm:$0xff] }
 0x1df   : > { %v1216_v10 = vadd.f32 %v1215_v4, %v4754_v59  ;;  %v1217_v45 = vpop.f32.mrb[109].mxu0 }
 0x1e0   : > { %v1218_v49 = vadd.f32 %v1217_v45, %v4759_v27  ;;  %2400 = vmatprep.mubr.f32.mxu0 %v1405_v31  ;;  %v1481_v31 = vmax.f32 %v1033_v61, 0.0 }
 0x1e1   : > { %2102 = vmatmul.mubr.f32.gmra.mrb[90].mxu1 %v1450_v11  ;;  %2401 = vmatmul.mubr.f32.gmra.mrb[170].mxu0 %v1404_v6  ;;  %v1410_v46 = vmax.f32 %v1216_v10, 0.0  ;;  %v2567_v6 = vld [vmem:[%s5282_s8 + $0x38] sm:$0xff] }
 0x1e2   : > { %v1411_v1 = vmax.f32 %v1218_v49, 0.0  ;;  %v1221_v41 = vpop.f32.mrb[110].mxu0  ;;  %2107 = vmatprep.mubr.f32.mxu1 %v1457_v32  ;;  %v3605_v0 = vpack.c.bf16 %v2567_v6, %v2566_v33  ;;  %v1487_v49 = vmax.f32 %v1039_v19, 0.0 }
 0x1e3   : > { %v1222_v38 = vadd.f32 %v1221_v41, %v4754_v59  ;;  %v1223_v14 = vpop.f32.mrb[111].mxu0 }
 0x1e4   : > { %v1224_v53 = vadd.f32 %v1223_v14, %v4759_v27  ;;  %2405 = vmatprep.mubr.f32.mxu0 %v1411_v1  ;;  %v1043_v1 = vadd.f32 %v4671_v29, %v4701_v36  ;;  %3606 = vmatprep.subr.bf16.mxu0 %v3605_v0  ;;  %v3609_v14 = vpack.c.bf16 %v2569_v5, %v2568_v50  ;;  %v1493_v29 = vmax.f32 %v1045_v56, 0.0 }
 0x1e5   : > { %2108 = vmatmul.mubr.f32.gmra.mrb[92].mxu1 %v1456_v2  ;;  %2406 = vmatmul.mubr.f32.gmra.mrb[172].mxu0 %v1410_v46  ;;  %v1416_v20 = vmax.f32 %v1222_v38, 0.0  ;;  %v1486_v2 = vmax.f32 %v1037_v60, 0.0 }
 0x1e6   : > { %v1417_v28 = vmax.f32 %v1224_v53, 0.0  ;;  %v1227_v55 = vpop.f32.mrb[112].mxu0  ;;  %2113 = vmatprep.mubr.f32.mxu1 %v1463_v62  ;;  %3608 = vmatpush3.bf16.msra.mxu0 %v3605_v0  ;;  %v5307_v62 = vld [vmem:[#allocation7_spill] sm:$0xff] }
 0x1e7   : > { %v1228_v17 = vadd.f32 %v1227_v55, %v4754_v59  ;;  %v1229_v35 = vpop.f32.mrb[113].mxu0  ;;  %v1051_v9 = vadd.f32 %v5307_v62, %v4705_v18  ;;  %3610 = vmatprep.subr.bf16.mxu0 %v3609_v14 }
 0x1e8   : > { %v1230_v52 = vadd.f32 %v1229_v35, %v4759_v27  ;;  %2410 = vmatprep.mubr.f32.mxu0 %v1417_v28  ;;  %v1492_v28 = vmax.f32 %v1043_v1, 0.0 }
 0x1e9   : > { %2114 = vmatmul.mubr.f32.gmra.mrb[94].mxu1 %v1462_v40  ;;  %2411 = vmatmul.mubr.f32.gmra.mrb[174].mxu0 %v1416_v20  ;;  %v1422_v48 = vmax.f32 %v1228_v17, 0.0  ;;  %v2571_v20 = vld [vmem:[%s5282_s8 + $0x58] sm:$0xff]  ;;  %v5308_v17 = vld [vmem:[#allocation6_spill] sm:$0xff]  ;;  %v1499_v23 = vmax.f32 %v1051_v9, 0.0 }
 0x1ea   : > { %v1423_v3 = vmax.f32 %v1230_v52, 0.0  ;;  %v1233_v58 = vpop.f32.mrb[114].mxu0  ;;  %2119 = vmatprep.mubr.f32.mxu1 %v1469_v47  ;;  %v1049_v35 = vadd.f32 %v5308_v17, %v4701_v36  ;;  %3612 = vmatpush3.bf16.msra.mxu0 %v3609_v14  ;;  %v3613_v42 = vpack.c.bf16 %v2571_v20, %v2570_v43 }
 0x1eb   : > { %v1234_v51 = vadd.f32 %v1233_v58, %v4754_v59  ;;  %v1235_v44 = vpop.f32.mrb[115].mxu0 }
 0x1ec   : > { %v1236_v22 = vadd.f32 %v1235_v44, %v4759_v27  ;;  %2415 = vmatprep.mubr.f32.mxu0 %v1423_v3  ;;  %v1057_v3 = vadd.f32 %v5309_v34, %v4705_v18  ;;  %3614 = vmatprep.subr.bf16.mxu0 %v3613_v42  ;;  %v2572_v44 = vld [vmem:[%s5282_s8 + $0x60] sm:$0xff]  ;;  %v1498_v61 = vmax.f32 %v1049_v35, 0.0 }
 0x1ed   : > { %2120 = vmatmul.mubr.f32.gmra.mrb[96].mxu1 %v1468_v54  ;;  %2416 = vmatmul.mubr.f32.gmra.mrb[176].mxu0 %v1422_v48  ;;  %v1428_v39 = vmax.f32 %v1234_v51, 0.0  ;;  %v5310_v54 = vld [vmem:[#allocation8_spill] sm:$0xff] }
 0x1ee   : > { %v1429_v63 = vmax.f32 %v1236_v22, 0.0  ;;  %v1239_v37 = vpop.f32.mrb[116].mxu0  ;;  %2125 = vmatprep.mubr.f32.mxu1 %v1475_v15  ;;  %v1055_v30 = vadd.f32 %v5310_v54, %v4701_v36  ;;  %v2573_v15 = vld [vmem:[%s5282_s8 + $0x68] sm:$0xff]  ;;  %3616 = vmatpush3.bf16.msra.mxu0 %v3613_v42 }
 0x1ef   : > { %v1240_v26 = vadd.f32 %v1239_v37, %v4754_v59  ;;  %v1241_v8 = vpop.f32.mrb[117].mxu0  ;;  %v3617_v37 = vpack.c.bf16 %v2573_v15, %v2572_v44 }
 0x1f0   : > { %v1242_v4 = vadd.f32 %v1241_v8, %v4759_v27  ;;  %2420 = vmatprep.mubr.f32.mxu0 %v1429_v63 }
 0x1f1   : > { %2126 = vmatmul.mubr.f32.gmra.mrb[98].mxu1 %v1474_v12  ;;  %2421 = vmatmul.mubr.f32.gmra.mrb[178].mxu0 %v1428_v39  ;;  %v1434_v10 = vmax.f32 %v1240_v26, 0.0  ;;  %v1505_v12 = vmax.f32 %v1057_v3, 0.0  ;;  %v5311_v39 = vld [vmem:[#allocation11_spill] sm:$0xff] }
 0x1f2   : > { %v1435_v11 = vmax.f32 %v1242_v4, 0.0  ;;  %v1245_v16 = vpop.f32.mrb[118].mxu0  ;;  %2131 = vmatprep.mubr.f32.mxu1 %v1481_v31  ;;  %v1063_v26 = vadd.f32 %v5311_v39, %v4705_v18  ;;  %v1504_v31 = vmax.f32 %v1055_v30, 0.0  ;;  %3618 = vmatprep.subr.bf16.mxu0 %v3617_v37  ;;  %v5312_v18 = vld [vmem:[#allocation10_spill] sm:$0xff] }
 0x1f3   : > { %v1246_v45 = vadd.f32 %v1245_v16, %v4754_v59  ;;  %v1247_v32 = vpop.f32.mrb[119].mxu0  ;;  %v1061_v16 = vadd.f32 %v5312_v18, %v4701_v36  ;;  %3620 = vmatpush3.bf16.msra.mxu0 %v3617_v37 }
 0x1f4   : > { %v1248_v13 = vadd.f32 %v1247_v32, %v4759_v27  ;;  %2425 = vmatprep.mubr.f32.mxu0 %v1435_v11  ;;  %v2575_v11 = vld [vmem:[%s5282_s8 + $0x78] sm:$0xff] }
 0x1f5   : > { %2132 = vmatmul.mubr.f32.gmra.mrb[100].mxu1 %v1480_v21  ;;  %2426 = vmatmul.mubr.f32.gmra.mrb[180].mxu0 %v1434_v10  ;;  %v1440_v57 = vmax.f32 %v1246_v45, 0.0  ;;  %v2574_v21 = vld [vmem:[%s5282_s8 + $0x70] sm:$0xff]  ;;  %v1511_v45 = vmax.f32 %v1063_v26, 0.0  ;;  %v1510_v56 = vmax.f32 %v1061_v16, 0.0 }
 0x1f6   : > { %v1441_v41 = vmax.f32 %v1248_v13, 0.0  ;;  %v1251_v25 = vpop.f32.mrb[120].mxu0  ;;  %2137 = vmatprep.mubr.f32.mxu1 %v1487_v49  ;;  %v3621_v10 = vpack.c.bf16 %v2575_v11, %v2574_v21  ;;  %v5313_v21 = vld [vmem:[#allocation5_spill] sm:$0xff] }
 0x1f7   : > { %v1252_v46 = vadd.f32 %v1251_v25, %v4754_v59  ;;  %v1253_v38 = vpop.f32.mrb[121].mxu0  ;;  %v5314_v11 = vsub.s32 0, %v5313_v21  ;;  %v5315_v16 = vsub.s32 1, %v5313_v21 }
 0x1f8   : > { %v1254_v53 = vadd.f32 %v1253_v38, %v4759_v27  ;;  %2430 = vmatprep.mubr.f32.mxu0 %v1441_v41  ;;  %3622 = vmatprep.subr.bf16.mxu0 %v3621_v10 }
 0x1f9   : > { %2138 = vmatmul.mubr.f32.gmra.mrb[102].mxu1 %v1486_v2  ;;  %2431 = vmatmul.mubr.f32.gmra.mrb[182].mxu0 %v1440_v57  ;;  %v1446_v47 = vmax.f32 %v1252_v46, 0.0 }
 0x1fa   : > { %v1447_v55 = vmax.f32 %v1254_v53, 0.0  ;;  %v1257_v40 = vpop.f32.mrb[122].mxu0  ;;  %2143 = vmatprep.mubr.f32.mxu1 %v1493_v29  ;;  %3624 = vmatpush3.bf16.msra.mxu0 %v3621_v10 }
 0x1fb   : > { %v1258_v24 = vadd.f32 %v1257_v40, %v4754_v59  ;;  %v1259_v52 = vpop.f32.mrb[123].mxu0 }
 0x1fc   : > { %v1260_v58 = vadd.f32 %v1259_v52, %v4759_v27  ;;  %2435 = vmatprep.mubr.f32.mxu0 %v1447_v55 }
 0x1fd   : > { %2144 = vmatmul.mubr.f32.gmra.mrb[104].mxu1 %v1492_v28  ;;  %2436 = vmatmul.mubr.f32.gmra.mrb[184].mxu0 %v1446_v47  ;;  %v1452_v22 = vmax.f32 %v1258_v24, 0.0 }
 0x1fe   : > { %v1453_v48 = vmax.f32 %v1260_v58, 0.0  ;;  %v1263_v51 = vpop.f32.mrb[124].mxu0  ;;  %2149 = vmatprep.mubr.f32.mxu1 %v1499_v23 }
 0x1ff   : > { %v1264_v7 = vadd.f32 %v1263_v51, %v4754_v59  ;;  %v1265_v63 = vpop.f32.mrb[125].mxu0 }
 0x200   : > { %v1266_v8 = vadd.f32 %v1265_v63, %v4759_v27  ;;  %2440 = vmatprep.mubr.f32.mxu0 %v1453_v48 }
 0x201   : > { %2150 = vmatmul.mubr.f32.gmra.mrb[106].mxu1 %v1498_v61  ;;  %2441 = vmatmul.mubr.f32.gmra.mrb[186].mxu0 %v1452_v22  ;;  %v1458_v33 = vmax.f32 %v1264_v7, 0.0 }
 0x202   : > { %v1459_v19 = vmax.f32 %v1266_v8, 0.0  ;;  %v1269_v4 = vpop.f32.mrb[126].mxu0  ;;  %2155 = vmatprep.mubr.f32.mxu1 %v1505_v12 }
 0x203   : > { %v1270_v6 = vadd.f32 %v1269_v4, %v4754_v59  ;;  %v1271_v60 = vpop.f32.mrb[127].mxu0  ;;  %v1642_v4 = vld [vmem:[%s5278_s4] sm:$0x3] }
 0x204   : > { %v1272_v32 = vadd.f32 %v1271_v60, %v4759_v27  ;;  %2445 = vmatprep.mubr.f32.mxu0 %v1459_v19  ;;  %v5056_v18 = vrot.slane %v1642_v4, %v5314_v11 }
 0x205   : > { %2156 = vmatmul.mubr.f32.gmra.mrb[108].mxu1 %v1504_v31  ;;  %2446 = vmatmul.mubr.f32.gmra.mrb[188].mxu0 %v1458_v33  ;;  %v1464_v13 = vmax.f32 %v1270_v6, 0.0 }
 0x206   : > { %v1465_v0 = vmax.f32 %v1272_v32, 0.0  ;;  %v1275_v49 = vpop.f32.mrb[128].mxu0  ;;  %2161 = vmatprep.mubr.f32.mxu1 %v1511_v45 }
 0x207   : > { %v1276_v36 = vadd.f32 %v1275_v49, %v4754_v59  ;;  %v1277_v1 = vpop.f32.mrb[129].mxu0 }
 0x208   : > { %v1278_v41 = vadd.f32 %v1277_v1, %v4759_v27  ;;  %2450 = vmatprep.mubr.f32.mxu0 %v1465_v0 }
 0x209   : > { %2162 = vmatmul.mubr.f32.gmra.mrb[110].mxu1 %v1510_v56  ;;  %2451 = vmatmul.mubr.f32.gmra.mrb[190].mxu0 %v1464_v13  ;;  %v1470_v5 = vmax.f32 %v1276_v36, 0.0 }
 0x20a   : > { %v1471_v25 = vmax.f32 %v1278_v41, 0.0  ;;  %v1281_v50 = vpop.f32.mrb[130].mxu0 }
 0x20b   : > { %v1282_v2 = vadd.f32 %v1281_v50, %v4754_v59  ;;  %v1283_v57 = vpop.f32.mrb[131].mxu0 }
 0x20c   : > { %v1284_v46 = vadd.f32 %v1283_v57, %v4759_v27  ;;  %2455 = vmatprep.mubr.f32.mxu0 %v1471_v25 }
 0x20d   : > { %2456 = vmatmul.mubr.f32.gmra.mrb[192].mxu0 %v1470_v5  ;;  %v1476_v29 = vmax.f32 %v1282_v2, 0.0 }
 0x20e   : > { %v1477_v38 = vmax.f32 %v1284_v46, 0.0  ;;  %v1287_v14 = vpop.f32.mrb[132].mxu0 }
 0x20f   : > { %v1288_v62 = vadd.f32 %v1287_v14, %v4754_v59  ;;  %v1289_v9 = vpop.f32.mrb[133].mxu0 }
 0x210   : > { %v1290_v53 = vadd.f32 %v1289_v9, %v4759_v27  ;;  %2460 = vmatprep.mubr.f32.mxu0 %v1477_v38 }
 0x211   : > { %2461 = vmatmul.mubr.f32.gmra.mrb[194].mxu0 %v1476_v29  ;;  %v1482_v40 = vmax.f32 %v1288_v62, 0.0 }
 0x212   : > { %v1483_v28 = vmax.f32 %v1290_v53, 0.0  ;;  %v1293_v55 = vpop.f32.mrb[134].mxu0 }
 0x213   : > { %v1294_v43 = vadd.f32 %v1293_v55, %v4754_v59  ;;  %v1295_v20 = vpop.f32.mrb[135].mxu0 }
 0x214   : > { %v1296_v17 = vadd.f32 %v1295_v20, %v4759_v27  ;;  %2465 = vmatprep.mubr.f32.mxu0 %v1483_v28 }
 0x215   : > { %2466 = vmatmul.mubr.f32.gmra.mrb[196].mxu0 %v1482_v40  ;;  %v1488_v24 = vmax.f32 %v1294_v43, 0.0 }
 0x216   : > { %v1489_v35 = vmax.f32 %v1296_v17, 0.0  ;;  %v1299_v47 = vpop.f32.mrb[136].mxu0 }
 0x217   : > { %v1300_v52 = vadd.f32 %v1299_v47, %v4754_v59  ;;  %v1301_v42 = vpop.f32.mrb[137].mxu0 }
 0x218   : > { %v1302_v23 = vadd.f32 %v1301_v42, %v4759_v27  ;;  %2470 = vmatprep.mubr.f32.mxu0 %v1489_v35 }
 0x219   : > { %2471 = vmatmul.mubr.f32.gmra.mrb[198].mxu0 %v1488_v24  ;;  %v1494_v58 = vmax.f32 %v1300_v52, 0.0 }
 0x21a   : > { %v1495_v34 = vmax.f32 %v1302_v23, 0.0  ;;  %v1305_v3 = vpop.f32.mrb[138].mxu0 }
 0x21b   : > { %v1306_v54 = vadd.f32 %v1305_v3, %v4754_v59  ;;  %v1307_v30 = vpop.f32.mrb[139].mxu0 }
 0x21c   : > { %v1308_v48 = vadd.f32 %v1307_v30, %v4759_v27  ;;  %2475 = vmatprep.mubr.f32.mxu0 %v1495_v34 }
 0x21d   : > { %2476 = vmatmul.mubr.f32.gmra.mrb[200].mxu0 %v1494_v58  ;;  %v1500_v15 = vmax.f32 %v1306_v54, 0.0 }
 0x21e   : > { %v1501_v51 = vmax.f32 %v1308_v48, 0.0  ;;  %v1311_v44 = vpop.f32.mrb[140].mxu0 }
 0x21f   : > { %v1312_v61 = vadd.f32 %v1311_v44, %v4754_v59  ;;  %v1313_v22 = vpop.f32.mrb[141].mxu0 }
 0x220   : > { %v1314_v7 = vadd.f32 %v1313_v22, %v4759_v27  ;;  %2480 = vmatprep.mubr.f32.mxu0 %v1501_v51 }
 0x221   : > { %2481 = vmatmul.mubr.f32.gmra.mrb[202].mxu0 %v1500_v15  ;;  %v1506_v12 = vmax.f32 %v1312_v61, 0.0  ;;  %v5081_v15 = vld [vmem:[%s5280_s6] ss:$0 sm:$0xff] }
 0x222   : > { %v1507_v63 = vmax.f32 %v1314_v7, 0.0  ;;  %v1317_v37 = vpop.f32.mrb[142].mxu0 }
 0x223   : > { %v1318_v39 = vadd.f32 %v1317_v37, %v4754_v59  ;;  %v1319_v26 = vpop.f32.mrb[143].mxu0  ;;  %v5060_v59 = vrot.slane %v1642_v4, %v5315_v16 }
 0x224   : > { %v1320_v8 = vadd.f32 %v1319_v26, %v4759_v27  ;;  %2485 = vmatprep.mubr.f32.mxu0 %v1507_v63 }
 0x225   : > { %2486 = vmatmul.mubr.f32.gmra.mrb[204].mxu0 %v1506_v12  ;;  %v1512_v19 = vmax.f32 %v1318_v39, 0.0 }
 0x226   : > { %v1513_v31 = vmax.f32 %v1320_v8, 0.0 }
 0x228   : > { %2490 = vmatprep.mubr.f32.mxu0 %v1513_v31 }
 0x229   : > { %2491 = vmatmul.mubr.f32.gmra.mrb[206].mxu0 %v1512_v19 }
 0x260   : > { %v1977_v33 = vpop.f32.mrb[48].mxu1 }
 0x261   : > { %v3675_v27 = vadd.f32 %v1977_v33, %v5056_v18  ;;  %v1979_v6 = vpop.f32.mrb[49].mxu1 }
 0x262   : > { %v3676_v60 = vadd.f32 %v1979_v6, %v5060_v59 }
 0x263   : > { %v2168_v32 = vmax.f32 %v3675_v27, 0.0 }
 0x264   : > { %v2169_v10 = vmax.f32 %v3676_v60, 0.0  ;;  %v1983_v45 = vpop.f32.mrb[50].mxu1 }
 0x265   : > { %v3677_v0 = vadd.f32 %v1983_v45, %v5056_v18  ;;  %v1985_v49 = vpop.f32.mrb[51].mxu1 }
 0x266   : > { %v3678_v56 = vadd.f32 %v1985_v49, %v5060_v59  ;;  %2865 = vmatprep.mubr.f32.mxu1 %v2169_v10 }
 0x267   : > { %2866 = vmatmul.mubr.f32.vlgmr.msra.gmra.mrb[112].mxu1 %v2168_v32  ;;  %v2170_v1 = vmax.f32 %v3677_v0, 0.0 }
 0x268   : > { %v2171_v13 = vmax.f32 %v3678_v56, 0.0  ;;  %v1989_v36 = vpop.f32.mrb[52].mxu1 }
 0x269   : > { %v3679_v41 = vadd.f32 %v1989_v36, %v5056_v18  ;;  %v1991_v25 = vpop.f32.mrb[53].mxu1 }
 0x26a   : > { %v3680_v50 = vadd.f32 %v1991_v25, %v5060_v59  ;;  %2870 = vmatprep.mubr.f32.mxu1 %v2171_v13 }
 0x26b   : > { %2871 = vmatmul.mubr.f32.gmra.mrb[114].mxu1 %v2170_v1  ;;  %v2172_v57 = vmax.f32 %v3679_v41, 0.0 }
 0x26c   : > { %v2173_v5 = vmax.f32 %v3680_v50, 0.0  ;;  %v1995_v2 = vpop.f32.mrb[54].mxu1 }
 0x26d   : > { %v3681_v46 = vadd.f32 %v1995_v2, %v5056_v18  ;;  %v1997_v38 = vpop.f32.mrb[55].mxu1 }
 0x26e   : > { %v3682_v14 = vadd.f32 %v1997_v38, %v5060_v59  ;;  %2875 = vmatprep.mubr.f32.mxu1 %v2173_v5 }
 0x26f   : > { %2876 = vmatmul.mubr.f32.gmra.mrb[116].mxu1 %v2172_v57  ;;  %v2174_v9 = vmax.f32 %v3681_v46, 0.0 }
 0x270   : > { %v2175_v29 = vmax.f32 %v3682_v14, 0.0  ;;  %v2001_v62 = vpop.f32.mrb[56].mxu1 }
 0x271   : > { %v3683_v53 = vadd.f32 %v2001_v62, %v5056_v18  ;;  %v2003_v28 = vpop.f32.mrb[57].mxu1 }
 0x272   : > { %v3684_v55 = vadd.f32 %v2003_v28, %v5060_v59  ;;  %2880 = vmatprep.mubr.f32.mxu1 %v2175_v29 }
 0x273   : > { %2881 = vmatmul.mubr.f32.gmra.mrb[118].mxu1 %v2174_v9  ;;  %v2176_v20 = vmax.f32 %v3683_v53, 0.0 }
 0x274   : > { %v2177_v40 = vmax.f32 %v3684_v55, 0.0  ;;  %v2007_v43 = vpop.f32.mrb[58].mxu1 }
 0x275   : > { %v3685_v17 = vadd.f32 %v2007_v43, %v5056_v18  ;;  %v2009_v35 = vpop.f32.mrb[59].mxu1 }
 0x276   : > { %v3686_v47 = vadd.f32 %v2009_v35, %v5060_v59  ;;  %2885 = vmatprep.mubr.f32.mxu1 %v2177_v40 }
 0x277   : > { %2886 = vmatmul.mubr.f32.gmra.mrb[120].mxu1 %v2176_v20  ;;  %v2178_v42 = vmax.f32 %v3685_v17, 0.0 }
 0x278   : > { %v2179_v24 = vmax.f32 %v3686_v47, 0.0  ;;  %v2013_v52 = vpop.f32.mrb[60].mxu1 }
 0x279   : > { %v3687_v23 = vadd.f32 %v2013_v52, %v5056_v18  ;;  %v2015_v34 = vpop.f32.mrb[61].mxu1 }
 0x27a   : > { %v3688_v3 = vadd.f32 %v2015_v34, %v5060_v59  ;;  %2890 = vmatprep.mubr.f32.mxu1 %v2179_v24 }
 0x27b   : > { %2891 = vmatmul.mubr.f32.gmra.mrb[122].mxu1 %v2178_v42  ;;  %v2180_v30 = vmax.f32 %v3687_v23, 0.0 }
 0x27c   : > { %v2181_v58 = vmax.f32 %v3688_v3, 0.0  ;;  %v2019_v54 = vpop.f32.mrb[62].mxu1 }
 0x27d   : > { %v3689_v48 = vadd.f32 %v2019_v54, %v5056_v18  ;;  %v2021_v51 = vpop.f32.mrb[63].mxu1 }
 0x27e   : > { %v3690_v44 = vadd.f32 %v2021_v51, %v5060_v59  ;;  %2895 = vmatprep.mubr.f32.mxu1 %v2181_v58 }
 0x27f   : > { %2896 = vmatmul.mubr.f32.gmra.mrb[124].mxu1 %v2180_v30  ;;  %v2182_v63 = vmax.f32 %v3689_v48, 0.0 }
 0x280   : > { %v2183_v61 = vmax.f32 %v3690_v44, 0.0  ;;  %v2025_v22 = vpop.f32.mrb[64].mxu1  ;;  %v2337_v7 = vpop.f32.mrb[144].mxu0 }
 0x281   : > { %v3691_v37 = vadd.f32 %v2025_v22, %v5056_v18  ;;  %v2338_v12 = vadd.f32 %v5081_v15, %v2337_v7  ;;  %v2027_v39 = vpop.f32.mrb[65].mxu1  ;;  %v2339_v26 = vpop.f32.mrb[145].mxu0 }
 0x282   : > { %v3692_v8 = vadd.f32 %v2027_v39, %v5060_v59  ;;  %2900 = vmatprep.mubr.f32.mxu1 %v2183_v61 }
 0x283   : > { %v2496_v31 = vmax.f32 %v2338_v12, 0.0  ;;  %2901 = vmatmul.mubr.f32.gmra.mrb[126].mxu1 %v2182_v63  ;;  %v2184_v11 = vmax.f32 %v3691_v37, 0.0 }
 0x284   : > { %v2185_v19 = vmax.f32 %v3692_v8, 0.0  ;;  %v2031_v4 = vpop.f32.mrb[66].mxu1  ;;  %v2342_v21 = vpop.f32.mrb[146].mxu0 }
 0x285   : > { %v3693_v16 = vadd.f32 %v2031_v4, %v5056_v18  ;;  %v2343_v33 = vadd.f32 %v5081_v15, %v2342_v21  ;;  %v2033_v27 = vpop.f32.mrb[67].mxu1  ;;  %v2344_v6 = vpop.f32.mrb[147].mxu0  ;;  %3357 = vmatprep.mubr.f32.mxu0 %v2496_v31 }
 0x286   : > { %v3694_v60 = vadd.f32 %v2033_v27, %v5060_v59  ;;  %2905 = vmatprep.mubr.f32.mxu1 %v2185_v19 }
 0x287   : > { %v2497_v10 = vmax.f32 %v2343_v33, 0.0  ;;  %2906 = vmatmul.mubr.f32.gmra.mrb[128].mxu1 %v2184_v11  ;;  %v2186_v49 = vmax.f32 %v3693_v16, 0.0 }
 0x288   : > { %v2187_v45 = vmax.f32 %v3694_v60, 0.0  ;;  %v2037_v32 = vpop.f32.mrb[68].mxu1  ;;  %v2347_v0 = vpop.f32.mrb[148].mxu0 }
 0x289   : > { %v3695_v56 = vadd.f32 %v2037_v32, %v5056_v18  ;;  %v2348_v13 = vadd.f32 %v5081_v15, %v2347_v0  ;;  %v2039_v36 = vpop.f32.mrb[69].mxu1  ;;  %v2349_v1 = vpop.f32.mrb[149].mxu0  ;;  %3358 = vmatmul.mubr.f32.vlgmr.msra.gmra.mrb[208].mxu0 %v2497_v10 }
 0x28a   : > { %v3696_v41 = vadd.f32 %v2039_v36, %v5060_v59  ;;  %2910 = vmatprep.mubr.f32.mxu1 %v2187_v45 }
 0x28b   : > { %v2498_v25 = vmax.f32 %v2348_v13, 0.0  ;;  %2911 = vmatmul.mubr.f32.gmra.mrb[130].mxu1 %v2186_v49  ;;  %v2188_v57 = vmax.f32 %v3695_v56, 0.0 }
 0x28c   : > { %v2189_v50 = vmax.f32 %v3696_v41, 0.0  ;;  %v2043_v5 = vpop.f32.mrb[70].mxu1  ;;  %v2352_v2 = vpop.f32.mrb[150].mxu0 }
 0x28d   : > { %v3697_v46 = vadd.f32 %v2043_v5, %v5056_v18  ;;  %v2353_v38 = vadd.f32 %v5081_v15, %v2352_v2  ;;  %v2045_v14 = vpop.f32.mrb[71].mxu1  ;;  %v2354_v29 = vpop.f32.mrb[151].mxu0  ;;  %3360 = vmatprep.mubr.f32.mxu0 %v2498_v25 }
 0x28e   : > { %v3698_v62 = vadd.f32 %v2045_v14, %v5060_v59  ;;  %2915 = vmatprep.mubr.f32.mxu1 %v2189_v50 }
 0x28f   : > { %v2499_v9 = vmax.f32 %v2353_v38, 0.0  ;;  %2916 = vmatmul.mubr.f32.gmra.mrb[132].mxu1 %v2188_v57  ;;  %v2190_v40 = vmax.f32 %v3697_v46, 0.0 }
 0x290   : > { %v2191_v53 = vmax.f32 %v3698_v62, 0.0  ;;  %v2049_v28 = vpop.f32.mrb[72].mxu1  ;;  %v2357_v55 = vpop.f32.mrb[152].mxu0 }
 0x291   : > { %v3699_v43 = vadd.f32 %v2049_v28, %v5056_v18  ;;  %v2358_v20 = vadd.f32 %v5081_v15, %v2357_v55  ;;  %v2051_v17 = vpop.f32.mrb[73].mxu1  ;;  %v2359_v35 = vpop.f32.mrb[153].mxu0  ;;  %3361 = vmatmul.mubr.f32.gmra.mrb[210].mxu0 %v2499_v9 }
 0x292   : > { %v3700_v47 = vadd.f32 %v2051_v17, %v5060_v59  ;;  %2920 = vmatprep.mubr.f32.mxu1 %v2191_v53 }
 0x293   : > { %v2500_v24 = vmax.f32 %v2358_v20, 0.0  ;;  %2921 = vmatmul.mubr.f32.gmra.mrb[134].mxu1 %v2190_v40  ;;  %v2192_v34 = vmax.f32 %v3699_v43, 0.0 }
 0x294   : > { %v2193_v52 = vmax.f32 %v3700_v47, 0.0  ;;  %v2055_v42 = vpop.f32.mrb[74].mxu1  ;;  %v2362_v23 = vpop.f32.mrb[154].mxu0 }
 0x295   : > { %v3701_v3 = vadd.f32 %v2055_v42, %v5056_v18  ;;  %v2363_v58 = vadd.f32 %v5081_v15, %v2362_v23  ;;  %v2057_v54 = vpop.f32.mrb[75].mxu1  ;;  %v2364_v30 = vpop.f32.mrb[155].mxu0  ;;  %3363 = vmatprep.mubr.f32.mxu0 %v2500_v24 }
 0x296   : > { %v3702_v48 = vadd.f32 %v2057_v54, %v5060_v59  ;;  %2925 = vmatprep.mubr.f32.mxu1 %v2193_v52 }
 0x297   : > { %v2501_v51 = vmax.f32 %v2363_v58, 0.0  ;;  %2926 = vmatmul.mubr.f32.gmra.mrb[136].mxu1 %v2192_v34  ;;  %v2194_v7 = vmax.f32 %v3701_v3, 0.0 }
 0x298   : > { %v2195_v44 = vmax.f32 %v3702_v48, 0.0  ;;  %v2061_v61 = vpop.f32.mrb[76].mxu1  ;;  %v2367_v22 = vpop.f32.mrb[156].mxu0 }
 0x299   : > { %v3703_v63 = vadd.f32 %v2061_v61, %v5056_v18  ;;  %v2368_v37 = vadd.f32 %v5081_v15, %v2367_v22  ;;  %v2063_v12 = vpop.f32.mrb[77].mxu1  ;;  %v2369_v39 = vpop.f32.mrb[157].mxu0  ;;  %3364 = vmatmul.mubr.f32.gmra.mrb[212].mxu0 %v2501_v51 }
 0x29a   : > { %v3704_v26 = vadd.f32 %v2063_v12, %v5060_v59  ;;  %2930 = vmatprep.mubr.f32.mxu1 %v2195_v44 }
 0x29b   : > { %v2502_v8 = vmax.f32 %v2368_v37, 0.0  ;;  %2931 = vmatmul.mubr.f32.gmra.mrb[138].mxu1 %v2194_v7  ;;  %v2196_v21 = vmax.f32 %v3703_v63, 0.0 }
 0x29c   : > { %v2197_v31 = vmax.f32 %v3704_v26, 0.0  ;;  %v2067_v19 = vpop.f32.mrb[78].mxu1  ;;  %v2372_v4 = vpop.f32.mrb[158].mxu0 }
 0x29d   : > { %v3705_v11 = vadd.f32 %v2067_v19, %v5056_v18  ;;  %v2373_v16 = vadd.f32 %v5081_v15, %v2372_v4  ;;  %v2069_v33 = vpop.f32.mrb[79].mxu1  ;;  %v2374_v27 = vpop.f32.mrb[159].mxu0  ;;  %3366 = vmatprep.mubr.f32.mxu0 %v2502_v8 }
 0x29e   : > { %v3706_v6 = vadd.f32 %v2069_v33, %v5060_v59  ;;  %2935 = vmatprep.mubr.f32.mxu1 %v2197_v31 }
 0x29f   : > { %v2503_v60 = vmax.f32 %v2373_v16, 0.0  ;;  %2936 = vmatmul.mubr.f32.gmra.mrb[140].mxu1 %v2196_v21  ;;  %v2198_v0 = vmax.f32 %v3705_v11, 0.0 }
 0x2a0   : > { %v2199_v10 = vmax.f32 %v3706_v6, 0.0  ;;  %v2073_v45 = vpop.f32.mrb[80].mxu1  ;;  %v2377_v32 = vpop.f32.mrb[160].mxu0 }
 0x2a1   : > { %v3707_v49 = vadd.f32 %v2073_v45, %v5056_v18  ;;  %v2378_v56 = vadd.f32 %v5081_v15, %v2377_v32  ;;  %v2075_v13 = vpop.f32.mrb[81].mxu1  ;;  %v2379_v36 = vpop.f32.mrb[161].mxu0  ;;  %3367 = vmatmul.mubr.f32.gmra.mrb[214].mxu0 %v2503_v60 }
 0x2a2   : > { %v3708_v1 = vadd.f32 %v2075_v13, %v5060_v59  ;;  %2940 = vmatprep.mubr.f32.mxu1 %v2199_v10 }
 0x2a3   : > { %v2504_v41 = vmax.f32 %v2378_v56, 0.0  ;;  %2941 = vmatmul.mubr.f32.gmra.mrb[142].mxu1 %v2198_v0  ;;  %v2200_v2 = vmax.f32 %v3707_v49, 0.0 }
 0x2a4   : > { %v2201_v25 = vmax.f32 %v3708_v1, 0.0  ;;  %v2079_v50 = vpop.f32.mrb[82].mxu1  ;;  %v2382_v5 = vpop.f32.mrb[162].mxu0 }
 0x2a5   : > { %v3709_v57 = vadd.f32 %v2079_v50, %v5056_v18  ;;  %v2383_v46 = vadd.f32 %v5081_v15, %v2382_v5  ;;  %v2081_v38 = vpop.f32.mrb[83].mxu1  ;;  %v2384_v14 = vpop.f32.mrb[163].mxu0  ;;  %3369 = vmatprep.mubr.f32.mxu0 %v2504_v41 }
 0x2a6   : > { %v3710_v29 = vadd.f32 %v2081_v38, %v5060_v59  ;;  %2945 = vmatprep.mubr.f32.mxu1 %v2201_v25 }
 0x2a7   : > { %v2505_v62 = vmax.f32 %v2383_v46, 0.0  ;;  %2946 = vmatmul.mubr.f32.gmra.mrb[144].mxu1 %v2200_v2  ;;  %v2202_v55 = vmax.f32 %v3709_v57, 0.0 }
 0x2a8   : > { %v2203_v9 = vmax.f32 %v3710_v29, 0.0  ;;  %v2085_v53 = vpop.f32.mrb[84].mxu1  ;;  %v2387_v28 = vpop.f32.mrb[164].mxu0 }
 0x2a9   : > { %v3711_v40 = vadd.f32 %v2085_v53, %v5056_v18  ;;  %v2388_v43 = vadd.f32 %v5081_v15, %v2387_v28  ;;  %v2087_v20 = vpop.f32.mrb[85].mxu1  ;;  %v2389_v17 = vpop.f32.mrb[165].mxu0  ;;  %3370 = vmatmul.mubr.f32.gmra.mrb[216].mxu0 %v2505_v62 }
 0x2aa   : > { %v3712_v35 = vadd.f32 %v2087_v20, %v5060_v59  ;;  %2950 = vmatprep.mubr.f32.mxu1 %v2203_v9 }
 0x2ab   : > { %v2506_v47 = vmax.f32 %v2388_v43, 0.0  ;;  %2951 = vmatmul.mubr.f32.gmra.mrb[146].mxu1 %v2202_v55  ;;  %v2204_v23 = vmax.f32 %v3711_v40, 0.0 }
 0x2ac   : > { %v2205_v24 = vmax.f32 %v3712_v35, 0.0  ;;  %v2091_v52 = vpop.f32.mrb[86].mxu1  ;;  %v2392_v42 = vpop.f32.mrb[166].mxu0 }
 0x2ad   : > { %v3713_v34 = vadd.f32 %v2091_v52, %v5056_v18  ;;  %v2393_v3 = vadd.f32 %v5081_v15, %v2392_v42  ;;  %v2093_v58 = vpop.f32.mrb[87].mxu1  ;;  %v2394_v54 = vpop.f32.mrb[167].mxu0  ;;  %3372 = vmatprep.mubr.f32.mxu0 %v2506_v47 }
 0x2ae   : > { %v3714_v30 = vadd.f32 %v2093_v58, %v5060_v59  ;;  %2955 = vmatprep.mubr.f32.mxu1 %v2205_v24 }
 0x2af   : > { %v2507_v48 = vmax.f32 %v2393_v3, 0.0  ;;  %2956 = vmatmul.mubr.f32.gmra.mrb[148].mxu1 %v2204_v23  ;;  %v2206_v22 = vmax.f32 %v3713_v34, 0.0 }
 0x2b0   : > { %v2207_v51 = vmax.f32 %v3714_v30, 0.0  ;;  %v2097_v44 = vpop.f32.mrb[88].mxu1  ;;  %v2397_v61 = vpop.f32.mrb[168].mxu0 }
 0x2b1   : > { %v3715_v7 = vadd.f32 %v2097_v44, %v5056_v18  ;;  %v2398_v63 = vadd.f32 %v5081_v15, %v2397_v61  ;;  %v2099_v37 = vpop.f32.mrb[89].mxu1  ;;  %v2399_v12 = vpop.f32.mrb[169].mxu0  ;;  %3373 = vmatmul.mubr.f32.gmra.mrb[218].mxu0 %v2507_v48 }
 0x2b2   : > { %v3716_v39 = vadd.f32 %v2099_v37, %v5060_v59  ;;  %2960 = vmatprep.mubr.f32.mxu1 %v2207_v51 }
 0x2b3   : > { %v2508_v26 = vmax.f32 %v2398_v63, 0.0  ;;  %2961 = vmatmul.mubr.f32.gmra.mrb[150].mxu1 %v2206_v22  ;;  %v2208_v4 = vmax.f32 %v3715_v7, 0.0 }
 0x2b4   : > { %v2209_v8 = vmax.f32 %v3716_v39, 0.0  ;;  %v2103_v31 = vpop.f32.mrb[90].mxu1  ;;  %v2402_v19 = vpop.f32.mrb[170].mxu0 }
 0x2b5   : > { %v3717_v21 = vadd.f32 %v2103_v31, %v5056_v18  ;;  %v2403_v11 = vadd.f32 %v5081_v15, %v2402_v19  ;;  %v2105_v16 = vpop.f32.mrb[91].mxu1  ;;  %v2404_v33 = vpop.f32.mrb[171].mxu0  ;;  %3375 = vmatprep.mubr.f32.mxu0 %v2508_v26 }
 0x2b6   : > { %v3718_v27 = vadd.f32 %v2105_v16, %v5060_v59  ;;  %2965 = vmatprep.mubr.f32.mxu1 %v2209_v8 }
 0x2b7   : > { %v2509_v6 = vmax.f32 %v2403_v11, 0.0  ;;  %2966 = vmatmul.mubr.f32.gmra.mrb[152].mxu1 %v2208_v4  ;;  %v2210_v32 = vmax.f32 %v3717_v21, 0.0 }
 0x2b8   : > { %v2211_v60 = vmax.f32 %v3718_v27, 0.0  ;;  %v2109_v10 = vpop.f32.mrb[92].mxu1  ;;  %v2407_v45 = vpop.f32.mrb[172].mxu0 }
 0x2b9   : > { %v3719_v0 = vadd.f32 %v2109_v10, %v5056_v18  ;;  %v2408_v49 = vadd.f32 %v5081_v15, %v2407_v45  ;;  %v2111_v56 = vpop.f32.mrb[93].mxu1  ;;  %v2409_v13 = vpop.f32.mrb[173].mxu0  ;;  %3376 = vmatmul.mubr.f32.gmra.mrb[220].mxu0 %v2509_v6 }
 0x2ba   : > { %v3720_v36 = vadd.f32 %v2111_v56, %v5060_v59  ;;  %2970 = vmatprep.mubr.f32.mxu1 %v2211_v60 }
 0x2bb   : > { %v2510_v1 = vmax.f32 %v2408_v49, 0.0  ;;  %2971 = vmatmul.mubr.f32.gmra.mrb[154].mxu1 %v2210_v32  ;;  %v2212_v5 = vmax.f32 %v3719_v0, 0.0 }
 0x2bc   : > { %v2213_v41 = vmax.f32 %v3720_v36, 0.0  ;;  %v2115_v25 = vpop.f32.mrb[94].mxu1  ;;  %v2412_v50 = vpop.f32.mrb[174].mxu0 }
 0x2bd   : > { %v3721_v2 = vadd.f32 %v2115_v25, %v5056_v18  ;;  %v2413_v57 = vadd.f32 %v5081_v15, %v2412_v50  ;;  %v2117_v46 = vpop.f32.mrb[95].mxu1  ;;  %v2414_v38 = vpop.f32.mrb[175].mxu0  ;;  %3378 = vmatprep.mubr.f32.mxu0 %v2510_v1 }
 0x2be   : > { %v3722_v14 = vadd.f32 %v2117_v46, %v5060_v59  ;;  %2975 = vmatprep.mubr.f32.mxu1 %v2213_v41 }
 0x2bf   : > { %v2511_v29 = vmax.f32 %v2413_v57, 0.0  ;;  %2976 = vmatmul.mubr.f32.gmra.mrb[156].mxu1 %v2212_v5  ;;  %v2214_v28 = vmax.f32 %v3721_v2, 0.0 }
 0x2c0   : > { %v2215_v62 = vmax.f32 %v3722_v14, 0.0  ;;  %v2121_v9 = vpop.f32.mrb[96].mxu1  ;;  %v2417_v53 = vpop.f32.mrb[176].mxu0 }
 0x2c1   : > { %v3723_v55 = vadd.f32 %v2121_v9, %v5056_v18  ;;  %v2418_v40 = vadd.f32 %v5081_v15, %v2417_v53  ;;  %v2123_v43 = vpop.f32.mrb[97].mxu1  ;;  %v2419_v20 = vpop.f32.mrb[177].mxu0  ;;  %3379 = vmatmul.mubr.f32.gmra.mrb[222].mxu0 %v2511_v29 }
 0x2c2   : > { %v3724_v17 = vadd.f32 %v2123_v43, %v5060_v59  ;;  %2980 = vmatprep.mubr.f32.mxu1 %v2215_v62 }
 0x2c3   : > { %v2512_v35 = vmax.f32 %v2418_v40, 0.0  ;;  %2981 = vmatmul.mubr.f32.gmra.mrb[158].mxu1 %v2214_v28  ;;  %v2216_v42 = vmax.f32 %v3723_v55, 0.0 }
 0x2c4   : > { %v2217_v47 = vmax.f32 %v3724_v17, 0.0  ;;  %v2127_v24 = vpop.f32.mrb[98].mxu1  ;;  %v2422_v52 = vpop.f32.mrb[178].mxu0 }
 0x2c5   : > { %v3725_v23 = vadd.f32 %v2127_v24, %v5056_v18  ;;  %v2423_v34 = vadd.f32 %v5081_v15, %v2422_v52  ;;  %v2129_v3 = vpop.f32.mrb[99].mxu1  ;;  %v2424_v58 = vpop.f32.mrb[179].mxu0  ;;  %3381 = vmatprep.mubr.f32.mxu0 %v2512_v35 }
 0x2c6   : > { %v3726_v54 = vadd.f32 %v2129_v3, %v5060_v59  ;;  %2985 = vmatprep.mubr.f32.mxu1 %v2217_v47 }
 0x2c7   : > { %v2513_v30 = vmax.f32 %v2423_v34, 0.0  ;;  %2986 = vmatmul.mubr.f32.gmra.mrb[160].mxu1 %v2216_v42  ;;  %v2218_v61 = vmax.f32 %v3725_v23, 0.0 }
 0x2c8   : > { %v2219_v48 = vmax.f32 %v3726_v54, 0.0  ;;  %v2133_v51 = vpop.f32.mrb[100].mxu1  ;;  %v2427_v44 = vpop.f32.mrb[180].mxu0 }
 0x2c9   : > { %v3727_v22 = vadd.f32 %v2133_v51, %v5056_v18  ;;  %v2428_v7 = vadd.f32 %v5081_v15, %v2427_v44  ;;  %v2135_v63 = vpop.f32.mrb[101].mxu1  ;;  %v2429_v37 = vpop.f32.mrb[181].mxu0  ;;  %3382 = vmatmul.mubr.f32.gmra.mrb[224].mxu0 %v2513_v30 }
 0x2ca   : > { %v3728_v12 = vadd.f32 %v2135_v63, %v5060_v59  ;;  %2990 = vmatprep.mubr.f32.mxu1 %v2219_v48 }
 0x2cb   : > { %v2514_v39 = vmax.f32 %v2428_v7, 0.0  ;;  %2991 = vmatmul.mubr.f32.gmra.mrb[162].mxu1 %v2218_v61  ;;  %v2220_v19 = vmax.f32 %v3727_v22, 0.0 }
 0x2cc   : > { %v2221_v26 = vmax.f32 %v3728_v12, 0.0  ;;  %v2139_v8 = vpop.f32.mrb[102].mxu1  ;;  %v2432_v31 = vpop.f32.mrb[182].mxu0 }
 0x2cd   : > { %v3729_v4 = vadd.f32 %v2139_v8, %v5056_v18  ;;  %v2433_v21 = vadd.f32 %v5081_v15, %v2432_v31  ;;  %v2141_v11 = vpop.f32.mrb[103].mxu1  ;;  %v2434_v16 = vpop.f32.mrb[183].mxu0  ;;  %3384 = vmatprep.mubr.f32.mxu0 %v2514_v39 }
 0x2ce   : > { %v3730_v33 = vadd.f32 %v2141_v11, %v5060_v59  ;;  %2995 = vmatprep.mubr.f32.mxu1 %v2221_v26 }
 0x2cf   : > { %v2515_v27 = vmax.f32 %v2433_v21, 0.0  ;;  %2996 = vmatmul.mubr.f32.gmra.mrb[164].mxu1 %v2220_v19  ;;  %v2222_v45 = vmax.f32 %v3729_v4, 0.0 }
 0x2d0   : > { %v2223_v6 = vmax.f32 %v3730_v33, 0.0  ;;  %v2145_v60 = vpop.f32.mrb[104].mxu1  ;;  %v2437_v10 = vpop.f32.mrb[184].mxu0 }
 0x2d1   : > { %v3731_v32 = vadd.f32 %v2145_v60, %v5056_v18  ;;  %v2438_v0 = vadd.f32 %v5081_v15, %v2437_v10  ;;  %v2147_v49 = vpop.f32.mrb[105].mxu1  ;;  %v2439_v56 = vpop.f32.mrb[185].mxu0  ;;  %3385 = vmatmul.mubr.f32.gmra.mrb[226].mxu0 %v2515_v27 }
 0x2d2   : > { %v3732_v13 = vadd.f32 %v2147_v49, %v5060_v59  ;;  %3000 = vmatprep.mubr.f32.mxu1 %v2223_v6 }
 0x2d3   : > { %v2516_v36 = vmax.f32 %v2438_v0, 0.0  ;;  %3001 = vmatmul.mubr.f32.gmra.mrb[166].mxu1 %v2222_v45  ;;  %v2224_v50 = vmax.f32 %v3731_v32, 0.0 }
 0x2d4   : > { %v2225_v1 = vmax.f32 %v3732_v13, 0.0  ;;  %v2151_v41 = vpop.f32.mrb[106].mxu1  ;;  %v2442_v25 = vpop.f32.mrb[186].mxu0 }
 0x2d5   : > { %v3733_v5 = vadd.f32 %v2151_v41, %v5056_v18  ;;  %v2443_v2 = vadd.f32 %v5081_v15, %v2442_v25  ;;  %v2153_v57 = vpop.f32.mrb[107].mxu1  ;;  %v2444_v46 = vpop.f32.mrb[187].mxu0  ;;  %3387 = vmatprep.mubr.f32.mxu0 %v2516_v36 }
 0x2d6   : > { %v3734_v38 = vadd.f32 %v2153_v57, %v5060_v59  ;;  %3005 = vmatprep.mubr.f32.mxu1 %v2225_v1 }
 0x2d7   : > { %v2517_v14 = vmax.f32 %v2443_v2, 0.0  ;;  %3006 = vmatmul.mubr.f32.gmra.mrb[168].mxu1 %v2224_v50  ;;  %v2226_v53 = vmax.f32 %v3733_v5, 0.0 }
 0x2d8   : > { %v2227_v29 = vmax.f32 %v3734_v38, 0.0  ;;  %v2157_v62 = vpop.f32.mrb[108].mxu1  ;;  %v2447_v9 = vpop.f32.mrb[188].mxu0 }
 0x2d9   : > { %v3735_v28 = vadd.f32 %v2157_v62, %v5056_v18  ;;  %v2448_v55 = vadd.f32 %v5081_v15, %v2447_v9  ;;  %v2159_v40 = vpop.f32.mrb[109].mxu1  ;;  %v2449_v43 = vpop.f32.mrb[189].mxu0  ;;  %3388 = vmatmul.mubr.f32.gmra.mrb[228].mxu0 %v2517_v14 }
 0x2da   : > { %v3736_v20 = vadd.f32 %v2159_v40, %v5060_v59  ;;  %3010 = vmatprep.mubr.f32.mxu1 %v2227_v29 }
 0x2db   : > { %v2518_v17 = vmax.f32 %v2448_v55, 0.0  ;;  %3011 = vmatmul.mubr.f32.gmra.mrb[170].mxu1 %v2226_v53  ;;  %v2228_v52 = vmax.f32 %v3735_v28, 0.0 }
 0x2dc   : > { %v2229_v35 = vmax.f32 %v3736_v20, 0.0  ;;  %v2163_v47 = vpop.f32.mrb[110].mxu1  ;;  %v2452_v24 = vpop.f32.mrb[190].mxu0 }
 0x2dd   : > { %v3737_v42 = vadd.f32 %v2163_v47, %v5056_v18  ;;  %v2453_v23 = vadd.f32 %v5081_v15, %v2452_v24  ;;  %v2165_v34 = vpop.f32.mrb[111].mxu1  ;;  %v2454_v3 = vpop.f32.mrb[191].mxu0  ;;  %3390 = vmatprep.mubr.f32.mxu0 %v2518_v17  ;;  %v5166_v17 = vld [vmem:[%s5283_s9] ss:$0 sm:$0xff] }
 0x2de   : > { %v3738_v58 = vadd.f32 %v2165_v34, %v5060_v59  ;;  %3015 = vmatprep.mubr.f32.mxu1 %v2229_v35 }
 0x2df   : > { %v2519_v54 = vmax.f32 %v2453_v23, 0.0  ;;  %3016 = vmatmul.mubr.f32.gmra.mrb[172].mxu1 %v2228_v52  ;;  %v2230_v51 = vmax.f32 %v3737_v42, 0.0 }
 0x2e0   : > { %v2231_v30 = vmax.f32 %v3738_v58, 0.0  ;;  %v2457_v48 = vpop.f32.mrb[192].mxu0 }
 0x2e1   : > { %v2458_v44 = vadd.f32 %v5081_v15, %v2457_v48  ;;  %v2459_v61 = vpop.f32.mrb[193].mxu0  ;;  %3391 = vmatmul.mubr.f32.gmra.mrb[230].mxu0 %v2519_v54 }
 0x2e2   : > { %3020 = vmatprep.mubr.f32.mxu1 %v2231_v30 }
 0x2e3   : > { %v2520_v22 = vmax.f32 %v2458_v44, 0.0  ;;  %3021 = vmatmul.mubr.f32.gmra.mrb[174].mxu1 %v2230_v51 }
 0x2e4   : > { %v2462_v18 = vpop.f32.mrb[194].mxu0 }
 0x2e5   : > { %v2463_v7 = vadd.f32 %v5081_v15, %v2462_v18  ;;  %v2464_v63 = vpop.f32.mrb[195].mxu0  ;;  %3393 = vmatprep.mubr.f32.mxu0 %v2520_v22 }
 0x2e7   : > { %v2521_v37 = vmax.f32 %v2463_v7, 0.0 }
 0x2e8   : > { %v2467_v59 = vpop.f32.mrb[196].mxu0 }
 0x2e9   : > { %v2468_v12 = vadd.f32 %v5081_v15, %v2467_v59  ;;  %v2469_v39 = vpop.f32.mrb[197].mxu0  ;;  %3394 = vmatmul.mubr.f32.gmra.mrb[232].mxu0 %v2521_v37 }
 0x2eb   : > { %v2522_v26 = vmax.f32 %v2468_v12, 0.0 }
 0x2ec   : > { %v2472_v8 = vpop.f32.mrb[198].mxu0 }
 0x2ed   : > { %v2473_v31 = vadd.f32 %v5081_v15, %v2472_v8  ;;  %v2474_v19 = vpop.f32.mrb[199].mxu0  ;;  %3396 = vmatprep.mubr.f32.mxu0 %v2522_v26 }
 0x2ef   : > { %v2523_v4 = vmax.f32 %v2473_v31, 0.0 }
 0x2f0   : > { %v2477_v21 = vpop.f32.mrb[200].mxu0 }
 0x2f1   : > { %v2478_v11 = vadd.f32 %v5081_v15, %v2477_v21  ;;  %v2479_v16 = vpop.f32.mrb[201].mxu0  ;;  %3397 = vmatmul.mubr.f32.gmra.mrb[234].mxu0 %v2523_v4 }
 0x2f3   : > { %v2524_v33 = vmax.f32 %v2478_v11, 0.0 }
 0x2f4   : > { %v2482_v27 = vpop.f32.mrb[202].mxu0 }
 0x2f5   : > { %v2483_v6 = vadd.f32 %v5081_v15, %v2482_v27  ;;  %v2484_v60 = vpop.f32.mrb[203].mxu0  ;;  %3399 = vmatprep.mubr.f32.mxu0 %v2524_v33 }
 0x2f7   : > { %v2525_v10 = vmax.f32 %v2483_v6, 0.0 }
 0x2f8   : > { %v2487_v45 = vpop.f32.mrb[204].mxu0 }
 0x2f9   : > { %v2488_v32 = vadd.f32 %v5081_v15, %v2487_v45  ;;  %v2489_v0 = vpop.f32.mrb[205].mxu0  ;;  %3400 = vmatmul.mubr.f32.gmra.mrb[236].mxu0 %v2525_v10 }
 0x2fb   : > { %v2526_v49 = vmax.f32 %v2488_v32, 0.0 }
 0x2fc   : > { %v2492_v56 = vpop.f32.mrb[206].mxu0 }
 0x2fd   : > { %v2493_v13 = vadd.f32 %v5081_v15, %v2492_v56  ;;  %v2494_v36 = vpop.f32.mrb[207].mxu0  ;;  %3402 = vmatprep.mubr.f32.mxu0 %v2526_v49 }
 0x2ff   : > { %v2527_v1 = vmax.f32 %v2493_v13, 0.0 }
 0x301   : > { %3403 = vmatmul.mubr.f32.gmra.mrb[238].mxu0 %v2527_v1 }
 0x33a   : > { %v2867_v41 = vpop.f32.mrb[112].mxu1 }
 0x33b   : > { %v2869_v25 = vpop.f32.mrb[113].mxu1 }
 0x33e   : > { %v2872_v50 = vpop.f32.mrb[114].mxu1 }
 0x33f   : > { %v2874_v5 = vpop.f32.mrb[115].mxu1 }
 0x342   : > { %v2877_v2 = vpop.f32.mrb[116].mxu1 }
 0x343   : > { %v2879_v57 = vpop.f32.mrb[117].mxu1 }
 0x346   : > { %v2882_v46 = vpop.f32.mrb[118].mxu1 }
 0x347   : > { %v2884_v38 = vpop.f32.mrb[119].mxu1 }
 0x34a   : > { %v2887_v14 = vpop.f32.mrb[120].mxu1 }
 0x34b   : > { %v2889_v29 = vpop.f32.mrb[121].mxu1 }
 0x34e   : > { %v2892_v62 = vpop.f32.mrb[122].mxu1 }
 0x34f   : > { %v2894_v9 = vpop.f32.mrb[123].mxu1 }
 0x352   : > { %v2897_v53 = vpop.f32.mrb[124].mxu1 }
 0x353   : > { %v2899_v28 = vpop.f32.mrb[125].mxu1 }
 0x356   : > { %v2902_v15 = vpop.f32.mrb[126].mxu1 }
 0x357   : > { %v2904_v55 = vpop.f32.mrb[127].mxu1 }
 0x35a   : > { %v2907_v40 = vpop.f32.mrb[128].mxu1 }
 0x35b   : > { %v2909_v43 = vpop.f32.mrb[129].mxu1 }
 0x35c   : > { %v3359_v20 = vpop.f32.mrb[208].mxu0 }
 0x35d   : > { %v2873_v35 = vadd.f32 %v3359_v20, %v2872_v50  ;;  %v2642_v47 = vpop.f32.mrb[209].mxu0 }
 0x35e   : > { %v2868_v24 = vadd.f32 %v2867_v41, %v2642_v47  ;;  %v2912_v52 = vpop.f32.mrb[130].mxu1 }
 0x35f   : > { %v3034_v42 = vadd.f32 %v5166_v17, %v2873_v35  ;;  %v2914_v23 = vpop.f32.mrb[131].mxu1 }
 0x360   : > { %v3033_v34 = vadd.f32 %v5166_v17, %v2868_v24 }
 0x361   : > { %3067 = vst.msk [vmem:[%s5173_s27 + $0x8] sm:$0xff] %vm3065_vm1, %v3034_v42 }
 0x362   : > { %3066 = vst.msk [vmem:[%s5173_s27] sm:$0xff] %vm3065_vm1, %v3033_v34  ;;  %v2917_v3 = vpop.f32.mrb[132].mxu1 }
 0x363   : > { %v2919_v58 = vpop.f32.mrb[133].mxu1 }
 0x364   : > { %v3362_v54 = vpop.f32.mrb[210].mxu0 }
 0x365   : > { %v2883_v30 = vadd.f32 %v3362_v54, %v2882_v46  ;;  %v2652_v48 = vpop.f32.mrb[211].mxu0 }
 0x366   : > { %v2878_v51 = vadd.f32 %v2877_v2, %v2652_v48  ;;  %v2922_v44 = vpop.f32.mrb[134].mxu1 }
 0x367   : > { %v3036_v61 = vadd.f32 %v5166_v17, %v2883_v30  ;;  %v2924_v22 = vpop.f32.mrb[135].mxu1 }
 0x368   : > { %v3035_v18 = vadd.f32 %v5166_v17, %v2878_v51 }
 0x369   : > { %3069 = vst.msk [vmem:[%s5173_s27 + $0x18] sm:$0xff] %vm3065_vm1, %v3036_v61 }
 0x36a   : > { %3068 = vst.msk [vmem:[%s5173_s27 + $0x10] sm:$0xff] %vm3065_vm1, %v3035_v18  ;;  %v2927_v7 = vpop.f32.mrb[136].mxu1 }
 0x36b   : > { %v2929_v63 = vpop.f32.mrb[137].mxu1 }
 0x36c   : > { %v3365_v37 = vpop.f32.mrb[212].mxu0 }
 0x36d   : > { %v2893_v59 = vadd.f32 %v3365_v37, %v2892_v62  ;;  %v2662_v12 = vpop.f32.mrb[213].mxu0 }
 0x36e   : > { %v2888_v39 = vadd.f32 %v2887_v14, %v2662_v12  ;;  %v2932_v26 = vpop.f32.mrb[138].mxu1 }
 0x36f   : > { %v3038_v8 = vadd.f32 %v5166_v17, %v2893_v59  ;;  %v2934_v31 = vpop.f32.mrb[139].mxu1 }
 0x370   : > { %v3037_v19 = vadd.f32 %v5166_v17, %v2888_v39 }
 0x371   : > { %3071 = vst.msk [vmem:[%s5173_s27 + $0x28] sm:$0xff] %vm3065_vm1, %v3038_v8 }
 0x372   : > { %3070 = vst.msk [vmem:[%s5173_s27 + $0x20] sm:$0xff] %vm3065_vm1, %v3037_v19  ;;  %v2937_v4 = vpop.f32.mrb[140].mxu1 }
 0x373   : > { %v2939_v21 = vpop.f32.mrb[141].mxu1 }
 0x374   : > { %v3368_v11 = vpop.f32.mrb[214].mxu0 }
 0x375   : > { %v2903_v16 = vadd.f32 %v3368_v11, %v2902_v15  ;;  %v2672_v33 = vpop.f32.mrb[215].mxu0 }
 0x376   : > { %v2898_v27 = vadd.f32 %v2897_v53, %v2672_v33  ;;  %v2942_v6 = vpop.f32.mrb[142].mxu1 }
 0x377   : > { %v3040_v60 = vadd.f32 %v5166_v17, %v2903_v16  ;;  %v2944_v10 = vpop.f32.mrb[143].mxu1 }
 0x378   : > { %v3039_v45 = vadd.f32 %v5166_v17, %v2898_v27 }
 0x379   : > { %3073 = vst.msk [vmem:[%s5173_s27 + $0x38] sm:$0xff] %vm3065_vm1, %v3040_v60 }
 0x37a   : > { %3072 = vst.msk [vmem:[%s5173_s27 + $0x30] sm:$0xff] %vm3065_vm1, %v3039_v45  ;;  %v2947_v32 = vpop.f32.mrb[144].mxu1 }
 0x37b   : > { %v2949_v0 = vpop.f32.mrb[145].mxu1 }
 0x37c   : > { %v3371_v49 = vpop.f32.mrb[216].mxu0 }
 0x37d   : > { %v2913_v56 = vadd.f32 %v3371_v49, %v2912_v52  ;;  %v2682_v13 = vpop.f32.mrb[217].mxu0 }
 0x37e   : > { %v2908_v36 = vadd.f32 %v2907_v40, %v2682_v13  ;;  %v2952_v1 = vpop.f32.mrb[146].mxu1 }
 0x37f   : > { %v3042_v41 = vadd.f32 %v5166_v17, %v2913_v56  ;;  %v2954_v25 = vpop.f32.mrb[147].mxu1 }
 0x380   : > { %v3041_v50 = vadd.f32 %v5166_v17, %v2908_v36 }
 0x381   : > { %3075 = vst.msk [vmem:[%s5173_s27 + $0x48] sm:$0xff] %vm3065_vm1, %v3042_v41 }
 0x382   : > { %3074 = vst.msk [vmem:[%s5173_s27 + $0x40] sm:$0xff] %vm3065_vm1, %v3041_v50  ;;  %v2957_v5 = vpop.f32.mrb[148].mxu1 }
 0x383   : > { %v2959_v2 = vpop.f32.mrb[149].mxu1 }
 0x384   : > { %v3374_v57 = vpop.f32.mrb[218].mxu0 }
 0x385   : > { %v2923_v46 = vadd.f32 %v3374_v57, %v2922_v44  ;;  %v2692_v38 = vpop.f32.mrb[219].mxu0 }
 0x386   : > { %v2918_v14 = vadd.f32 %v2917_v3, %v2692_v38  ;;  %v2962_v29 = vpop.f32.mrb[150].mxu1 }
 0x387   : > { %v3044_v62 = vadd.f32 %v5166_v17, %v2923_v46  ;;  %v2964_v9 = vpop.f32.mrb[151].mxu1 }
 0x388   : > { %v3043_v53 = vadd.f32 %v5166_v17, %v2918_v14 }
 0x389   : > { %3077 = vst.msk [vmem:[%s5173_s27 + $0x58] sm:$0xff] %vm3065_vm1, %v3044_v62 }
 0x38a   : > { %3076 = vst.msk [vmem:[%s5173_s27 + $0x50] sm:$0xff] %vm3065_vm1, %v3043_v53  ;;  %v2967_v28 = vpop.f32.mrb[152].mxu1 }
 0x38b   : > { %v2969_v15 = vpop.f32.mrb[153].mxu1 }
 0x38c   : > { %v3377_v55 = vpop.f32.mrb[220].mxu0 }
 0x38d   : > { %v2933_v40 = vadd.f32 %v3377_v55, %v2932_v26  ;;  %v2702_v43 = vpop.f32.mrb[221].mxu0 }
 0x38e   : > { %v2928_v20 = vadd.f32 %v2927_v7, %v2702_v43  ;;  %v2972_v35 = vpop.f32.mrb[154].mxu1 }
 0x38f   : > { %v3046_v47 = vadd.f32 %v5166_v17, %v2933_v40  ;;  %v2974_v24 = vpop.f32.mrb[155].mxu1 }
 0x390   : > { %v3045_v52 = vadd.f32 %v5166_v17, %v2928_v20 }
 0x391   : > { %3079 = vst.msk [vmem:[%s5173_s27 + $0x68] sm:$0xff] %vm3065_vm1, %v3046_v47 }
 0x392   : > { %3078 = vst.msk [vmem:[%s5173_s27 + $0x60] sm:$0xff] %vm3065_vm1, %v3045_v52  ;;  %v2977_v42 = vpop.f32.mrb[156].mxu1 }
 0x393   : > { %v2979_v23 = vpop.f32.mrb[157].mxu1 }
 0x394   : > { %v3380_v34 = vpop.f32.mrb[222].mxu0 }
 0x395   : > { %v2943_v3 = vadd.f32 %v3380_v34, %v2942_v6  ;;  %v2712_v58 = vpop.f32.mrb[223].mxu0 }
 0x396   : > { %v2938_v54 = vadd.f32 %v2937_v4, %v2712_v58  ;;  %v2982_v30 = vpop.f32.mrb[158].mxu1 }
 0x397   : > { %v3048_v48 = vadd.f32 %v5166_v17, %v2943_v3  ;;  %v2984_v51 = vpop.f32.mrb[159].mxu1 }
 0x398   : > { %v3047_v44 = vadd.f32 %v5166_v17, %v2938_v54 }
 0x399   : > { %3081 = vst.msk [vmem:[%s5173_s27 + $0x78] sm:$0xff] %vm3065_vm1, %v3048_v48 }
 0x39a   : > { %3080 = vst.msk [vmem:[%s5173_s27 + $0x70] sm:$0xff] %vm3065_vm1, %v3047_v44  ;;  %v2987_v61 = vpop.f32.mrb[160].mxu1 }
 0x39b   : > { %v2989_v22 = vpop.f32.mrb[161].mxu1 }
 0x39c   : > { %v3383_v18 = vpop.f32.mrb[224].mxu0 }
 0x39d   : > { %v2953_v7 = vadd.f32 %v3383_v18, %v2952_v1  ;;  %v2722_v63 = vpop.f32.mrb[225].mxu0 }
 0x39e   : > { %v2948_v37 = vadd.f32 %v2947_v32, %v2722_v63  ;;  %v2992_v59 = vpop.f32.mrb[162].mxu1 }
 0x39f   : > { %v3050_v12 = vadd.f32 %v5166_v17, %v2953_v7  ;;  %v2994_v39 = vpop.f32.mrb[163].mxu1 }
 0x3a0   : > { %v3049_v26 = vadd.f32 %v5166_v17, %v2948_v37 }
 0x3a1   : > { %3083 = vst.msk [vmem:[%s5173_s27 + $0x88] sm:$0xff] %vm3065_vm1, %v3050_v12 }
 0x3a2   : > { %3082 = vst.msk [vmem:[%s5173_s27 + $0x80] sm:$0xff] %vm3065_vm1, %v3049_v26  ;;  %v2997_v8 = vpop.f32.mrb[164].mxu1 }
 0x3a3   : > { %v2999_v31 = vpop.f32.mrb[165].mxu1 }
 0x3a4   : > { %v3386_v19 = vpop.f32.mrb[226].mxu0 }
 0x3a5   : > { %v2963_v4 = vadd.f32 %v3386_v19, %v2962_v29  ;;  %v2732_v21 = vpop.f32.mrb[227].mxu0 }
 0x3a6   : > { %v2958_v11 = vadd.f32 %v2957_v5, %v2732_v21  ;;  %v3002_v16 = vpop.f32.mrb[166].mxu1 }
 0x3a7   : > { %v3052_v33 = vadd.f32 %v5166_v17, %v2963_v4  ;;  %v3004_v27 = vpop.f32.mrb[167].mxu1 }
 0x3a8   : > { %v3051_v6 = vadd.f32 %v5166_v17, %v2958_v11 }
 0x3a9   : > { %3085 = vst.msk [vmem:[%s5173_s27 + $0x98] sm:$0xff] %vm3065_vm1, %v3052_v33 }
 0x3aa   : > { %3084 = vst.msk [vmem:[%s5173_s27 + $0x90] sm:$0xff] %vm3065_vm1, %v3051_v6  ;;  %v3007_v60 = vpop.f32.mrb[168].mxu1 }
 0x3ab   : > { %v3009_v10 = vpop.f32.mrb[169].mxu1 }
 0x3ac   : > { %v3389_v45 = vpop.f32.mrb[228].mxu0 }
 0x3ad   : > { %v2973_v32 = vadd.f32 %v3389_v45, %v2972_v35  ;;  %v2742_v0 = vpop.f32.mrb[229].mxu0 }
 0x3ae   : > { %v2968_v49 = vadd.f32 %v2967_v28, %v2742_v0  ;;  %v3012_v56 = vpop.f32.mrb[170].mxu1 }
 0x3af   : > { %v3054_v13 = vadd.f32 %v5166_v17, %v2973_v32  ;;  %v3014_v36 = vpop.f32.mrb[171].mxu1 }
 0x3b0   : > { %v3053_v1 = vadd.f32 %v5166_v17, %v2968_v49 }
 0x3b1   : > { %3087 = vst.msk [vmem:[%s5173_s27 + $0xa8] sm:$0xff] %vm3065_vm1, %v3054_v13 }
 0x3b2   : > { %3086 = vst.msk [vmem:[%s5173_s27 + $0xa0] sm:$0xff] %vm3065_vm1, %v3053_v1  ;;  %v3017_v41 = vpop.f32.mrb[172].mxu1 }
 0x3b3   : > { %v3019_v25 = vpop.f32.mrb[173].mxu1 }
 0x3b4   : > { %v3392_v50 = vpop.f32.mrb[230].mxu0 }
 0x3b5   : > { %v2983_v5 = vadd.f32 %v3392_v50, %v2982_v30  ;;  %v2752_v2 = vpop.f32.mrb[231].mxu0 }
 0x3b6   : > { %v2978_v57 = vadd.f32 %v2977_v42, %v2752_v2  ;;  %v3022_v46 = vpop.f32.mrb[174].mxu1 }
 0x3b7   : > { %v3056_v38 = vadd.f32 %v5166_v17, %v2983_v5  ;;  %v3024_v14 = vpop.f32.mrb[175].mxu1 }
 0x3b8   : > { %v3055_v29 = vadd.f32 %v5166_v17, %v2978_v57 }
 0x3b9   : > { %3089 = vst.msk [vmem:[%s5173_s27 + $0xb8] sm:$0xff] %vm3065_vm1, %v3056_v38 }
 0x3ba   : > { %3088 = vst.msk [vmem:[%s5173_s27 + $0xb0] sm:$0xff] %vm3065_vm1, %v3055_v29 }
 0x3bc   : > { %v3395_v62 = vpop.f32.mrb[232].mxu0 }
 0x3bd   : > { %v2993_v9 = vadd.f32 %v3395_v62, %v2992_v59  ;;  %v2762_v53 = vpop.f32.mrb[233].mxu0 }
 0x3be   : > { %v2988_v28 = vadd.f32 %v2987_v61, %v2762_v53 }
 0x3bf   : > { %v3058_v15 = vadd.f32 %v5166_v17, %v2993_v9 }
 0x3c0   : > { %v3057_v55 = vadd.f32 %v5166_v17, %v2988_v28 }
 0x3c1   : > { %3091 = vst.msk [vmem:[%s5173_s27 + $0xc8] sm:$0xff] %vm3065_vm1, %v3058_v15 }
 0x3c2   : > { %3090 = vst.msk [vmem:[%s5173_s27 + $0xc0] sm:$0xff] %vm3065_vm1, %v3057_v55 }
 0x3c4   : > { %v3398_v40 = vpop.f32.mrb[234].mxu0 }
 0x3c5   : > { %v3003_v43 = vadd.f32 %v3398_v40, %v3002_v16  ;;  %v2772_v20 = vpop.f32.mrb[235].mxu0 }
 0x3c6   : > { %v2998_v35 = vadd.f32 %v2997_v8, %v2772_v20 }
 0x3c7   : > { %v3060_v47 = vadd.f32 %v5166_v17, %v3003_v43 }
 0x3c8   : > { %v3059_v24 = vadd.f32 %v5166_v17, %v2998_v35 }
 0x3c9   : > { %3093 = vst.msk [vmem:[%s5173_s27 + $0xd8] sm:$0xff] %vm3065_vm1, %v3060_v47 }
 0x3ca   : > { %3092 = vst.msk [vmem:[%s5173_s27 + $0xd0] sm:$0xff] %vm3065_vm1, %v3059_v24 }
 0x3cc   : > { %v3401_v52 = vpop.f32.mrb[236].mxu0 }
 0x3cd   : > { %v3013_v42 = vadd.f32 %v3401_v52, %v3012_v56  ;;  %v2782_v23 = vpop.f32.mrb[237].mxu0 }
 0x3ce   : > { %v3008_v34 = vadd.f32 %v3007_v60, %v2782_v23 }
 0x3cf   : > { %v3062_v3 = vadd.f32 %v5166_v17, %v3013_v42 }
 0x3d0   : > { %v3061_v58 = vadd.f32 %v5166_v17, %v3008_v34 }
 0x3d1   : > { %3095 = vst.msk [vmem:[%s5173_s27 + $0xe8] sm:$0xff] %vm3065_vm1, %v3062_v3 }
 0x3d2   : > { %3094 = vst.msk [vmem:[%s5173_s27 + $0xe0] sm:$0xff] %vm3065_vm1, %v3061_v58 }
 0x3d4   : > { %v3404_v54 = vpop.f32.mrb[238].mxu0 }
 0x3d5   : > { %v3023_v30 = vadd.f32 %v3404_v54, %v3022_v46  ;;  %v2792_v48 = vpop.f32.mrb[239].mxu0 }
 0x3d6   : > { %v3018_v51 = vadd.f32 %v3017_v41, %v2792_v48 }
 0x3d7   : > { %v3064_v44 = vadd.f32 %v5166_v17, %v3023_v30 }
 0x3d8   : > { %v3063_v61 = vadd.f32 %v5166_v17, %v3018_v51 }
 0x3d9   : > { %3097 = vst.msk [vmem:[%s5173_s27 + $0xf8] sm:$0xff] %vm3065_vm1, %v3064_v44 }
 0x3da   : > { %3096 = vst.msk [vmem:[%s5173_s27 + $0xf0] sm:$0xff] %vm3065_vm1, %v3063_v61 }
 0x3db PF: > { %s21_s13 = sadd.s32 1, %s3865_s13  }
 0x3dc   : > { %p18_p3 = scmp.ge.s32.totalorder %s21_s13, 4  }
 0x3de   :  { %20 = sbr.rel (!%p18_p3) target bundleno = 1 (0x1), region = 95 }
 0x3e5   :  { %3120 = vsyncpa [#allocation3], 1 }
 0x3e6   :  { %3122 = vsyncpa [#allocation3 + $0x1], 1 }

</bundles_post_ra>
